<compile_context>
chip_gen: v7x
topology: tpu7x:2x2x1
jax: 0.10.0
libtpu: 0.0.40
codegen_flags: <defaults>
</compile_context>

<pallas_src>
import functools

import jax
import jax.numpy as jnp
import numpy as np
from jax import lax
from jax.experimental import pallas as pl
from jax.experimental.pallas import tpu as pltpu

G = 128        # lane width of one packed gate / hidden slot (per direction)
B_PAD = 8      # padded batch (f32 sublane count)


# ----------------------------- Pallas kernel --------------------------------

def _elmo_lstm_kernel(lam_ref, e0_ref,
                      wih1_ref, whh1_ref, b1_ref,
                      wih2_ref, whh2_ref, b2_ref,
                      wihw_ref, whhw_ref, bw_ref,
                      wlin_ref, blin_ref,
                      out_ref,
                      e1_sc, e2_sc, gx_sc, h_sc, c_sc,
                      *, h_bi, h_word, unroll):
    T, Bp, F = e0_ref.shape                    # F == 2 * G

    def gate_masks(rows, hw):
        lane = lax.broadcasted_iota(jnp.int32, (rows, G), 1)
        tanh_m = (lane >= 2 * hw) & (lane < 3 * hw)
        valid_m = lane < hw
        return tanh_m, valid_m

    def cell(gates, c_prev, hw, tanh_m, valid_m):
        """Packed-gate LSTM cell: gates (rows,G) holds [i|f|g|o] in lanes [0,4hw)."""
        act = jnp.where(tanh_m, jnp.tanh(gates), jax.nn.sigmoid(gates))
        f_g = pltpu.roll(act, shift=G - hw, axis=1)        # align f with lanes [0,hw)
        g_g = pltpu.roll(act, shift=G - 2 * hw, axis=1)
        o_g = pltpu.roll(act, shift=G - 3 * hw, axis=1)
        c_new = f_g * c_prev + act * g_g                   # act == i gate in [0,hw)
        h_new = jnp.where(valid_m, o_g * jnp.tanh(c_new), 0.0)
        c_new = jnp.where(valid_m, c_new, 0.0)
        return h_new, c_new

    def run_bilstm(x_ref, wih_r, whh_r, b_r, out_sc):
        # Hoisted bf16 projection for BOTH directions in one wide MXU matmul.
        xm = x_ref[...].reshape(T * Bp, F).astype(jnp.bfloat16)
        proj = jnp.dot(xm, wih_r[...],
                       preferred_element_type=jnp.float32) + b_r[...]
        gx_sc[...] = proj.reshape(T, Bp, F)                # fwd lanes [0,G), bwd [G,2G)

        h_sc[...] = jnp.zeros_like(h_sc)                   # rows [0,Bp)=fwd, [Bp,2Bp)=bwd
        c_sc[...] = jnp.zeros_like(c_sc)
        tanh_m, valid_m = gate_masks(2 * Bp, h_bi)
        whh = whh_r[...]                                   # (G, 2G) loop-invariant

        def step(t, carry):
            t_rev = T - 1 - t
            h = h_sc[...]
            c = c_sc[...]
            d = jnp.dot(h, whh, preferred_element_type=jnp.float32)   # (2Bp, 2G)
            gates = jnp.concatenate(
                [d[0:Bp, 0:G] + gx_sc[t, :, 0:G],                     # fwd @ time t
                 d[Bp:2 * Bp, G:2 * G] + gx_sc[t_rev, :, G:2 * G]],   # bwd @ time T-1-t
                axis=0)                                               # (2Bp, G)
            h_new, c_new = cell(gates, c, h_bi, tanh_m, valid_m)
            h_sc[...] = h_new
            c_sc[...] = c_new
            out_sc[t, :, 0:G] = h_new[0:Bp]                  # fwd h_t
            out_sc[t_rev, :, G:2 * G] = h_new[Bp:2 * Bp]     # bwd h_{T-1-t}
            return carry

        lax.fori_loop(0, T, step, 0, unroll=unroll)

    # ---- two BiLSTM layers, activations resident in VMEM ------------------
    run_bilstm(e0_ref, wih1_ref, whh1_ref, b1_ref, e1_sc)
    run_bilstm(e1_sc, wih2_ref, whh2_ref, b2_ref, e2_sc)

    # ---- ELMo scalar mix -> word-level LSTM -> last hidden -> Linear ------
    word = (lam_ref[0] * e0_ref[...]
            + lam_ref[1] * e1_sc[...]
            + lam_ref[2] * e2_sc[...])                       # (T, Bp, F) f32
    proj = jnp.dot(word.reshape(T * Bp, F).astype(jnp.bfloat16), wihw_ref[...],
                   preferred_element_type=jnp.float32) + bw_ref[...]
    gx_sc[:, :, 0:G] = proj.reshape(T, Bp, G)

    h_sc[...] = jnp.zeros_like(h_sc)
    c_sc[...] = jnp.zeros_like(c_sc)
    tanh_m, valid_m = gate_masks(Bp, h_word)
    whh_w = whhw_ref[...]                                    # (G, G)

    def wstep(t, carry):
        h = h_sc[0:Bp, :]
        c = c_sc[0:Bp, :]
        gates = (jnp.dot(h, whh_w, preferred_element_type=jnp.float32)
                 + gx_sc[t, :, 0:G])
        h_new, c_new = cell(gates, c, h_word, tanh_m, valid_m)
        h_sc[0:Bp, :] = h_new
        c_sc[0:Bp, :] = c_new
        return carry

    lax.fori_loop(0, T, wstep, 0, unroll=unroll)

    # Classifier on the last hidden state; output padded to a full 128-lane
    # slot so the final store is an unmasked lane-dense (8,128) vst.
    out_ref[...] = (jnp.dot(h_sc[0:Bp, :], wlin_ref[...],
                            preferred_element_type=jnp.float32) + blin_ref[...])


# ----------------------------- wrapper ---------------------------------------

_VMEM = pl.BlockSpec(memory_space=pltpu.MemorySpace.VMEM)
_SMEM = pl.BlockSpec(memory_space=pltpu.MemorySpace.SMEM)


def elmo_lstm_fused(lam, e0, weights, *, h_bi, h_word):
    """e0: (T, B_PAD, 2*G) padded embeddings -> (B_PAD, G) padded logits."""
    T, Bp, F = e0.shape
    unroll = True if T <= 16 else 8            # bounded unroll for long sequences

    kernel = functools.partial(_elmo_lstm_kernel, h_bi=h_bi, h_word=h_word,
                               unroll=unroll)

    scratch_shapes = [pltpu.VMEM((T, Bp, F), jnp.float32),   # e1
                      pltpu.VMEM((T, Bp, F), jnp.float32),   # e2
                      pltpu.VMEM((T, Bp, F), jnp.float32),   # gx (reused per layer)
                      pltpu.VMEM((2 * Bp, G), jnp.float32),  # h (fwd rows | bwd rows)
                      pltpu.VMEM((2 * Bp, G), jnp.float32)]  # c

    operands = (lam, e0) + tuple(weights)

    # Explicit VMEM budget (feedback): operands (double-buffered by the
    # runtime) + resident scratch + margin, clamped to v7x's 64 MiB.
    op_bytes = sum(int(np.prod(a.shape)) * a.dtype.itemsize for a in operands)
    sc_bytes = 3 * T * Bp * F * 4 + 2 * (2 * Bp * G * 4) + Bp * G * 4
    vmem_limit = int(min(max(2 * op_bytes + sc_bytes + (4 << 20), 8 << 20),
                         64 << 20))

    return pl.pallas_call(
        kernel,
        out_shape=jax.ShapeDtypeStruct((Bp, G), jnp.float32),
        in_specs=[_SMEM] + [_VMEM] * (len(operands) - 1),
        out_specs=_VMEM,
        scratch_shapes=scratch_shapes,
        compiler_params=pltpu.CompilerParams(vmem_limit_bytes=vmem_limit),
    )(*operands)


# ----------------------------- parameters ------------------------------------

def _uniform(key, shape, scale):
    return jax.random.uniform(key, shape, jnp.float32, -scale, scale)


def make_lstm_params(key, in_dim, hidden):
    """Deterministic PyTorch-style LSTM params, pre-transposed (logical)."""
    k1, k2, k3, k4 = jax.random.split(key, 4)
    s = 1.0 / np.sqrt(hidden)
    w_ih = _uniform(k1, (4 * hidden, in_dim), s)
    w_hh = _uniform(k2, (4 * hidden, hidden), s)
    b_ih = _uniform(k3, (4 * hidden,), s)
    b_hh = _uniform(k4, (4 * hidden,), s)
    return (w_ih.T, w_hh.T, (b_ih + b_hh).reshape(1, 4 * hidden))


def init_params(key, vocab, embd_dim, hidden_dim, output_dim):
    keys = jax.random.split(key, 8)
    h_half = embd_dim // 2        # bilstm hidden -> bidirectional out == embd_dim
    s_lin = 1.0 / np.sqrt(hidden_dim)
    return {
        "embedding": jax.random.normal(keys[0], (vocab, embd_dim), jnp.float32),
        "bilstm_l1_f": make_lstm_params(keys[1], embd_dim, h_half),
        "bilstm_l1_b": make_lstm_params(keys[2], embd_dim, h_half),
        "bilstm_l2_f": make_lstm_params(keys[3], embd_dim, h_half),
        "bilstm_l2_b": make_lstm_params(keys[4], embd_dim, h_half),
        "lstm": make_lstm_params(keys[5], embd_dim, hidden_dim),
        "linear_w": _uniform(keys[6], (output_dim, hidden_dim), s_lin).T,  # (H,O)
        "linear_b": _uniform(keys[7], (1, output_dim), s_lin),
        "lambda": jnp.array([1.0 / 3, 1.0 / 3, 1.0 / 3], jnp.float32),
    }


# -------- pack logical params into the packed-gate / lane-padded layout ------

def _pad_cols(w, cols_pad):
    out = jnp.zeros((w.shape[0], cols_pad), jnp.float32)
    return out.at[:, 0:w.shape[1]].set(w)


def _pad_rows_split(w, half):
    """Input-feature rows: feature j<half -> row j, j>=half -> row G+(j-half)."""
    out = jnp.zeros((2 * G, w.shape[1]), jnp.float32)
    out = out.at[0:half].set(w[0:half])
    out = out.at[G:G + half].set(w[half:2 * half])
    return out


def _pad_rows_top(w, rows_pad):
    out = jnp.zeros((rows_pad, w.shape[1]), jnp.float32)
    return out.at[0:w.shape[0]].set(w)


def pack_params(p, embd_dim, hidden_dim):
    half = embd_dim // 2                       # BiLSTM per-direction hidden
    assert 4 * half <= G and 4 * hidden_dim <= G, \
        "packed-gate layout requires 4*hidden <= 128"

    def pack_dir(prm):
        wih_t, whh_t, b = prm                  # (in,4h), (h,4h), (1,4h)
        return (_pad_rows_split(_pad_cols(wih_t, G), half),   # (2G, G)
                _pad_rows_top(_pad_cols(whh_t, G), G),        # (G,  G)
                _pad_cols(b, G))                               # (1,  G)

    def pack_bilstm(fwd, bwd):
        f = pack_dir(fwd)
        b = pack_dir(bwd)
        return (jnp.concatenate([f[0], b[0]], axis=1).astype(jnp.bfloat16),  # (2G,2G)
                jnp.concatenate([f[1], b[1]], axis=1),                        # (G, 2G)
                jnp.concatenate([f[2], b[2]], axis=1))                        # (1, 2G)

    emb = p["embedding"]
    emb_pad = jnp.zeros((emb.shape[0], 2 * G), jnp.float32)
    emb_pad = emb_pad.at[:, 0:half].set(emb[:, 0:half])
    emb_pad = emb_pad.at[:, G:G + half].set(emb[:, half:])

    wih_w, whh_w, b_w = p["lstm"]
    wihw = _pad_rows_split(_pad_cols(wih_w, G), half).astype(jnp.bfloat16)  # (2G,G)
    whhw = _pad_rows_top(_pad_cols(whh_w, G), G)                            # (G, G)
    bw = _pad_cols(b_w, G)                                                  # (1, G)

    wlin = _pad_rows_top(_pad_cols(p["linear_w"], G), G)                    # (G, G)
    blin = _pad_cols(p["linear_b"], G)                                      # (1, G)

    l1 = pack_bilstm(p["bilstm_l1_f"], p["bilstm_l1_b"])
    l2 = pack_bilstm(p["bilstm_l2_f"], p["bilstm_l2_b"])

    return {
        "emb_pad": emb_pad,
        "weights": l1 + l2 + (wihw, whhw, bw, wlin, blin),
        "lambda": p["lambda"],
    }


# ----------------------------- forward pass ----------------------------------

def lstm_model_forward(packed, x, *, h_bi, h_word, out_dim):
    """Mirrors LSTM_Model.forward: returns (final_layer, lambda_params)."""
    B, T = x.shape
    # Embedding gather stays in plain JAX glue (data-dependent row gather);
    # the table is pre-laid-out in the padded [fwd-slot | bwd-slot] format.
    emb = jnp.take(packed["emb_pad"], x, axis=0)                # (B, T, 2G)
    e0 = jnp.transpose(emb, (1, 0, 2))                          # (T, B, 2G)
    e0 = jnp.pad(e0, ((0, 0), (0, B_PAD - B), (0, 0)))          # (T, Bp, 2G)
    out_pad = elmo_lstm_fused(packed["lambda"], e0, packed["weights"],
                              h_bi=h_bi, h_word=h_word)         # (Bp, G)
    return out_pad[:B, :out_dim], packed["lambda"]


# ----------------------------- plain-JAX reference ---------------------------

def _ref_lstm(x_tm, w_ih_t, w_hh_t, b):
    T, B, _ = x_tm.shape
    H = w_hh_t.shape[0]
    hp = jax.lax.Precision.HIGHEST

    def step(carry, x_t):
        h, c = carry
        g = (jnp.dot(x_t, w_ih_t, precision=hp)
             + jnp.dot(h, w_hh_t, precision=hp) + b[0])
        i = jax.nn.sigmoid(g[:, :H])
        f = jax.nn.sigmoid(g[:, H:2 * H])
        gg = jnp.tanh(g[:, 2 * H:3 * H])
        o = jax.nn.sigmoid(g[:, 3 * H:4 * H])
        c = f * c + i * gg
        h = o * jnp.tanh(c)
        return (h, c), h

    init = (jnp.zeros((B, H), jnp.float32), jnp.zeros((B, H), jnp.float32))
    _, hs = lax.scan(step, init, x_tm)
    return hs


def _ref_bilstm(x_tm, fwd, bwd):
    return jnp.concatenate([_ref_lstm(x_tm, *fwd),
                            _ref_lstm(x_tm[::-1], *bwd)[::-1]], axis=-1)


def _reference_forward(params, x):
    hp = jax.lax.Precision.HIGHEST
    emb = jnp.take(params["embedding"], x, axis=0)
    e0 = jnp.transpose(emb, (1, 0, 2))
    e1 = _ref_bilstm(e0, params["bilstm_l1_f"], params["bilstm_l1_b"])
    e2 = _ref_bilstm(e1, params["bilstm_l2_f"], params["bilstm_l2_b"])
    lam = params["lambda"]
    word = lam[0] * e0 + lam[1] * e1 + lam[2] * e2
    h_seq = _ref_lstm(word, *params["lstm"])
    out = jnp.dot(h_seq[-1], params["linear_w"], precision=hp) + params["linear_b"]
    return out, lam


# ----------------------------- main -------------------------------------------

if __name__ == "__main__":
    B, T = 2, 8
    vocab, embd_dim, hidden_dim, output_dim = 50, 32, 32, 4

    key = jax.random.PRNGKey(0)
    kp, kx = jax.random.split(key)
    params = init_params(kp, vocab, embd_dim, hidden_dim, output_dim)
    packed = pack_params(params, embd_dim, hidden_dim)
    x = jax.random.randint(kx, (B, T), 0, vocab, dtype=jnp.int32)

    fwd = jax.jit(functools.partial(lstm_model_forward,
                                    h_bi=embd_dim // 2,
                                    h_word=hidden_dim,
                                    out_dim=output_dim))
    out, lam = fwd(packed, x)
    out = jax.block_until_ready(out)
    lam = jax.block_until_ready(lam)

    assert out.shape == (B, output_dim)
    assert lam.shape == (3,)

    ref_out, _ = jax.jit(_reference_forward)(params, x)
    # Tolerance sized for the bf16 input-projection matmuls (f32 accumulate).
    np.testing.assert_allclose(np.asarray(out), np.asarray(ref_out),
                               rtol=2e-2, atol=3e-2)

    print("KERNEL_OK")
</pallas_src>

<mosaic_0001>
module attributes {stable_mosaic.version = 11 : i64} {
  func.func @_elmo_lstm_kernel(%arg0: memref<3xf32, #tpu.memory_space<smem>>, %arg1: memref<8x8x256xf32, #tpu.memory_space<vmem>>, %arg2: memref<256x256xbf16, #tpu.memory_space<vmem>>, %arg3: memref<128x256xf32, #tpu.memory_space<vmem>>, %arg4: memref<1x256xf32, #tpu.memory_space<vmem>>, %arg5: memref<256x256xbf16, #tpu.memory_space<vmem>>, %arg6: memref<128x256xf32, #tpu.memory_space<vmem>>, %arg7: memref<1x256xf32, #tpu.memory_space<vmem>>, %arg8: memref<256x128xbf16, #tpu.memory_space<vmem>>, %arg9: memref<128x128xf32, #tpu.memory_space<vmem>>, %arg10: memref<1x128xf32, #tpu.memory_space<vmem>>, %arg11: memref<128x128xf32, #tpu.memory_space<vmem>>, %arg12: memref<1x128xf32, #tpu.memory_space<vmem>>, %arg13: memref<8x128xf32, #tpu.memory_space<vmem>>, %arg14: memref<8x8x256xf32, #tpu.memory_space<vmem>>, %arg15: memref<8x8x256xf32, #tpu.memory_space<vmem>>, %arg16: memref<8x8x256xf32, #tpu.memory_space<vmem>>, %arg17: memref<16x128xf32, #tpu.memory_space<vmem>>, %arg18: memref<16x128xf32, #tpu.memory_space<vmem>>) attributes {dimension_semantics = [], scalar_prefetch = 0 : i64, scratch_operands = 5 : i64, tpu.core_type = #tpu.core_type<tc>} {
    %c0 = arith.constant 0 : index
    %c0_0 = arith.constant 0 : index
    %c0_1 = arith.constant 0 : index
    %0 = vector.load %arg1[%c0, %c0_0, %c0_1] : memref<8x8x256xf32, #tpu.memory_space<vmem>>, vector<8x8x256xf32>
    %1 = vector.shape_cast %0 : vector<8x8x256xf32> to vector<64x256xf32>
    %2 = arith.truncf %1 : vector<64x256xf32> to vector<64x256xbf16>
    %c0_2 = arith.constant 0 : index
    %c0_3 = arith.constant 0 : index
    %3 = vector.load %arg2[%c0_2, %c0_3] : memref<256x256xbf16, #tpu.memory_space<vmem>>, vector<256x256xbf16>
    %cst = arith.constant dense<0.000000e+00> : vector<64x256xf32>
    %4 = tpu.matmul %2, %3, %cst {dimension_numbers = #tpu.dot_dimension_numbers<[1], [0], [0], [1], [0, 0, 1, 1], [], []>} : vector<64x256xbf16>, vector<256x256xbf16>, vector<64x256xf32> -> vector<64x256xf32>
    %c0_4 = arith.constant 0 : index
    %c0_5 = arith.constant 0 : index
    %5 = vector.load %arg4[%c0_4, %c0_5] : memref<1x256xf32, #tpu.memory_space<vmem>>, vector<1x256xf32>
    %6 = vector.broadcast %5 : vector<1x256xf32> to vector<64x256xf32>
    %7 = arith.addf %4, %6 : vector<64x256xf32>
    %8 = vector.shape_cast %7 : vector<64x256xf32> to vector<8x8x256xf32>
    %c0_6 = arith.constant 0 : index
    %c0_7 = arith.constant 0 : index
    %c0_8 = arith.constant 0 : index
    %9 = vector.load %arg16[%c0_6, %c0_7, %c0_8] : memref<8x8x256xf32, #tpu.memory_space<vmem>>, vector<8x8x256xf32>
    tpu.vector_store %arg16[%c0_6, %c0_7, %c0_8], %8 {strides = array<i32>} : memref<8x8x256xf32, #tpu.memory_space<vmem>>, vector<8x8x256xf32>,
    %cst_9 = arith.constant 0.000000e+00 : f32
    %10 = vector.broadcast %cst_9 : f32 to vector<16x128xf32>
    %c0_10 = arith.constant 0 : index
    %c0_11 = arith.constant 0 : index
    %11 = vector.load %arg17[%c0_10, %c0_11] : memref<16x128xf32, #tpu.memory_space<vmem>>, vector<16x128xf32>
    tpu.vector_store %arg17[%c0_10, %c0_11], %10 {strides = array<i32>} : memref<16x128xf32, #tpu.memory_space<vmem>>, vector<16x128xf32>,
    %cst_12 = arith.constant 0.000000e+00 : f32
    %12 = vector.broadcast %cst_12 : f32 to vector<16x128xf32>
    %c0_13 = arith.constant 0 : index
    %c0_14 = arith.constant 0 : index
    %13 = vector.load %arg18[%c0_13, %c0_14] : memref<16x128xf32, #tpu.memory_space<vmem>>, vector<16x128xf32>
    tpu.vector_store %arg18[%c0_13, %c0_14], %12 {strides = array<i32>} : memref<16x128xf32, #tpu.memory_space<vmem>>, vector<16x128xf32>,
    %14 = tpu.iota {dimensions = array<i32: 1>} : vector<16x128xi32>
    %c32_i32 = arith.constant 32 : i32
    %15 = vector.broadcast %c32_i32 : i32 to vector<16x128xi32>
    %16 = arith.cmpi sge, %14, %15 : vector<16x128xi32>
    %c48_i32 = arith.constant 48 : i32
    %17 = vector.broadcast %c48_i32 : i32 to vector<16x128xi32>
    %18 = arith.cmpi slt, %14, %17 : vector<16x128xi32>
    %19 = arith.andi %16, %18 : vector<16x128xi1>
    %c16_i32 = arith.constant 16 : i32
    %20 = vector.broadcast %c16_i32 : i32 to vector<16x128xi32>
    %21 = arith.cmpi slt, %14, %20 : vector<16x128xi32>
    %c0_15 = arith.constant 0 : index
    %c0_16 = arith.constant 0 : index
    %22 = vector.load %arg3[%c0_15, %c0_16] : memref<128x256xf32, #tpu.memory_space<vmem>>, vector<128x256xf32>
    %c0_i32 = arith.constant 0 : i32
    %c7_i32 = arith.constant 7 : i32
    %23 = arith.subi %c7_i32, %c0_i32 : i32
    %c0_17 = arith.constant 0 : index
    %c0_18 = arith.constant 0 : index
    %24 = vector.load %arg17[%c0_17, %c0_18] : memref<16x128xf32, #tpu.memory_space<vmem>>, vector<16x128xf32>
    %c0_19 = arith.constant 0 : index
    %c0_20 = arith.constant 0 : index
    %25 = vector.load %arg18[%c0_19, %c0_20] : memref<16x128xf32, #tpu.memory_space<vmem>>, vector<16x128xf32>
    %cst_21 = arith.constant dense<0.000000e+00> : vector<16x256xf32>
    %26 = tpu.matmul %24, %22, %cst_21 {dimension_numbers = #tpu.dot_dimension_numbers<[1], [0], [0], [1], [0, 0, 1, 1], [], []>} : vector<16x128xf32>, vector<128x256xf32>, vector<16x256xf32> -> vector<16x256xf32>
    %27 = vector.extract_strided_slice %26 {offsets = [0, 0], sizes = [8, 128], strides = [1, 1]} : vector<16x256xf32> to vector<8x128xf32>
    %28 = arith.index_cast %c0_i32 : i32 to index
    %c0_22 = arith.constant 0 : index
    %c0_23 = arith.constant 0 : index
    %29 = vector.load %arg16[%28, %c0_22, %c0_23] : memref<8x8x256xf32, #tpu.memory_space<vmem>>, vector<1x8x128xf32>
    %30 = vector.shape_cast %29 : vector<1x8x128xf32> to vector<8x128xf32>
    %31 = arith.addf %27, %30 : vector<8x128xf32>
    %32 = vector.extract_strided_slice %26 {offsets = [8, 128], sizes = [8, 128], strides = [1, 1]} : vector<16x256xf32> to vector<8x128xf32>
    %33 = arith.index_cast %23 : i32 to index
    %c0_24 = arith.constant 0 : index
    %c128 = arith.constant 128 : index
    %34 = vector.load %arg16[%33, %c0_24, %c128] : memref<8x8x256xf32, #tpu.memory_space<vmem>>, vector<1x8x128xf32>
    %35 = vector.shape_cast %34 : vector<1x8x128xf32> to vector<8x128xf32>
    %36 = arith.addf %32, %35 : vector<8x128xf32>
    %37 = tpu.concatenate %31, %36 in 0 : vector<8x128xf32>, vector<8x128xf32> -> vector<16x128xf32>
    %38 = math.tanh %37 : vector<16x128xf32>
    %39 = arith.negf %37 : vector<16x128xf32>
    %40 = math.exp %39 : vector<16x128xf32>
    %cst_25 = arith.constant 1.000000e+00 : f32
    %41 = vector.broadcast %cst_25 : f32 to vector<16x128xf32>
    %42 = arith.addf %41, %40 : vector<16x128xf32>
    %43 = arith.divf %41, %42 : vector<16x128xf32>
    %44 = arith.select %19, %38, %43 : vector<16x128xi1>, vector<16x128xf32>
    %c112_i32 = arith.constant 112 : i32
    %45 = tpu.dynamic_rotate %44 by %c112_i32 dim 1 : vector<16x128xf32>, i32 -> vector<16x128xf32>
    %c96_i32 = arith.constant 96 : i32
    %46 = tpu.dynamic_rotate %44 by %c96_i32 dim 1 : vector<16x128xf32>, i32 -> vector<16x128xf32>
    %c80_i32 = arith.constant 80 : i32
    %47 = tpu.dynamic_rotate %44 by %c80_i32 dim 1 : vector<16x128xf32>, i32 -> vector<16x128xf32>
    %48 = arith.mulf %45, %25 : vector<16x128xf32>
    %49 = arith.mulf %44, %46 : vector<16x128xf32>
    %50 = arith.addf %48, %49 : vector<16x128xf32>
    %51 = math.tanh %50 : vector<16x128xf32>
    %52 = arith.mulf %47, %51 : vector<16x128xf32>
    %cst_26 = arith.constant 0.000000e+00 : f32
    %53 = vector.broadcast %cst_26 : f32 to vector<16x128xf32>
    %54 = arith.select %21, %52, %53 : vector<16x128xi1>, vector<16x128xf32>
    %cst_27 = arith.constant 0.000000e+00 : f32
    %55 = vector.broadcast %cst_27 : f32 to vector<16x128xf32>
    %56 = arith.select %21, %50, %55 : vector<16x128xi1>, vector<16x128xf32>
    %c0_28 = arith.constant 0 : index
    %c0_29 = arith.constant 0 : index
    %57 = vector.load %arg17[%c0_28, %c0_29] : memref<16x128xf32, #tpu.memory_space<vmem>>, vector<16x128xf32>
    tpu.vector_store %arg17[%c0_28, %c0_29], %54 {strides = array<i32>} : memref<16x128xf32, #tpu.memory_space<vmem>>, vector<16x128xf32>,
    %c0_30 = arith.constant 0 : index
    %c0_31 = arith.constant 0 : index
    %58 = vector.load %arg18[%c0_30, %c0_31] : memref<16x128xf32, #tpu.memory_space<vmem>>, vector<16x128xf32>
    tpu.vector_store %arg18[%c0_30, %c0_31], %56 {strides = array<i32>} : memref<16x128xf32, #tpu.memory_space<vmem>>, vector<16x128xf32>,
    %59 = vector.extract_strided_slice %54 {offsets = [0, 0], sizes = [8, 128], strides = [1, 1]} : vector<16x128xf32> to vector<8x128xf32>
    %60 = arith.index_cast %c0_i32 : i32 to index
    %c0_32 = arith.constant 0 : index
    %c0_33 = arith.constant 0 : index
    %61 = vector.load %arg14[%60, %c0_32, %c0_33] : memref<8x8x256xf32, #tpu.memory_space<vmem>>, vector<1x8x128xf32>
    %62 = vector.shape_cast %61 : vector<1x8x128xf32> to vector<8x128xf32>
    %63 = vector.shape_cast %59 : vector<8x128xf32> to vector<1x8x128xf32>
    tpu.vector_store %arg14[%60, %c0_32, %c0_33], %63 {strides = array<i32>} : memref<8x8x256xf32, #tpu.memory_space<vmem>>, vector<1x8x128xf32>,
    %64 = vector.extract_strided_slice %54 {offsets = [8, 0], sizes = [8, 128], strides = [1, 1]} : vector<16x128xf32> to vector<8x128xf32>
    %65 = arith.index_cast %23 : i32 to index
    %c0_34 = arith.constant 0 : index
    %c128_35 = arith.constant 128 : index
    %66 = vector.load %arg14[%65, %c0_34, %c128_35] : memref<8x8x256xf32, #tpu.memory_space<vmem>>, vector<1x8x128xf32>
    %67 = vector.shape_cast %66 : vector<1x8x128xf32> to vector<8x128xf32>
    %68 = vector.shape_cast %64 : vector<8x128xf32> to vector<1x8x128xf32>
    tpu.vector_store %arg14[%65, %c0_34, %c128_35], %68 {strides = array<i32>} : memref<8x8x256xf32, #tpu.memory_space<vmem>>, vector<1x8x128xf32>,
    %c1_i32 = arith.constant 1 : i32
    %c7_i32_36 = arith.constant 7 : i32
    %69 = arith.subi %c7_i32_36, %c1_i32 : i32
    %c0_37 = arith.constant 0 : index
    %c0_38 = arith.constant 0 : index
    %70 = vector.load %arg17[%c0_37, %c0_38] : memref<16x128xf32, #tpu.memory_space<vmem>>, vector<16x128xf32>
    %c0_39 = arith.constant 0 : index
    %c0_40 = arith.constant 0 : index
    %71 = vector.load %arg18[%c0_39, %c0_40] : memref<16x128xf32, #tpu.memory_space<vmem>>, vector<16x128xf32>
    %cst_41 = arith.constant dense<0.000000e+00> : vector<16x256xf32>
    %72 = tpu.matmul %70, %22, %cst_41 {dimension_numbers = #tpu.dot_dimension_numbers<[1], [0], [0], [1], [0, 0, 1, 1], [], []>} : vector<16x128xf32>, vector<128x256xf32>, vector<16x256xf32> -> vector<16x256xf32>
    %73 = vector.extract_strided_slice %72 {offsets = [0, 0], sizes = [8, 128], strides = [1, 1]} : vector<16x256xf32> to vector<8x128xf32>
    %74 = arith.index_cast %c1_i32 : i32 to index
    %c0_42 = arith.constant 0 : index
    %c0_43 = arith.constant 0 : index
    %75 = vector.load %arg16[%74, %c0_42, %c0_43] : memref<8x8x256xf32, #tpu.memory_space<vmem>>, vector<1x8x128xf32>
    %76 = vector.shape_cast %75 : vector<1x8x128xf32> to vector<8x128xf32>
    %77 = arith.addf %73, %76 : vector<8x128xf32>
    %78 = vector.extract_strided_slice %72 {offsets = [8, 128], sizes = [8, 128], strides = [1, 1]} : vector<16x256xf32> to vector<8x128xf32>
    %79 = arith.index_cast %69 : i32 to index
    %c0_44 = arith.constant 0 : index
    %c128_45 = arith.constant 128 : index
    %80 = vector.load %arg16[%79, %c0_44, %c128_45] : memref<8x8x256xf32, #tpu.memory_space<vmem>>, vector<1x8x128xf32>
    %81 = vector.shape_cast %80 : vector<1x8x128xf32> to vector<8x128xf32>
    %82 = arith.addf %78, %81 : vector<8x128xf32>
    %83 = tpu.concatenate %77, %82 in 0 : vector<8x128xf32>, vector<8x128xf32> -> vector<16x128xf32>
    %84 = math.tanh %83 : vector<16x128xf32>
    %85 = arith.negf %83 : vector<16x128xf32>
    %86 = math.exp %85 : vector<16x128xf32>
    %cst_46 = arith.constant 1.000000e+00 : f32
    %87 = vector.broadcast %cst_46 : f32 to vector<16x128xf32>
    %88 = arith.addf %87, %86 : vector<16x128xf32>
    %89 = arith.divf %87, %88 : vector<16x128xf32>
    %90 = arith.select %19, %84, %89 : vector<16x128xi1>, vector<16x128xf32>
    %c112_i32_47 = arith.constant 112 : i32
    %91 = tpu.dynamic_rotate %90 by %c112_i32_47 dim 1 : vector<16x128xf32>, i32 -> vector<16x128xf32>
    %c96_i32_48 = arith.constant 96 : i32
    %92 = tpu.dynamic_rotate %90 by %c96_i32_48 dim 1 : vector<16x128xf32>, i32 -> vector<16x128xf32>
    %c80_i32_49 = arith.constant 80 : i32
    %93 = tpu.dynamic_rotate %90 by %c80_i32_49 dim 1 : vector<16x128xf32>, i32 -> vector<16x128xf32>
    %94 = arith.mulf %91, %71 : vector<16x128xf32>
    %95 = arith.mulf %90, %92 : vector<16x128xf32>
    %96 = arith.addf %94, %95 : vector<16x128xf32>
    %97 = math.tanh %96 : vector<16x128xf32>
    %98 = arith.mulf %93, %97 : vector<16x128xf32>
    %cst_50 = arith.constant 0.000000e+00 : f32
    %99 = vector.broadcast %cst_50 : f32 to vector<16x128xf32>
    %100 = arith.select %21, %98, %99 : vector<16x128xi1>, vector<16x128xf32>
    %cst_51 = arith.constant 0.000000e+00 : f32
    %101 = vector.broadcast %cst_51 : f32 to vector<16x128xf32>
    %102 = arith.select %21, %96, %101 : vector<16x128xi1>, vector<16x128xf32>
    %c0_52 = arith.constant 0 : index
    %c0_53 = arith.constant 0 : index
    %103 = vector.load %arg17[%c0_52, %c0_53] : memref<16x128xf32, #tpu.memory_space<vmem>>, vector<16x128xf32>
    tpu.vector_store %arg17[%c0_52, %c0_53], %100 {strides = array<i32>} : memref<16x128xf32, #tpu.memory_space<vmem>>, vector<16x128xf32>,
    %c0_54 = arith.constant 0 : index
    %c0_55 = arith.constant 0 : index
    %104 = vector.load %arg18[%c0_54, %c0_55] : memref<16x128xf32, #tpu.memory_space<vmem>>, vector<16x128xf32>
    tpu.vector_store %arg18[%c0_54, %c0_55], %102 {strides = array<i32>} : memref<16x128xf32, #tpu.memory_space<vmem>>, vector<16x128xf32>,
    %105 = vector.extract_strided_slice %100 {offsets = [0, 0], sizes = [8, 128], strides = [1, 1]} : vector<16x128xf32> to vector<8x128xf32>
    %106 = arith.index_cast %c1_i32 : i32 to index
    %c0_56 = arith.constant 0 : index
    %c0_57 = arith.constant 0 : index
    %107 = vector.load %arg14[%106, %c0_56, %c0_57] : memref<8x8x256xf32, #tpu.memory_space<vmem>>, vector<1x8x128xf32>
    %108 = vector.shape_cast %107 : vector<1x8x128xf32> to vector<8x128xf32>
    %109 = vector.shape_cast %105 : vector<8x128xf32> to vector<1x8x128xf32>
    tpu.vector_store %arg14[%106, %c0_56, %c0_57], %109 {strides = array<i32>} : memref<8x8x256xf32, #tpu.memory_space<vmem>>, vector<1x8x128xf32>,
    %110 = vector.extract_strided_slice %100 {offsets = [8, 0], sizes = [8, 128], strides = [1, 1]} : vector<16x128xf32> to vector<8x128xf32>
    %111 = arith.index_cast %69 : i32 to index
    %c0_58 = arith.constant 0 : index
    %c128_59 = arith.constant 128 : index
    %112 = vector.load %arg14[%111, %c0_58, %c128_59] : memref<8x8x256xf32, #tpu.memory_space<vmem>>, vector<1x8x128xf32>
    %113 = vector.shape_cast %112 : vector<1x8x128xf32> to vector<8x128xf32>
    %114 = vector.shape_cast %110 : vector<8x128xf32> to vector<1x8x128xf32>
    tpu.vector_store %arg14[%111, %c0_58, %c128_59], %114 {strides = array<i32>} : memref<8x8x256xf32, #tpu.memory_space<vmem>>, vector<1x8x128xf32>,
    %c2_i32 = arith.constant 2 : i32
    %c7_i32_60 = arith.constant 7 : i32
    %115 = arith.subi %c7_i32_60, %c2_i32 : i32
    %c0_61 = arith.constant 0 : index
    %c0_62 = arith.constant 0 : index
    %116 = vector.load %arg17[%c0_61, %c0_62] : memref<16x128xf32, #tpu.memory_space<vmem>>, vector<16x128xf32>
    %c0_63 = arith.constant 0 : index
    %c0_64 = arith.constant 0 : index
    %117 = vector.load %arg18[%c0_63, %c0_64] : memref<16x128xf32, #tpu.memory_space<vmem>>, vector<16x128xf32>
    %cst_65 = arith.constant dense<0.000000e+00> : vector<16x256xf32>
    %118 = tpu.matmul %116, %22, %cst_65 {dimension_numbers = #tpu.dot_dimension_numbers<[1], [0], [0], [1], [0, 0, 1, 1], [], []>} : vector<16x128xf32>, vector<128x256xf32>, vector<16x256xf32> -> vector<16x256xf32>
    %119 = vector.extract_strided_slice %118 {offsets = [0, 0], sizes = [8, 128], strides = [1, 1]} : vector<16x256xf32> to vector<8x128xf32>
    %120 = arith.index_cast %c2_i32 : i32 to index
    %c0_66 = arith.constant 0 : index
    %c0_67 = arith.constant 0 : index
    %121 = vector.load %arg16[%120, %c0_66, %c0_67] : memref<8x8x256xf32, #tpu.memory_space<vmem>>, vector<1x8x128xf32>
    %122 = vector.shape_cast %121 : vector<1x8x128xf32> to vector<8x128xf32>
    %123 = arith.addf %119, %122 : vector<8x128xf32>
    %124 = vector.extract_strided_slice %118 {offsets = [8, 128], sizes = [8, 128], strides = [1, 1]} : vector<16x256xf32> to vector<8x128xf32>
    %125 = arith.index_cast %115 : i32 to index
    %c0_68 = arith.constant 0 : index
    %c128_69 = arith.constant 128 : index
    %126 = vector.load %arg16[%125, %c0_68, %c128_69] : memref<8x8x256xf32, #tpu.memory_space<vmem>>, vector<1x8x128xf32>
    %127 = vector.shape_cast %126 : vector<1x8x128xf32> to vector<8x128xf32>
    %128 = arith.addf %124, %127 : vector<8x128xf32>
    %129 = tpu.concatenate %123, %128 in 0 : vector<8x128xf32>, vector<8x128xf32> -> vector<16x128xf32>
    %130 = math.tanh %129 : vector<16x128xf32>
    %131 = arith.negf %129 : vector<16x128xf32>
    %132 = math.exp %131 : vector<16x128xf32>
    %cst_70 = arith.constant 1.000000e+00 : f32
    %133 = vector.broadcast %cst_70 : f32 to vector<16x128xf32>
    %134 = arith.addf %133, %132 : vector<16x128xf32>
    %135 = arith.divf %133, %134 : vector<16x128xf32>
    %136 = arith.select %19, %130, %135 : vector<16x128xi1>, vector<16x128xf32>
    %c112_i32_71 = arith.constant 112 : i32
    %137 = tpu.dynamic_rotate %136 by %c112_i32_71 dim 1 : vector<16x128xf32>, i32 -> vector<16x128xf32>
    %c96_i32_72 = arith.constant 96 : i32
    %138 = tpu.dynamic_rotate %136 by %c96_i32_72 dim 1 : vector<16x128xf32>, i32 -> vector<16x128xf32>
    %c80_i32_73 = arith.constant 80 : i32
    %139 = tpu.dynamic_rotate %136 by %c80_i32_73 dim 1 : vector<16x128xf32>, i32 -> vector<16x128xf32>
    %140 = arith.mulf %137, %117 : vector<16x128xf32>
    %141 = arith.mulf %136, %138 : vector<16x128xf32>
    %142 = arith.addf %140, %141 : vector<16x128xf32>
    %143 = math.tanh %142 : vector<16x128xf32>
    %144 = arith.mulf %139, %143 : vector<16x128xf32>
    %cst_74 = arith.constant 0.000000e+00 : f32
    %145 = vector.broadcast %cst_74 : f32 to vector<16x128xf32>
    %146 = arith.select %21, %144, %145 : vector<16x128xi1>, vector<16x128xf32>
    %cst_75 = arith.constant 0.000000e+00 : f32
    %147 = vector.broadcast %cst_75 : f32 to vector<16x128xf32>
    %148 = arith.select %21, %142, %147 : vector<16x128xi1>, vector<16x128xf32>
    %c0_76 = arith.constant 0 : index
    %c0_77 = arith.constant 0 : index
    %149 = vector.load %arg17[%c0_76, %c0_77] : memref<16x128xf32, #tpu.memory_space<vmem>>, vector<16x128xf32>
    tpu.vector_store %arg17[%c0_76, %c0_77], %146 {strides = array<i32>} : memref<16x128xf32, #tpu.memory_space<vmem>>, vector<16x128xf32>,
    %c0_78 = arith.constant 0 : index
    %c0_79 = arith.constant 0 : index
    %150 = vector.load %arg18[%c0_78, %c0_79] : memref<16x128xf32, #tpu.memory_space<vmem>>, vector<16x128xf32>
    tpu.vector_store %arg18[%c0_78, %c0_79], %148 {strides = array<i32>} : memref<16x128xf32, #tpu.memory_space<vmem>>, vector<16x128xf32>,
    %151 = vector.extract_strided_slice %146 {offsets = [0, 0], sizes = [8, 128], strides = [1, 1]} : vector<16x128xf32> to vector<8x128xf32>
    %152 = arith.index_cast %c2_i32 : i32 to index
    %c0_80 = arith.constant 0 : index
    %c0_81 = arith.constant 0 : index
    %153 = vector.load %arg14[%152, %c0_80, %c0_81] : memref<8x8x256xf32, #tpu.memory_space<vmem>>, vector<1x8x128xf32>
    %154 = vector.shape_cast %153 : vector<1x8x128xf32> to vector<8x128xf32>
    %155 = vector.shape_cast %151 : vector<8x128xf32> to vector<1x8x128xf32>
    tpu.vector_store %arg14[%152, %c0_80, %c0_81], %155 {strides = array<i32>} : memref<8x8x256xf32, #tpu.memory_space<vmem>>, vector<1x8x128xf32>,
    %156 = vector.extract_strided_slice %146 {offsets = [8, 0], sizes = [8, 128], strides = [1, 1]} : vector<16x128xf32> to vector<8x128xf32>
    %157 = arith.index_cast %115 : i32 to index
    %c0_82 = arith.constant 0 : index
    %c128_83 = arith.constant 128 : index
    %158 = vector.load %arg14[%157, %c0_82, %c128_83] : memref<8x8x256xf32, #tpu.memory_space<vmem>>, vector<1x8x128xf32>
    %159 = vector.shape_cast %158 : vector<1x8x128xf32> to vector<8x128xf32>
    %160 = vector.shape_cast %156 : vector<8x128xf32> to vector<1x8x128xf32>
    tpu.vector_store %arg14[%157, %c0_82, %c128_83], %160 {strides = array<i32>} : memref<8x8x256xf32, #tpu.memory_space<vmem>>, vector<1x8x128xf32>,
    %c3_i32 = arith.constant 3 : i32
    %c7_i32_84 = arith.constant 7 : i32
    %161 = arith.subi %c7_i32_84, %c3_i32 : i32
    %c0_85 = arith.constant 0 : index
    %c0_86 = arith.constant 0 : index
    %162 = vector.load %arg17[%c0_85, %c0_86] : memref<16x128xf32, #tpu.memory_space<vmem>>, vector<16x128xf32>
    %c0_87 = arith.constant 0 : index
    %c0_88 = arith.constant 0 : index
    %163 = vector.load %arg18[%c0_87, %c0_88] : memref<16x128xf32, #tpu.memory_space<vmem>>, vector<16x128xf32>
    %cst_89 = arith.constant dense<0.000000e+00> : vector<16x256xf32>
    %164 = tpu.matmul %162, %22, %cst_89 {dimension_numbers = #tpu.dot_dimension_numbers<[1], [0], [0], [1], [0, 0, 1, 1], [], []>} : vector<16x128xf32>, vector<128x256xf32>, vector<16x256xf32> -> vector<16x256xf32>
    %165 = vector.extract_strided_slice %164 {offsets = [0, 0], sizes = [8, 128], strides = [1, 1]} : vector<16x256xf32> to vector<8x128xf32>
    %166 = arith.index_cast %c3_i32 : i32 to index
    %c0_90 = arith.constant 0 : index
    %c0_91 = arith.constant 0 : index
    %167 = vector.load %arg16[%166, %c0_90, %c0_91] : memref<8x8x256xf32, #tpu.memory_space<vmem>>, vector<1x8x128xf32>
    %168 = vector.shape_cast %167 : vector<1x8x128xf32> to vector<8x128xf32>
    %169 = arith.addf %165, %168 : vector<8x128xf32>
    %170 = vector.extract_strided_slice %164 {offsets = [8, 128], sizes = [8, 128], strides = [1, 1]} : vector<16x256xf32> to vector<8x128xf32>
    %171 = arith.index_cast %161 : i32 to index
    %c0_92 = arith.constant 0 : index
    %c128_93 = arith.constant 128 : index
    %172 = vector.load %arg16[%171, %c0_92, %c128_93] : memref<8x8x256xf32, #tpu.memory_space<vmem>>, vector<1x8x128xf32>
    %173 = vector.shape_cast %172 : vector<1x8x128xf32> to vector<8x128xf32>
    %174 = arith.addf %170, %173 : vector<8x128xf32>
    %175 = tpu.concatenate %169, %174 in 0 : vector<8x128xf32>, vector<8x128xf32> -> vector<16x128xf32>
    %176 = math.tanh %175 : vector<16x128xf32>
    %177 = arith.negf %175 : vector<16x128xf32>
    %178 = math.exp %177 : vector<16x128xf32>
    %cst_94 = arith.constant 1.000000e+00 : f32
    %179 = vector.broadcast %cst_94 : f32 to vector<16x128xf32>
    %180 = arith.addf %179, %178 : vector<16x128xf32>
    %181 = arith.divf %179, %180 : vector<16x128xf32>
    %182 = arith.select %19, %176, %181 : vector<16x128xi1>, vector<16x128xf32>
    %c112_i32_95 = arith.constant 112 : i32
    %183 = tpu.dynamic_rotate %182 by %c112_i32_95 dim 1 : vector<16x128xf32>, i32 -> vector<16x128xf32>
    %c96_i32_96 = arith.constant 96 : i32
    %184 = tpu.dynamic_rotate %182 by %c96_i32_96 dim 1 : vector<16x128xf32>, i32 -> vector<16x128xf32>
    %c80_i32_97 = arith.constant 80 : i32
    %185 = tpu.dynamic_rotate %182 by %c80_i32_97 dim 1 : vector<16x128xf32>, i32 -> vector<16x128xf32>
    %186 = arith.mulf %183, %163 : vector<16x128xf32>
    %187 = arith.mulf %182, %184 : vector<16x128xf32>
    %188 = arith.addf %186, %187 : vector<16x128xf32>
    %189 = math.tanh %188 : vector<16x128xf32>
    %190 = arith.mulf %185, %189 : vector<16x128xf32>
    %cst_98 = arith.constant 0.000000e+00 : f32
    %191 = vector.broadcast %cst_98 : f32 to vector<16x128xf32>
    %192 = arith.select %21, %190, %191 : vector<16x128xi1>, vector<16x128xf32>
    %cst_99 = arith.constant 0.000000e+00 : f32
    %193 = vector.broadcast %cst_99 : f32 to vector<16x128xf32>
    %194 = arith.select %21, %188, %193 : vector<16x128xi1>, vector<16x128xf32>
    %c0_100 = arith.constant 0 : index
    %c0_101 = arith.constant 0 : index
    %195 = vector.load %arg17[%c0_100, %c0_101] : memref<16x128xf32, #tpu.memory_space<vmem>>, vector<16x128xf32>
    tpu.vector_store %arg17[%c0_100, %c0_101], %192 {strides = array<i32>} : memref<16x128xf32, #tpu.memory_space<vmem>>, vector<16x128xf32>,
    %c0_102 = arith.constant 0 : index
    %c0_103 = arith.constant 0 : index
    %196 = vector.load %arg18[%c0_102, %c0_103] : memref<16x128xf32, #tpu.memory_space<vmem>>, vector<16x128xf32>
    tpu.vector_store %arg18[%c0_102, %c0_103], %194 {strides = array<i32>} : memref<16x128xf32, #tpu.memory_space<vmem>>, vector<16x128xf32>,
    %197 = vector.extract_strided_slice %192 {offsets = [0, 0], sizes = [8, 128], strides = [1, 1]} : vector<16x128xf32> to vector<8x128xf32>
    %198 = arith.index_cast %c3_i32 : i32 to index
    %c0_104 = arith.constant 0 : index
    %c0_105 = arith.constant 0 : index
    %199 = vector.load %arg14[%198, %c0_104, %c0_105] : memref<8x8x256xf32, #tpu.memory_space<vmem>>, vector<1x8x128xf32>
    %200 = vector.shape_cast %199 : vector<1x8x128xf32> to vector<8x128xf32>
    %201 = vector.shape_cast %197 : vector<8x128xf32> to vector<1x8x128xf32>
    tpu.vector_store %arg14[%198, %c0_104, %c0_105], %201 {strides = array<i32>} : memref<8x8x256xf32, #tpu.memory_space<vmem>>, vector<1x8x128xf32>,
    %202 = vector.extract_strided_slice %192 {offsets = [8, 0], sizes = [8, 128], strides = [1, 1]} : vector<16x128xf32> to vector<8x128xf32>
    %203 = arith.index_cast %161 : i32 to index
    %c0_106 = arith.constant 0 : index
    %c128_107 = arith.constant 128 : index
    %204 = vector.load %arg14[%203, %c0_106, %c128_107] : memref<8x8x256xf32, #tpu.memory_space<vmem>>, vector<1x8x128xf32>
    %205 = vector.shape_cast %204 : vector<1x8x128xf32> to vector<8x128xf32>
    %206 = vector.shape_cast %202 : vector<8x128xf32> to vector<1x8x128xf32>
    tpu.vector_store %arg14[%203, %c0_106, %c128_107], %206 {strides = array<i32>} : memref<8x8x256xf32, #tpu.memory_space<vmem>>, vector<1x8x128xf32>,
    %c4_i32 = arith.constant 4 : i32
    %c7_i32_108 = arith.constant 7 : i32
    %207 = arith.subi %c7_i32_108, %c4_i32 : i32
    %c0_109 = arith.constant 0 : index
    %c0_110 = arith.constant 0 : index
    %208 = vector.load %arg17[%c0_109, %c0_110] : memref<16x128xf32, #tpu.memory_space<vmem>>, vector<16x128xf32>
    %c0_111 = arith.constant 0 : index
    %c0_112 = arith.constant 0 : index
    %209 = vector.load %arg18[%c0_111, %c0_112] : memref<16x128xf32, #tpu.memory_space<vmem>>, vector<16x128xf32>
    %cst_113 = arith.constant dense<0.000000e+00> : vector<16x256xf32>
    %210 = tpu.matmul %208, %22, %cst_113 {dimension_numbers = #tpu.dot_dimension_numbers<[1], [0], [0], [1], [0, 0, 1, 1], [], []>} : vector<16x128xf32>, vector<128x256xf32>, vector<16x256xf32> -> vector<16x256xf32>
    %211 = vector.extract_strided_slice %210 {offsets = [0, 0], sizes = [8, 128], strides = [1, 1]} : vector<16x256xf32> to vector<8x128xf32>
    %212 = arith.index_cast %c4_i32 : i32 to index
    %c0_114 = arith.constant 0 : index
    %c0_115 = arith.constant 0 : index
    %213 = vector.load %arg16[%212, %c0_114, %c0_115] : memref<8x8x256xf32, #tpu.memory_space<vmem>>, vector<1x8x128xf32>
    %214 = vector.shape_cast %213 : vector<1x8x128xf32> to vector<8x128xf32>
    %215 = arith.addf %211, %214 : vector<8x128xf32>
    %216 = vector.extract_strided_slice %210 {offsets = [8, 128], sizes = [8, 128], strides = [1, 1]} : vector<16x256xf32> to vector<8x128xf32>
    %217 = arith.index_cast %207 : i32 to index
    %c0_116 = arith.constant 0 : index
    %c128_117 = arith.constant 128 : index
    %218 = vector.load %arg16[%217, %c0_116, %c128_117] : memref<8x8x256xf32, #tpu.memory_space<vmem>>, vector<1x8x128xf32>
    %219 = vector.shape_cast %218 : vector<1x8x128xf32> to vector<8x128xf32>
    %220 = arith.addf %216, %219 : vector<8x128xf32>
    %221 = tpu.concatenate %215, %220 in 0 : vector<8x128xf32>, vector<8x128xf32> -> vector<16x128xf32>
    %222 = math.tanh %221 : vector<16x128xf32>
    %223 = arith.negf %221 : vector<16x128xf32>
    %224 = math.exp %223 : vector<16x128xf32>
    %cst_118 = arith.constant 1.000000e+00 : f32
    %225 = vector.broadcast %cst_118 : f32 to vector<16x128xf32>
    %226 = arith.addf %225, %224 : vector<16x128xf32>
    %227 = arith.divf %225, %226 : vector<16x128xf32>
    %228 = arith.select %19, %222, %227 : vector<16x128xi1>, vector<16x128xf32>
    %c112_i32_119 = arith.constant 112 : i32
    %229 = tpu.dynamic_rotate %228 by %c112_i32_119 dim 1 : vector<16x128xf32>, i32 -> vector<16x128xf32>
    %c96_i32_120 = arith.constant 96 : i32
    %230 = tpu.dynamic_rotate %228 by %c96_i32_120 dim 1 : vector<16x128xf32>, i32 -> vector<16x128xf32>
    %c80_i32_121 = arith.constant 80 : i32
    %231 = tpu.dynamic_rotate %228 by %c80_i32_121 dim 1 : vector<16x128xf32>, i32 -> vector<16x128xf32>
    %232 = arith.mulf %229, %209 : vector<16x128xf32>
    %233 = arith.mulf %228, %230 : vector<16x128xf32>
    %234 = arith.addf %232, %233 : vector<16x128xf32>
    %235 = math.tanh %234 : vector<16x128xf32>
    %236 = arith.mulf %231, %235 : vector<16x128xf32>
    %cst_122 = arith.constant 0.000000e+00 : f32
    %237 = vector.broadcast %cst_122 : f32 to vector<16x128xf32>
    %238 = arith.select %21, %236, %237 : vector<16x128xi1>, vector<16x128xf32>
    %cst_123 = arith.constant 0.000000e+00 : f32
    %239 = vector.broadcast %cst_123 : f32 to vector<16x128xf32>
    %240 = arith.select %21, %234, %239 : vector<16x128xi1>, vector<16x128xf32>
    %c0_124 = arith.constant 0 : index
    %c0_125 = arith.constant 0 : index
    %241 = vector.load %arg17[%c0_124, %c0_125] : memref<16x128xf32, #tpu.memory_space<vmem>>, vector<16x128xf32>
    tpu.vector_store %arg17[%c0_124, %c0_125], %238 {strides = array<i32>} : memref<16x128xf32, #tpu.memory_space<vmem>>, vector<16x128xf32>,
    %c0_126 = arith.constant 0 : index
    %c0_127 = arith.constant 0 : index
    %242 = vector.load %arg18[%c0_126, %c0_127] : memref<16x128xf32, #tpu.memory_space<vmem>>, vector<16x128xf32>
    tpu.vector_store %arg18[%c0_126, %c0_127], %240 {strides = array<i32>} : memref<16x128xf32, #tpu.memory_space<vmem>>, vector<16x128xf32>,
    %243 = vector.extract_strided_slice %238 {offsets = [0, 0], sizes = [8, 128], strides = [1, 1]} : vector<16x128xf32> to vector<8x128xf32>
    %244 = arith.index_cast %c4_i32 : i32 to index
    %c0_128 = arith.constant 0 : index
    %c0_129 = arith.constant 0 : index
    %245 = vector.load %arg14[%244, %c0_128, %c0_129] : memref<8x8x256xf32, #tpu.memory_space<vmem>>, vector<1x8x128xf32>
    %246 = vector.shape_cast %245 : vector<1x8x128xf32> to vector<8x128xf32>
    %247 = vector.shape_cast %243 : vector<8x128xf32> to vector<1x8x128xf32>
    tpu.vector_store %arg14[%244, %c0_128, %c0_129], %247 {strides = array<i32>} : memref<8x8x256xf32, #tpu.memory_space<vmem>>, vector<1x8x128xf32>,
    %248 = vector.extract_strided_slice %238 {offsets = [8, 0], sizes = [8, 128], strides = [1, 1]} : vector<16x128xf32> to vector<8x128xf32>
    %249 = arith.index_cast %207 : i32 to index
    %c0_130 = arith.constant 0 : index
    %c128_131 = arith.constant 128 : index
    %250 = vector.load %arg14[%249, %c0_130, %c128_131] : memref<8x8x256xf32, #tpu.memory_space<vmem>>, vector<1x8x128xf32>
    %251 = vector.shape_cast %250 : vector<1x8x128xf32> to vector<8x128xf32>
    %252 = vector.shape_cast %248 : vector<8x128xf32> to vector<1x8x128xf32>
    tpu.vector_store %arg14[%249, %c0_130, %c128_131], %252 {strides = array<i32>} : memref<8x8x256xf32, #tpu.memory_space<vmem>>, vector<1x8x128xf32>,
    %c5_i32 = arith.constant 5 : i32
    %c7_i32_132 = arith.constant 7 : i32
    %253 = arith.subi %c7_i32_132, %c5_i32 : i32
    %c0_133 = arith.constant 0 : index
    %c0_134 = arith.constant 0 : index
    %254 = vector.load %arg17[%c0_133, %c0_134] : memref<16x128xf32, #tpu.memory_space<vmem>>, vector<16x128xf32>
    %c0_135 = arith.constant 0 : index
    %c0_136 = arith.constant 0 : index
    %255 = vector.load %arg18[%c0_135, %c0_136] : memref<16x128xf32, #tpu.memory_space<vmem>>, vector<16x128xf32>
    %cst_137 = arith.constant dense<0.000000e+00> : vector<16x256xf32>
    %256 = tpu.matmul %254, %22, %cst_137 {dimension_numbers = #tpu.dot_dimension_numbers<[1], [0], [0], [1], [0, 0, 1, 1], [], []>} : vector<16x128xf32>, vector<128x256xf32>, vector<16x256xf32> -> vector<16x256xf32>
    %257 = vector.extract_strided_slice %256 {offsets = [0, 0], sizes = [8, 128], strides = [1, 1]} : vector<16x256xf32> to vector<8x128xf32>
    %258 = arith.index_cast %c5_i32 : i32 to index
    %c0_138 = arith.constant 0 : index
    %c0_139 = arith.constant 0 : index
    %259 = vector.load %arg16[%258, %c0_138, %c0_139] : memref<8x8x256xf32, #tpu.memory_space<vmem>>, vector<1x8x128xf32>
    %260 = vector.shape_cast %259 : vector<1x8x128xf32> to vector<8x128xf32>
    %261 = arith.addf %257, %260 : vector<8x128xf32>
    %262 = vector.extract_strided_slice %256 {offsets = [8, 128], sizes = [8, 128], strides = [1, 1]} : vector<16x256xf32> to vector<8x128xf32>
    %263 = arith.index_cast %253 : i32 to index
    %c0_140 = arith.constant 0 : index
    %c128_141 = arith.constant 128 : index
    %264 = vector.load %arg16[%263, %c0_140, %c128_141] : memref<8x8x256xf32, #tpu.memory_space<vmem>>, vector<1x8x128xf32>
    %265 = vector.shape_cast %264 : vector<1x8x128xf32> to vector<8x128xf32>
    %266 = arith.addf %262, %265 : vector<8x128xf32>
    %267 = tpu.concatenate %261, %266 in 0 : vector<8x128xf32>, vector<8x128xf32> -> vector<16x128xf32>
    %268 = math.tanh %267 : vector<16x128xf32>
    %269 = arith.negf %267 : vector<16x128xf32>
    %270 = math.exp %269 : vector<16x128xf32>
    %cst_142 = arith.constant 1.000000e+00 : f32
    %271 = vector.broadcast %cst_142 : f32 to vector<16x128xf32>
    %272 = arith.addf %271, %270 : vector<16x128xf32>
    %273 = arith.divf %271, %272 : vector<16x128xf32>
    %274 = arith.select %19, %268, %273 : vector<16x128xi1>, vector<16x128xf32>
    %c112_i32_143 = arith.constant 112 : i32
    %275 = tpu.dynamic_rotate %274 by %c112_i32_143 dim 1 : vector<16x128xf32>, i32 -> vector<16x128xf32>
    %c96_i32_144 = arith.constant 96 : i32
    %276 = tpu.dynamic_rotate %274 by %c96_i32_144 dim 1 : vector<16x128xf32>, i32 -> vector<16x128xf32>
    %c80_i32_145 = arith.constant 80 : i32
    %277 = tpu.dynamic_rotate %274 by %c80_i32_145 dim 1 : vector<16x128xf32>, i32 -> vector<16x128xf32>
    %278 = arith.mulf %275, %255 : vector<16x128xf32>
    %279 = arith.mulf %274, %276 : vector<16x128xf32>
    %280 = arith.addf %278, %279 : vector<16x128xf32>
    %281 = math.tanh %280 : vector<16x128xf32>
    %282 = arith.mulf %277, %281 : vector<16x128xf32>
    %cst_146 = arith.constant 0.000000e+00 : f32
    %283 = vector.broadcast %cst_146 : f32 to vector<16x128xf32>
    %284 = arith.select %21, %282, %283 : vector<16x128xi1>, vector<16x128xf32>
    %cst_147 = arith.constant 0.000000e+00 : f32
    %285 = vector.broadcast %cst_147 : f32 to vector<16x128xf32>
    %286 = arith.select %21, %280, %285 : vector<16x128xi1>, vector<16x128xf32>
    %c0_148 = arith.constant 0 : index
    %c0_149 = arith.constant 0 : index
    %287 = vector.load %arg17[%c0_148, %c0_149] : memref<16x128xf32, #tpu.memory_space<vmem>>, vector<16x128xf32>
    tpu.vector_store %arg17[%c0_148, %c0_149], %284 {strides = array<i32>} : memref<16x128xf32, #tpu.memory_space<vmem>>, vector<16x128xf32>,
    %c0_150 = arith.constant 0 : index
    %c0_151 = arith.constant 0 : index
    %288 = vector.load %arg18[%c0_150, %c0_151] : memref<16x128xf32, #tpu.memory_space<vmem>>, vector<16x128xf32>
    tpu.vector_store %arg18[%c0_150, %c0_151], %286 {strides = array<i32>} : memref<16x128xf32, #tpu.memory_space<vmem>>, vector<16x128xf32>,
    %289 = vector.extract_strided_slice %284 {offsets = [0, 0], sizes = [8, 128], strides = [1, 1]} : vector<16x128xf32> to vector<8x128xf32>
    %290 = arith.index_cast %c5_i32 : i32 to index
    %c0_152 = arith.constant 0 : index
    %c0_153 = arith.constant 0 : index
    %291 = vector.load %arg14[%290, %c0_152, %c0_153] : memref<8x8x256xf32, #tpu.memory_space<vmem>>, vector<1x8x128xf32>
    %292 = vector.shape_cast %291 : vector<1x8x128xf32> to vector<8x128xf32>
    %293 = vector.shape_cast %289 : vector<8x128xf32> to vector<1x8x128xf32>
    tpu.vector_store %arg14[%290, %c0_152, %c0_153], %293 {strides = array<i32>} : memref<8x8x256xf32, #tpu.memory_space<vmem>>, vector<1x8x128xf32>,
    %294 = vector.extract_strided_slice %284 {offsets = [8, 0], sizes = [8, 128], strides = [1, 1]} : vector<16x128xf32> to vector<8x128xf32>
    %295 = arith.index_cast %253 : i32 to index
    %c0_154 = arith.constant 0 : index
    %c128_155 = arith.constant 128 : index
    %296 = vector.load %arg14[%295, %c0_154, %c128_155] : memref<8x8x256xf32, #tpu.memory_space<vmem>>, vector<1x8x128xf32>
    %297 = vector.shape_cast %296 : vector<1x8x128xf32> to vector<8x128xf32>
    %298 = vector.shape_cast %294 : vector<8x128xf32> to vector<1x8x128xf32>
    tpu.vector_store %arg14[%295, %c0_154, %c128_155], %298 {strides = array<i32>} : memref<8x8x256xf32, #tpu.memory_space<vmem>>, vector<1x8x128xf32>,
    %c6_i32 = arith.constant 6 : i32
    %c7_i32_156 = arith.constant 7 : i32
    %299 = arith.subi %c7_i32_156, %c6_i32 : i32
    %c0_157 = arith.constant 0 : index
    %c0_158 = arith.constant 0 : index
    %300 = vector.load %arg17[%c0_157, %c0_158] : memref<16x128xf32, #tpu.memory_space<vmem>>, vector<16x128xf32>
    %c0_159 = arith.constant 0 : index
    %c0_160 = arith.constant 0 : index
    %301 = vector.load %arg18[%c0_159, %c0_160] : memref<16x128xf32, #tpu.memory_space<vmem>>, vector<16x128xf32>
    %cst_161 = arith.constant dense<0.000000e+00> : vector<16x256xf32>
    %302 = tpu.matmul %300, %22, %cst_161 {dimension_numbers = #tpu.dot_dimension_numbers<[1], [0], [0], [1], [0, 0, 1, 1], [], []>} : vector<16x128xf32>, vector<128x256xf32>, vector<16x256xf32> -> vector<16x256xf32>
    %303 = vector.extract_strided_slice %302 {offsets = [0, 0], sizes = [8, 128], strides = [1, 1]} : vector<16x256xf32> to vector<8x128xf32>
    %304 = arith.index_cast %c6_i32 : i32 to index
    %c0_162 = arith.constant 0 : index
    %c0_163 = arith.constant 0 : index
    %305 = vector.load %arg16[%304, %c0_162, %c0_163] : memref<8x8x256xf32, #tpu.memory_space<vmem>>, vector<1x8x128xf32>
    %306 = vector.shape_cast %305 : vector<1x8x128xf32> to vector<8x128xf32>
    %307 = arith.addf %303, %306 : vector<8x128xf32>
    %308 = vector.extract_strided_slice %302 {offsets = [8, 128], sizes = [8, 128], strides = [1, 1]} : vector<16x256xf32> to vector<8x128xf32>
    %309 = arith.index_cast %299 : i32 to index
    %c0_164 = arith.constant 0 : index
    %c128_165 = arith.constant 128 : index
    %310 = vector.load %arg16[%309, %c0_164, %c128_165] : memref<8x8x256xf32, #tpu.memory_space<vmem>>, vector<1x8x128xf32>
    %311 = vector.shape_cast %310 : vector<1x8x128xf32> to vector<8x128xf32>
    %312 = arith.addf %308, %311 : vector<8x128xf32>
    %313 = tpu.concatenate %307, %312 in 0 : vector<8x128xf32>, vector<8x128xf32> -> vector<16x128xf32>
    %314 = math.tanh %313 : vector<16x128xf32>
    %315 = arith.negf %313 : vector<16x128xf32>
    %316 = math.exp %315 : vector<16x128xf32>
    %cst_166 = arith.constant 1.000000e+00 : f32
    %317 = vector.broadcast %cst_166 : f32 to vector<16x128xf32>
    %318 = arith.addf %317, %316 : vector<16x128xf32>
    %319 = arith.divf %317, %318 : vector<16x128xf32>
    %320 = arith.select %19, %314, %319 : vector<16x128xi1>, vector<16x128xf32>
    %c112_i32_167 = arith.constant 112 : i32
    %321 = tpu.dynamic_rotate %320 by %c112_i32_167 dim 1 : vector<16x128xf32>, i32 -> vector<16x128xf32>
    %c96_i32_168 = arith.constant 96 : i32
    %322 = tpu.dynamic_rotate %320 by %c96_i32_168 dim 1 : vector<16x128xf32>, i32 -> vector<16x128xf32>
    %c80_i32_169 = arith.constant 80 : i32
    %323 = tpu.dynamic_rotate %320 by %c80_i32_169 dim 1 : vector<16x128xf32>, i32 -> vector<16x128xf32>
    %324 = arith.mulf %321, %301 : vector<16x128xf32>
    %325 = arith.mulf %320, %322 : vector<16x128xf32>
    %326 = arith.addf %324, %325 : vector<16x128xf32>
    %327 = math.tanh %326 : vector<16x128xf32>
    %328 = arith.mulf %323, %327 : vector<16x128xf32>
    %cst_170 = arith.constant 0.000000e+00 : f32
    %329 = vector.broadcast %cst_170 : f32 to vector<16x128xf32>
    %330 = arith.select %21, %328, %329 : vector<16x128xi1>, vector<16x128xf32>
    %cst_171 = arith.constant 0.000000e+00 : f32
    %331 = vector.broadcast %cst_171 : f32 to vector<16x128xf32>
    %332 = arith.select %21, %326, %331 : vector<16x128xi1>, vector<16x128xf32>
    %c0_172 = arith.constant 0 : index
    %c0_173 = arith.constant 0 : index
    %333 = vector.load %arg17[%c0_172, %c0_173] : memref<16x128xf32, #tpu.memory_space<vmem>>, vector<16x128xf32>
    tpu.vector_store %arg17[%c0_172, %c0_173], %330 {strides = array<i32>} : memref<16x128xf32, #tpu.memory_space<vmem>>, vector<16x128xf32>,
    %c0_174 = arith.constant 0 : index
    %c0_175 = arith.constant 0 : index
    %334 = vector.load %arg18[%c0_174, %c0_175] : memref<16x128xf32, #tpu.memory_space<vmem>>, vector<16x128xf32>
    tpu.vector_store %arg18[%c0_174, %c0_175], %332 {strides = array<i32>} : memref<16x128xf32, #tpu.memory_space<vmem>>, vector<16x128xf32>,
    %335 = vector.extract_strided_slice %330 {offsets = [0, 0], sizes = [8, 128], strides = [1, 1]} : vector<16x128xf32> to vector<8x128xf32>
    %336 = arith.index_cast %c6_i32 : i32 to index
    %c0_176 = arith.constant 0 : index
    %c0_177 = arith.constant 0 : index
    %337 = vector.load %arg14[%336, %c0_176, %c0_177] : memref<8x8x256xf32, #tpu.memory_space<vmem>>, vector<1x8x128xf32>
    %338 = vector.shape_cast %337 : vector<1x8x128xf32> to vector<8x128xf32>
    %339 = vector.shape_cast %335 : vector<8x128xf32> to vector<1x8x128xf32>
    tpu.vector_store %arg14[%336, %c0_176, %c0_177], %339 {strides = array<i32>} : memref<8x8x256xf32, #tpu.memory_space<vmem>>, vector<1x8x128xf32>,
    %340 = vector.extract_strided_slice %330 {offsets = [8, 0], sizes = [8, 128], strides = [1, 1]} : vector<16x128xf32> to vector<8x128xf32>
    %341 = arith.index_cast %299 : i32 to index
    %c0_178 = arith.constant 0 : index
    %c128_179 = arith.constant 128 : index
    %342 = vector.load %arg14[%341, %c0_178, %c128_179] : memref<8x8x256xf32, #tpu.memory_space<vmem>>, vector<1x8x128xf32>
    %343 = vector.shape_cast %342 : vector<1x8x128xf32> to vector<8x128xf32>
    %344 = vector.shape_cast %340 : vector<8x128xf32> to vector<1x8x128xf32>
    tpu.vector_store %arg14[%341, %c0_178, %c128_179], %344 {strides = array<i32>} : memref<8x8x256xf32, #tpu.memory_space<vmem>>, vector<1x8x128xf32>,
    %c7_i32_180 = arith.constant 7 : i32
    %c7_i32_181 = arith.constant 7 : i32
    %345 = arith.subi %c7_i32_181, %c7_i32_180 : i32
    %c0_182 = arith.constant 0 : index
    %c0_183 = arith.constant 0 : index
    %346 = vector.load %arg17[%c0_182, %c0_183] : memref<16x128xf32, #tpu.memory_space<vmem>>, vector<16x128xf32>
    %c0_184 = arith.constant 0 : index
    %c0_185 = arith.constant 0 : index
    %347 = vector.load %arg18[%c0_184, %c0_185] : memref<16x128xf32, #tpu.memory_space<vmem>>, vector<16x128xf32>
    %cst_186 = arith.constant dense<0.000000e+00> : vector<16x256xf32>
    %348 = tpu.matmul %346, %22, %cst_186 {dimension_numbers = #tpu.dot_dimension_numbers<[1], [0], [0], [1], [0, 0, 1, 1], [], []>} : vector<16x128xf32>, vector<128x256xf32>, vector<16x256xf32> -> vector<16x256xf32>
    %349 = vector.extract_strided_slice %348 {offsets = [0, 0], sizes = [8, 128], strides = [1, 1]} : vector<16x256xf32> to vector<8x128xf32>
    %350 = arith.index_cast %c7_i32_180 : i32 to index
    %c0_187 = arith.constant 0 : index
    %c0_188 = arith.constant 0 : index
    %351 = vector.load %arg16[%350, %c0_187, %c0_188] : memref<8x8x256xf32, #tpu.memory_space<vmem>>, vector<1x8x128xf32>
    %352 = vector.shape_cast %351 : vector<1x8x128xf32> to vector<8x128xf32>
    %353 = arith.addf %349, %352 : vector<8x128xf32>
    %354 = vector.extract_strided_slice %348 {offsets = [8, 128], sizes = [8, 128], strides = [1, 1]} : vector<16x256xf32> to vector<8x128xf32>
    %355 = arith.index_cast %345 : i32 to index
    %c0_189 = arith.constant 0 : index
    %c128_190 = arith.constant 128 : index
    %356 = vector.load %arg16[%355, %c0_189, %c128_190] : memref<8x8x256xf32, #tpu.memory_space<vmem>>, vector<1x8x128xf32>
    %357 = vector.shape_cast %356 : vector<1x8x128xf32> to vector<8x128xf32>
    %358 = arith.addf %354, %357 : vector<8x128xf32>
    %359 = tpu.concatenate %353, %358 in 0 : vector<8x128xf32>, vector<8x128xf32> -> vector<16x128xf32>
    %360 = math.tanh %359 : vector<16x128xf32>
    %361 = arith.negf %359 : vector<16x128xf32>
    %362 = math.exp %361 : vector<16x128xf32>
    %cst_191 = arith.constant 1.000000e+00 : f32
    %363 = vector.broadcast %cst_191 : f32 to vector<16x128xf32>
    %364 = arith.addf %363, %362 : vector<16x128xf32>
    %365 = arith.divf %363, %364 : vector<16x128xf32>
    %366 = arith.select %19, %360, %365 : vector<16x128xi1>, vector<16x128xf32>
    %c112_i32_192 = arith.constant 112 : i32
    %367 = tpu.dynamic_rotate %366 by %c112_i32_192 dim 1 : vector<16x128xf32>, i32 -> vector<16x128xf32>
    %c96_i32_193 = arith.constant 96 : i32
    %368 = tpu.dynamic_rotate %366 by %c96_i32_193 dim 1 : vector<16x128xf32>, i32 -> vector<16x128xf32>
    %c80_i32_194 = arith.constant 80 : i32
    %369 = tpu.dynamic_rotate %366 by %c80_i32_194 dim 1 : vector<16x128xf32>, i32 -> vector<16x128xf32>
    %370 = arith.mulf %367, %347 : vector<16x128xf32>
    %371 = arith.mulf %366, %368 : vector<16x128xf32>
    %372 = arith.addf %370, %371 : vector<16x128xf32>
    %373 = math.tanh %372 : vector<16x128xf32>
    %374 = arith.mulf %369, %373 : vector<16x128xf32>
    %cst_195 = arith.constant 0.000000e+00 : f32
    %375 = vector.broadcast %cst_195 : f32 to vector<16x128xf32>
    %376 = arith.select %21, %374, %375 : vector<16x128xi1>, vector<16x128xf32>
    %cst_196 = arith.constant 0.000000e+00 : f32
    %377 = vector.broadcast %cst_196 : f32 to vector<16x128xf32>
    %378 = arith.select %21, %372, %377 : vector<16x128xi1>, vector<16x128xf32>
    %c0_197 = arith.constant 0 : index
    %c0_198 = arith.constant 0 : index
    %379 = vector.load %arg17[%c0_197, %c0_198] : memref<16x128xf32, #tpu.memory_space<vmem>>, vector<16x128xf32>
    tpu.vector_store %arg17[%c0_197, %c0_198], %376 {strides = array<i32>} : memref<16x128xf32, #tpu.memory_space<vmem>>, vector<16x128xf32>,
    %c0_199 = arith.constant 0 : index
    %c0_200 = arith.constant 0 : index
    %380 = vector.load %arg18[%c0_199, %c0_200] : memref<16x128xf32, #tpu.memory_space<vmem>>, vector<16x128xf32>
    tpu.vector_store %arg18[%c0_199, %c0_200], %378 {strides = array<i32>} : memref<16x128xf32, #tpu.memory_space<vmem>>, vector<16x128xf32>,
    %381 = vector.extract_strided_slice %376 {offsets = [0, 0], sizes = [8, 128], strides = [1, 1]} : vector<16x128xf32> to vector<8x128xf32>
    %382 = arith.index_cast %c7_i32_180 : i32 to index
    %c0_201 = arith.constant 0 : index
    %c0_202 = arith.constant 0 : index
    %383 = vector.load %arg14[%382, %c0_201, %c0_202] : memref<8x8x256xf32, #tpu.memory_space<vmem>>, vector<1x8x128xf32>
    %384 = vector.shape_cast %383 : vector<1x8x128xf32> to vector<8x128xf32>
    %385 = vector.shape_cast %381 : vector<8x128xf32> to vector<1x8x128xf32>
    tpu.vector_store %arg14[%382, %c0_201, %c0_202], %385 {strides = array<i32>} : memref<8x8x256xf32, #tpu.memory_space<vmem>>, vector<1x8x128xf32>,
    %386 = vector.extract_strided_slice %376 {offsets = [8, 0], sizes = [8, 128], strides = [1, 1]} : vector<16x128xf32> to vector<8x128xf32>
    %387 = arith.index_cast %345 : i32 to index
    %c0_203 = arith.constant 0 : index
    %c128_204 = arith.constant 128 : index
    %388 = vector.load %arg14[%387, %c0_203, %c128_204] : memref<8x8x256xf32, #tpu.memory_space<vmem>>, vector<1x8x128xf32>
    %389 = vector.shape_cast %388 : vector<1x8x128xf32> to vector<8x128xf32>
    %390 = vector.shape_cast %386 : vector<8x128xf32> to vector<1x8x128xf32>
    tpu.vector_store %arg14[%387, %c0_203, %c128_204], %390 {strides = array<i32>} : memref<8x8x256xf32, #tpu.memory_space<vmem>>, vector<1x8x128xf32>,
    %c8_i32 = arith.constant 8 : i32
    %c0_205 = arith.constant 0 : index
    %c0_206 = arith.constant 0 : index
    %c0_207 = arith.constant 0 : index
    %391 = vector.load %arg14[%c0_205, %c0_206, %c0_207] : memref<8x8x256xf32, #tpu.memory_space<vmem>>, vector<8x8x256xf32>
    %392 = vector.shape_cast %391 : vector<8x8x256xf32> to vector<64x256xf32>
    %393 = arith.truncf %392 : vector<64x256xf32> to vector<64x256xbf16>
    %c0_208 = arith.constant 0 : index
    %c0_209 = arith.constant 0 : index
    %394 = vector.load %arg5[%c0_208, %c0_209] : memref<256x256xbf16, #tpu.memory_space<vmem>>, vector<256x256xbf16>
    %cst_210 = arith.constant dense<0.000000e+00> : vector<64x256xf32>
    %395 = tpu.matmul %393, %394, %cst_210 {dimension_numbers = #tpu.dot_dimension_numbers<[1], [0], [0], [1], [0, 0, 1, 1], [], []>} : vector<64x256xbf16>, vector<256x256xbf16>, vector<64x256xf32> -> vector<64x256xf32>
    %c0_211 = arith.constant 0 : index
    %c0_212 = arith.constant 0 : index
    %396 = vector.load %arg7[%c0_211, %c0_212] : memref<1x256xf32, #tpu.memory_space<vmem>>, vector<1x256xf32>
    %397 = vector.broadcast %396 : vector<1x256xf32> to vector<64x256xf32>
    %398 = arith.addf %395, %397 : vector<64x256xf32>
    %399 = vector.shape_cast %398 : vector<64x256xf32> to vector<8x8x256xf32>
    %c0_213 = arith.constant 0 : index
    %c0_214 = arith.constant 0 : index
    %c0_215 = arith.constant 0 : index
    %400 = vector.load %arg16[%c0_213, %c0_214, %c0_215] : memref<8x8x256xf32, #tpu.memory_space<vmem>>, vector<8x8x256xf32>
    tpu.vector_store %arg16[%c0_213, %c0_214, %c0_215], %399 {strides = array<i32>} : memref<8x8x256xf32, #tpu.memory_space<vmem>>, vector<8x8x256xf32>,
    %cst_216 = arith.constant 0.000000e+00 : f32
    %401 = vector.broadcast %cst_216 : f32 to vector<16x128xf32>
    %c0_217 = arith.constant 0 : index
    %c0_218 = arith.constant 0 : index
    %402 = vector.load %arg17[%c0_217, %c0_218] : memref<16x128xf32, #tpu.memory_space<vmem>>, vector<16x128xf32>
    tpu.vector_store %arg17[%c0_217, %c0_218], %401 {strides = array<i32>} : memref<16x128xf32, #tpu.memory_space<vmem>>, vector<16x128xf32>,
    %cst_219 = arith.constant 0.000000e+00 : f32
    %403 = vector.broadcast %cst_219 : f32 to vector<16x128xf32>
    %c0_220 = arith.constant 0 : index
    %c0_221 = arith.constant 0 : index
    %404 = vector.load %arg18[%c0_220, %c0_221] : memref<16x128xf32, #tpu.memory_space<vmem>>, vector<16x128xf32>
    tpu.vector_store %arg18[%c0_220, %c0_221], %403 {strides = array<i32>} : memref<16x128xf32, #tpu.memory_space<vmem>>, vector<16x128xf32>,
    %405 = tpu.iota {dimensions = array<i32: 1>} : vector<16x128xi32>
    %c32_i32_222 = arith.constant 32 : i32
    %406 = vector.broadcast %c32_i32_222 : i32 to vector<16x128xi32>
    %407 = arith.cmpi sge, %405, %406 : vector<16x128xi32>
    %c48_i32_223 = arith.constant 48 : i32
    %408 = vector.broadcast %c48_i32_223 : i32 to vector<16x128xi32>
    %409 = arith.cmpi slt, %405, %408 : vector<16x128xi32>
    %410 = arith.andi %407, %409 : vector<16x128xi1>
    %c16_i32_224 = arith.constant 16 : i32
    %411 = vector.broadcast %c16_i32_224 : i32 to vector<16x128xi32>
    %412 = arith.cmpi slt, %405, %411 : vector<16x128xi32>
    %c0_225 = arith.constant 0 : index
    %c0_226 = arith.constant 0 : index
    %413 = vector.load %arg6[%c0_225, %c0_226] : memref<128x256xf32, #tpu.memory_space<vmem>>, vector<128x256xf32>
    %c0_i32_227 = arith.constant 0 : i32
    %c7_i32_228 = arith.constant 7 : i32
    %414 = arith.subi %c7_i32_228, %c0_i32_227 : i32
    %c0_229 = arith.constant 0 : index
    %c0_230 = arith.constant 0 : index
    %415 = vector.load %arg17[%c0_229, %c0_230] : memref<16x128xf32, #tpu.memory_space<vmem>>, vector<16x128xf32>
    %c0_231 = arith.constant 0 : index
    %c0_232 = arith.constant 0 : index
    %416 = vector.load %arg18[%c0_231, %c0_232] : memref<16x128xf32, #tpu.memory_space<vmem>>, vector<16x128xf32>
    %cst_233 = arith.constant dense<0.000000e+00> : vector<16x256xf32>
    %417 = tpu.matmul %415, %413, %cst_233 {dimension_numbers = #tpu.dot_dimension_numbers<[1], [0], [0], [1], [0, 0, 1, 1], [], []>} : vector<16x128xf32>, vector<128x256xf32>, vector<16x256xf32> -> vector<16x256xf32>
    %418 = vector.extract_strided_slice %417 {offsets = [0, 0], sizes = [8, 128], strides = [1, 1]} : vector<16x256xf32> to vector<8x128xf32>
    %419 = arith.index_cast %c0_i32_227 : i32 to index
    %c0_234 = arith.constant 0 : index
    %c0_235 = arith.constant 0 : index
    %420 = vector.load %arg16[%419, %c0_234, %c0_235] : memref<8x8x256xf32, #tpu.memory_space<vmem>>, vector<1x8x128xf32>
    %421 = vector.shape_cast %420 : vector<1x8x128xf32> to vector<8x128xf32>
    %422 = arith.addf %418, %421 : vector<8x128xf32>
    %423 = vector.extract_strided_slice %417 {offsets = [8, 128], sizes = [8, 128], strides = [1, 1]} : vector<16x256xf32> to vector<8x128xf32>
    %424 = arith.index_cast %414 : i32 to index
    %c0_236 = arith.constant 0 : index
    %c128_237 = arith.constant 128 : index
    %425 = vector.load %arg16[%424, %c0_236, %c128_237] : memref<8x8x256xf32, #tpu.memory_space<vmem>>, vector<1x8x128xf32>
    %426 = vector.shape_cast %425 : vector<1x8x128xf32> to vector<8x128xf32>
    %427 = arith.addf %423, %426 : vector<8x128xf32>
    %428 = tpu.concatenate %422, %427 in 0 : vector<8x128xf32>, vector<8x128xf32> -> vector<16x128xf32>
    %429 = math.tanh %428 : vector<16x128xf32>
    %430 = arith.negf %428 : vector<16x128xf32>
    %431 = math.exp %430 : vector<16x128xf32>
    %cst_238 = arith.constant 1.000000e+00 : f32
    %432 = vector.broadcast %cst_238 : f32 to vector<16x128xf32>
    %433 = arith.addf %432, %431 : vector<16x128xf32>
    %434 = arith.divf %432, %433 : vector<16x128xf32>
    %435 = arith.select %410, %429, %434 : vector<16x128xi1>, vector<16x128xf32>
    %c112_i32_239 = arith.constant 112 : i32
    %436 = tpu.dynamic_rotate %435 by %c112_i32_239 dim 1 : vector<16x128xf32>, i32 -> vector<16x128xf32>
    %c96_i32_240 = arith.constant 96 : i32
    %437 = tpu.dynamic_rotate %435 by %c96_i32_240 dim 1 : vector<16x128xf32>, i32 -> vector<16x128xf32>
    %c80_i32_241 = arith.constant 80 : i32
    %438 = tpu.dynamic_rotate %435 by %c80_i32_241 dim 1 : vector<16x128xf32>, i32 -> vector<16x128xf32>
    %439 = arith.mulf %436, %416 : vector<16x128xf32>
    %440 = arith.mulf %435, %437 : vector<16x128xf32>
    %441 = arith.addf %439, %440 : vector<16x128xf32>
    %442 = math.tanh %441 : vector<16x128xf32>
    %443 = arith.mulf %438, %442 : vector<16x128xf32>
    %cst_242 = arith.constant 0.000000e+00 : f32
    %444 = vector.broadcast %cst_242 : f32 to vector<16x128xf32>
    %445 = arith.select %412, %443, %444 : vector<16x128xi1>, vector<16x128xf32>
    %cst_243 = arith.constant 0.000000e+00 : f32
    %446 = vector.broadcast %cst_243 : f32 to vector<16x128xf32>
    %447 = arith.select %412, %441, %446 : vector<16x128xi1>, vector<16x128xf32>
    %c0_244 = arith.constant 0 : index
    %c0_245 = arith.constant 0 : index
    %448 = vector.load %arg17[%c0_244, %c0_245] : memref<16x128xf32, #tpu.memory_space<vmem>>, vector<16x128xf32>
    tpu.vector_store %arg17[%c0_244, %c0_245], %445 {strides = array<i32>} : memref<16x128xf32, #tpu.memory_space<vmem>>, vector<16x128xf32>,
    %c0_246 = arith.constant 0 : index
    %c0_247 = arith.constant 0 : index
    %449 = vector.load %arg18[%c0_246, %c0_247] : memref<16x128xf32, #tpu.memory_space<vmem>>, vector<16x128xf32>
    tpu.vector_store %arg18[%c0_246, %c0_247], %447 {strides = array<i32>} : memref<16x128xf32, #tpu.memory_space<vmem>>, vector<16x128xf32>,
    %450 = vector.extract_strided_slice %445 {offsets = [0, 0], sizes = [8, 128], strides = [1, 1]} : vector<16x128xf32> to vector<8x128xf32>
    %451 = arith.index_cast %c0_i32_227 : i32 to index
    %c0_248 = arith.constant 0 : index
    %c0_249 = arith.constant 0 : index
    %452 = vector.load %arg15[%451, %c0_248, %c0_249] : memref<8x8x256xf32, #tpu.memory_space<vmem>>, vector<1x8x128xf32>
    %453 = vector.shape_cast %452 : vector<1x8x128xf32> to vector<8x128xf32>
    %454 = vector.shape_cast %450 : vector<8x128xf32> to vector<1x8x128xf32>
    tpu.vector_store %arg15[%451, %c0_248, %c0_249], %454 {strides = array<i32>} : memref<8x8x256xf32, #tpu.memory_space<vmem>>, vector<1x8x128xf32>,
    %455 = vector.extract_strided_slice %445 {offsets = [8, 0], sizes = [8, 128], strides = [1, 1]} : vector<16x128xf32> to vector<8x128xf32>
    %456 = arith.index_cast %414 : i32 to index
    %c0_250 = arith.constant 0 : index
    %c128_251 = arith.constant 128 : index
    %457 = vector.load %arg15[%456, %c0_250, %c128_251] : memref<8x8x256xf32, #tpu.memory_space<vmem>>, vector<1x8x128xf32>
    %458 = vector.shape_cast %457 : vector<1x8x128xf32> to vector<8x128xf32>
    %459 = vector.shape_cast %455 : vector<8x128xf32> to vector<1x8x128xf32>
    tpu.vector_store %arg15[%456, %c0_250, %c128_251], %459 {strides = array<i32>} : memref<8x8x256xf32, #tpu.memory_space<vmem>>, vector<1x8x128xf32>,
    %c1_i32_252 = arith.constant 1 : i32
    %c7_i32_253 = arith.constant 7 : i32
    %460 = arith.subi %c7_i32_253, %c1_i32_252 : i32
    %c0_254 = arith.constant 0 : index
    %c0_255 = arith.constant 0 : index
    %461 = vector.load %arg17[%c0_254, %c0_255] : memref<16x128xf32, #tpu.memory_space<vmem>>, vector<16x128xf32>
    %c0_256 = arith.constant 0 : index
    %c0_257 = arith.constant 0 : index
    %462 = vector.load %arg18[%c0_256, %c0_257] : memref<16x128xf32, #tpu.memory_space<vmem>>, vector<16x128xf32>
    %cst_258 = arith.constant dense<0.000000e+00> : vector<16x256xf32>
    %463 = tpu.matmul %461, %413, %cst_258 {dimension_numbers = #tpu.dot_dimension_numbers<[1], [0], [0], [1], [0, 0, 1, 1], [], []>} : vector<16x128xf32>, vector<128x256xf32>, vector<16x256xf32> -> vector<16x256xf32>
    %464 = vector.extract_strided_slice %463 {offsets = [0, 0], sizes = [8, 128], strides = [1, 1]} : vector<16x256xf32> to vector<8x128xf32>
    %465 = arith.index_cast %c1_i32_252 : i32 to index
    %c0_259 = arith.constant 0 : index
    %c0_260 = arith.constant 0 : index
    %466 = vector.load %arg16[%465, %c0_259, %c0_260] : memref<8x8x256xf32, #tpu.memory_space<vmem>>, vector<1x8x128xf32>
    %467 = vector.shape_cast %466 : vector<1x8x128xf32> to vector<8x128xf32>
    %468 = arith.addf %464, %467 : vector<8x128xf32>
    %469 = vector.extract_strided_slice %463 {offsets = [8, 128], sizes = [8, 128], strides = [1, 1]} : vector<16x256xf32> to vector<8x128xf32>
    %470 = arith.index_cast %460 : i32 to index
    %c0_261 = arith.constant 0 : index
    %c128_262 = arith.constant 128 : index
    %471 = vector.load %arg16[%470, %c0_261, %c128_262] : memref<8x8x256xf32, #tpu.memory_space<vmem>>, vector<1x8x128xf32>
    %472 = vector.shape_cast %471 : vector<1x8x128xf32> to vector<8x128xf32>
    %473 = arith.addf %469, %472 : vector<8x128xf32>
    %474 = tpu.concatenate %468, %473 in 0 : vector<8x128xf32>, vector<8x128xf32> -> vector<16x128xf32>
    %475 = math.tanh %474 : vector<16x128xf32>
    %476 = arith.negf %474 : vector<16x128xf32>
    %477 = math.exp %476 : vector<16x128xf32>
    %cst_263 = arith.constant 1.000000e+00 : f32
    %478 = vector.broadcast %cst_263 : f32 to vector<16x128xf32>
    %479 = arith.addf %478, %477 : vector<16x128xf32>
    %480 = arith.divf %478, %479 : vector<16x128xf32>
    %481 = arith.select %410, %475, %480 : vector<16x128xi1>, vector<16x128xf32>
    %c112_i32_264 = arith.constant 112 : i32
    %482 = tpu.dynamic_rotate %481 by %c112_i32_264 dim 1 : vector<16x128xf32>, i32 -> vector<16x128xf32>
    %c96_i32_265 = arith.constant 96 : i32
    %483 = tpu.dynamic_rotate %481 by %c96_i32_265 dim 1 : vector<16x128xf32>, i32 -> vector<16x128xf32>
    %c80_i32_266 = arith.constant 80 : i32
    %484 = tpu.dynamic_rotate %481 by %c80_i32_266 dim 1 : vector<16x128xf32>, i32 -> vector<16x128xf32>
    %485 = arith.mulf %482, %462 : vector<16x128xf32>
    %486 = arith.mulf %481, %483 : vector<16x128xf32>
    %487 = arith.addf %485, %486 : vector<16x128xf32>
    %488 = math.tanh %487 : vector<16x128xf32>
    %489 = arith.mulf %484, %488 : vector<16x128xf32>
    %cst_267 = arith.constant 0.000000e+00 : f32
    %490 = vector.broadcast %cst_267 : f32 to vector<16x128xf32>
    %491 = arith.select %412, %489, %490 : vector<16x128xi1>, vector<16x128xf32>
    %cst_268 = arith.constant 0.000000e+00 : f32
    %492 = vector.broadcast %cst_268 : f32 to vector<16x128xf32>
    %493 = arith.select %412, %487, %492 : vector<16x128xi1>, vector<16x128xf32>
    %c0_269 = arith.constant 0 : index
    %c0_270 = arith.constant 0 : index
    %494 = vector.load %arg17[%c0_269, %c0_270] : memref<16x128xf32, #tpu.memory_space<vmem>>, vector<16x128xf32>
    tpu.vector_store %arg17[%c0_269, %c0_270], %491 {strides = array<i32>} : memref<16x128xf32, #tpu.memory_space<vmem>>, vector<16x128xf32>,
    %c0_271 = arith.constant 0 : index
    %c0_272 = arith.constant 0 : index
    %495 = vector.load %arg18[%c0_271, %c0_272] : memref<16x128xf32, #tpu.memory_space<vmem>>, vector<16x128xf32>
    tpu.vector_store %arg18[%c0_271, %c0_272], %493 {strides = array<i32>} : memref<16x128xf32, #tpu.memory_space<vmem>>, vector<16x128xf32>,
    %496 = vector.extract_strided_slice %491 {offsets = [0, 0], sizes = [8, 128], strides = [1, 1]} : vector<16x128xf32> to vector<8x128xf32>
    %497 = arith.index_cast %c1_i32_252 : i32 to index
    %c0_273 = arith.constant 0 : index
    %c0_274 = arith.constant 0 : index
    %498 = vector.load %arg15[%497, %c0_273, %c0_274] : memref<8x8x256xf32, #tpu.memory_space<vmem>>, vector<1x8x128xf32>
    %499 = vector.shape_cast %498 : vector<1x8x128xf32> to vector<8x128xf32>
    %500 = vector.shape_cast %496 : vector<8x128xf32> to vector<1x8x128xf32>
    tpu.vector_store %arg15[%497, %c0_273, %c0_274], %500 {strides = array<i32>} : memref<8x8x256xf32, #tpu.memory_space<vmem>>, vector<1x8x128xf32>,
    %501 = vector.extract_strided_slice %491 {offsets = [8, 0], sizes = [8, 128], strides = [1, 1]} : vector<16x128xf32> to vector<8x128xf32>
    %502 = arith.index_cast %460 : i32 to index
    %c0_275 = arith.constant 0 : index
    %c128_276 = arith.constant 128 : index
    %503 = vector.load %arg15[%502, %c0_275, %c128_276] : memref<8x8x256xf32, #tpu.memory_space<vmem>>, vector<1x8x128xf32>
    %504 = vector.shape_cast %503 : vector<1x8x128xf32> to vector<8x128xf32>
    %505 = vector.shape_cast %501 : vector<8x128xf32> to vector<1x8x128xf32>
    tpu.vector_store %arg15[%502, %c0_275, %c128_276], %505 {strides = array<i32>} : memref<8x8x256xf32, #tpu.memory_space<vmem>>, vector<1x8x128xf32>,
    %c2_i32_277 = arith.constant 2 : i32
    %c7_i32_278 = arith.constant 7 : i32
    %506 = arith.subi %c7_i32_278, %c2_i32_277 : i32
    %c0_279 = arith.constant 0 : index
    %c0_280 = arith.constant 0 : index
    %507 = vector.load %arg17[%c0_279, %c0_280] : memref<16x128xf32, #tpu.memory_space<vmem>>, vector<16x128xf32>
    %c0_281 = arith.constant 0 : index
    %c0_282 = arith.constant 0 : index
    %508 = vector.load %arg18[%c0_281, %c0_282] : memref<16x128xf32, #tpu.memory_space<vmem>>, vector<16x128xf32>
    %cst_283 = arith.constant dense<0.000000e+00> : vector<16x256xf32>
    %509 = tpu.matmul %507, %413, %cst_283 {dimension_numbers = #tpu.dot_dimension_numbers<[1], [0], [0], [1], [0, 0, 1, 1], [], []>} : vector<16x128xf32>, vector<128x256xf32>, vector<16x256xf32> -> vector<16x256xf32>
    %510 = vector.extract_strided_slice %509 {offsets = [0, 0], sizes = [8, 128], strides = [1, 1]} : vector<16x256xf32> to vector<8x128xf32>
    %511 = arith.index_cast %c2_i32_277 : i32 to index
    %c0_284 = arith.constant 0 : index
    %c0_285 = arith.constant 0 : index
    %512 = vector.load %arg16[%511, %c0_284, %c0_285] : memref<8x8x256xf32, #tpu.memory_space<vmem>>, vector<1x8x128xf32>
    %513 = vector.shape_cast %512 : vector<1x8x128xf32> to vector<8x128xf32>
    %514 = arith.addf %510, %513 : vector<8x128xf32>
    %515 = vector.extract_strided_slice %509 {offsets = [8, 128], sizes = [8, 128], strides = [1, 1]} : vector<16x256xf32> to vector<8x128xf32>
    %516 = arith.index_cast %506 : i32 to index
    %c0_286 = arith.constant 0 : index
    %c128_287 = arith.constant 128 : index
    %517 = vector.load %arg16[%516, %c0_286, %c128_287] : memref<8x8x256xf32, #tpu.memory_space<vmem>>, vector<1x8x128xf32>
    %518 = vector.shape_cast %517 : vector<1x8x128xf32> to vector<8x128xf32>
    %519 = arith.addf %515, %518 : vector<8x128xf32>
    %520 = tpu.concatenate %514, %519 in 0 : vector<8x128xf32>, vector<8x128xf32> -> vector<16x128xf32>
    %521 = math.tanh %520 : vector<16x128xf32>
    %522 = arith.negf %520 : vector<16x128xf32>
    %523 = math.exp %522 : vector<16x128xf32>
    %cst_288 = arith.constant 1.000000e+00 : f32
    %524 = vector.broadcast %cst_288 : f32 to vector<16x128xf32>
    %525 = arith.addf %524, %523 : vector<16x128xf32>
    %526 = arith.divf %524, %525 : vector<16x128xf32>
    %527 = arith.select %410, %521, %526 : vector<16x128xi1>, vector<16x128xf32>
    %c112_i32_289 = arith.constant 112 : i32
    %528 = tpu.dynamic_rotate %527 by %c112_i32_289 dim 1 : vector<16x128xf32>, i32 -> vector<16x128xf32>
    %c96_i32_290 = arith.constant 96 : i32
    %529 = tpu.dynamic_rotate %527 by %c96_i32_290 dim 1 : vector<16x128xf32>, i32 -> vector<16x128xf32>
    %c80_i32_291 = arith.constant 80 : i32
    %530 = tpu.dynamic_rotate %527 by %c80_i32_291 dim 1 : vector<16x128xf32>, i32 -> vector<16x128xf32>
    %531 = arith.mulf %528, %508 : vector<16x128xf32>
    %532 = arith.mulf %527, %529 : vector<16x128xf32>
    %533 = arith.addf %531, %532 : vector<16x128xf32>
    %534 = math.tanh %533 : vector<16x128xf32>
    %535 = arith.mulf %530, %534 : vector<16x128xf32>
    %cst_292 = arith.constant 0.000000e+00 : f32
    %536 = vector.broadcast %cst_292 : f32 to vector<16x128xf32>
    %537 = arith.select %412, %535, %536 : vector<16x128xi1>, vector<16x128xf32>
    %cst_293 = arith.constant 0.000000e+00 : f32
    %538 = vector.broadcast %cst_293 : f32 to vector<16x128xf32>
    %539 = arith.select %412, %533, %538 : vector<16x128xi1>, vector<16x128xf32>
    %c0_294 = arith.constant 0 : index
    %c0_295 = arith.constant 0 : index
    %540 = vector.load %arg17[%c0_294, %c0_295] : memref<16x128xf32, #tpu.memory_space<vmem>>, vector<16x128xf32>
    tpu.vector_store %arg17[%c0_294, %c0_295], %537 {strides = array<i32>} : memref<16x128xf32, #tpu.memory_space<vmem>>, vector<16x128xf32>,
    %c0_296 = arith.constant 0 : index
    %c0_297 = arith.constant 0 : index
    %541 = vector.load %arg18[%c0_296, %c0_297] : memref<16x128xf32, #tpu.memory_space<vmem>>, vector<16x128xf32>
    tpu.vector_store %arg18[%c0_296, %c0_297], %539 {strides = array<i32>} : memref<16x128xf32, #tpu.memory_space<vmem>>, vector<16x128xf32>,
    %542 = vector.extract_strided_slice %537 {offsets = [0, 0], sizes = [8, 128], strides = [1, 1]} : vector<16x128xf32> to vector<8x128xf32>
    %543 = arith.index_cast %c2_i32_277 : i32 to index
    %c0_298 = arith.constant 0 : index
    %c0_299 = arith.constant 0 : index
    %544 = vector.load %arg15[%543, %c0_298, %c0_299] : memref<8x8x256xf32, #tpu.memory_space<vmem>>, vector<1x8x128xf32>
    %545 = vector.shape_cast %544 : vector<1x8x128xf32> to vector<8x128xf32>
    %546 = vector.shape_cast %542 : vector<8x128xf32> to vector<1x8x128xf32>
    tpu.vector_store %arg15[%543, %c0_298, %c0_299], %546 {strides = array<i32>} : memref<8x8x256xf32, #tpu.memory_space<vmem>>, vector<1x8x128xf32>,
    %547 = vector.extract_strided_slice %537 {offsets = [8, 0], sizes = [8, 128], strides = [1, 1]} : vector<16x128xf32> to vector<8x128xf32>
    %548 = arith.index_cast %506 : i32 to index
    %c0_300 = arith.constant 0 : index
    %c128_301 = arith.constant 128 : index
    %549 = vector.load %arg15[%548, %c0_300, %c128_301] : memref<8x8x256xf32, #tpu.memory_space<vmem>>, vector<1x8x128xf32>
    %550 = vector.shape_cast %549 : vector<1x8x128xf32> to vector<8x128xf32>
    %551 = vector.shape_cast %547 : vector<8x128xf32> to vector<1x8x128xf32>
    tpu.vector_store %arg15[%548, %c0_300, %c128_301], %551 {strides = array<i32>} : memref<8x8x256xf32, #tpu.memory_space<vmem>>, vector<1x8x128xf32>,
    %c3_i32_302 = arith.constant 3 : i32
    %c7_i32_303 = arith.constant 7 : i32
    %552 = arith.subi %c7_i32_303, %c3_i32_302 : i32
    %c0_304 = arith.constant 0 : index
    %c0_305 = arith.constant 0 : index
    %553 = vector.load %arg17[%c0_304, %c0_305] : memref<16x128xf32, #tpu.memory_space<vmem>>, vector<16x128xf32>
    %c0_306 = arith.constant 0 : index
    %c0_307 = arith.constant 0 : index
    %554 = vector.load %arg18[%c0_306, %c0_307] : memref<16x128xf32, #tpu.memory_space<vmem>>, vector<16x128xf32>
    %cst_308 = arith.constant dense<0.000000e+00> : vector<16x256xf32>
    %555 = tpu.matmul %553, %413, %cst_308 {dimension_numbers = #tpu.dot_dimension_numbers<[1], [0], [0], [1], [0, 0, 1, 1], [], []>} : vector<16x128xf32>, vector<128x256xf32>, vector<16x256xf32> -> vector<16x256xf32>
    %556 = vector.extract_strided_slice %555 {offsets = [0, 0], sizes = [8, 128], strides = [1, 1]} : vector<16x256xf32> to vector<8x128xf32>
    %557 = arith.index_cast %c3_i32_302 : i32 to index
    %c0_309 = arith.constant 0 : index
    %c0_310 = arith.constant 0 : index
    %558 = vector.load %arg16[%557, %c0_309, %c0_310] : memref<8x8x256xf32, #tpu.memory_space<vmem>>, vector<1x8x128xf32>
    %559 = vector.shape_cast %558 : vector<1x8x128xf32> to vector<8x128xf32>
    %560 = arith.addf %556, %559 : vector<8x128xf32>
    %561 = vector.extract_strided_slice %555 {offsets = [8, 128], sizes = [8, 128], strides = [1, 1]} : vector<16x256xf32> to vector<8x128xf32>
    %562 = arith.index_cast %552 : i32 to index
    %c0_311 = arith.constant 0 : index
    %c128_312 = arith.constant 128 : index
    %563 = vector.load %arg16[%562, %c0_311, %c128_312] : memref<8x8x256xf32, #tpu.memory_space<vmem>>, vector<1x8x128xf32>
    %564 = vector.shape_cast %563 : vector<1x8x128xf32> to vector<8x128xf32>
    %565 = arith.addf %561, %564 : vector<8x128xf32>
    %566 = tpu.concatenate %560, %565 in 0 : vector<8x128xf32>, vector<8x128xf32> -> vector<16x128xf32>
    %567 = math.tanh %566 : vector<16x128xf32>
    %568 = arith.negf %566 : vector<16x128xf32>
    %569 = math.exp %568 : vector<16x128xf32>
    %cst_313 = arith.constant 1.000000e+00 : f32
    %570 = vector.broadcast %cst_313 : f32 to vector<16x128xf32>
    %571 = arith.addf %570, %569 : vector<16x128xf32>
    %572 = arith.divf %570, %571 : vector<16x128xf32>
    %573 = arith.select %410, %567, %572 : vector<16x128xi1>, vector<16x128xf32>
    %c112_i32_314 = arith.constant 112 : i32
    %574 = tpu.dynamic_rotate %573 by %c112_i32_314 dim 1 : vector<16x128xf32>, i32 -> vector<16x128xf32>
    %c96_i32_315 = arith.constant 96 : i32
    %575 = tpu.dynamic_rotate %573 by %c96_i32_315 dim 1 : vector<16x128xf32>, i32 -> vector<16x128xf32>
    %c80_i32_316 = arith.constant 80 : i32
    %576 = tpu.dynamic_rotate %573 by %c80_i32_316 dim 1 : vector<16x128xf32>, i32 -> vector<16x128xf32>
    %577 = arith.mulf %574, %554 : vector<16x128xf32>
    %578 = arith.mulf %573, %575 : vector<16x128xf32>
    %579 = arith.addf %577, %578 : vector<16x128xf32>
    %580 = math.tanh %579 : vector<16x128xf32>
    %581 = arith.mulf %576, %580 : vector<16x128xf32>
    %cst_317 = arith.constant 0.000000e+00 : f32
    %582 = vector.broadcast %cst_317 : f32 to vector<16x128xf32>
    %583 = arith.select %412, %581, %582 : vector<16x128xi1>, vector<16x128xf32>
    %cst_318 = arith.constant 0.000000e+00 : f32
    %584 = vector.broadcast %cst_318 : f32 to vector<16x128xf32>
    %585 = arith.select %412, %579, %584 : vector<16x128xi1>, vector<16x128xf32>
    %c0_319 = arith.constant 0 : index
    %c0_320 = arith.constant 0 : index
    %586 = vector.load %arg17[%c0_319, %c0_320] : memref<16x128xf32, #tpu.memory_space<vmem>>, vector<16x128xf32>
    tpu.vector_store %arg17[%c0_319, %c0_320], %583 {strides = array<i32>} : memref<16x128xf32, #tpu.memory_space<vmem>>, vector<16x128xf32>,
    %c0_321 = arith.constant 0 : index
    %c0_322 = arith.constant 0 : index
    %587 = vector.load %arg18[%c0_321, %c0_322] : memref<16x128xf32, #tpu.memory_space<vmem>>, vector<16x128xf32>
    tpu.vector_store %arg18[%c0_321, %c0_322], %585 {strides = array<i32>} : memref<16x128xf32, #tpu.memory_space<vmem>>, vector<16x128xf32>,
    %588 = vector.extract_strided_slice %583 {offsets = [0, 0], sizes = [8, 128], strides = [1, 1]} : vector<16x128xf32> to vector<8x128xf32>
    %589 = arith.index_cast %c3_i32_302 : i32 to index
    %c0_323 = arith.constant 0 : index
    %c0_324 = arith.constant 0 : index
    %590 = vector.load %arg15[%589, %c0_323, %c0_324] : memref<8x8x256xf32, #tpu.memory_space<vmem>>, vector<1x8x128xf32>
    %591 = vector.shape_cast %590 : vector<1x8x128xf32> to vector<8x128xf32>
    %592 = vector.shape_cast %588 : vector<8x128xf32> to vector<1x8x128xf32>
    tpu.vector_store %arg15[%589, %c0_323, %c0_324], %592 {strides = array<i32>} : memref<8x8x256xf32, #tpu.memory_space<vmem>>, vector<1x8x128xf32>,
    %593 = vector.extract_strided_slice %583 {offsets = [8, 0], sizes = [8, 128], strides = [1, 1]} : vector<16x128xf32> to vector<8x128xf32>
    %594 = arith.index_cast %552 : i32 to index
    %c0_325 = arith.constant 0 : index
    %c128_326 = arith.constant 128 : index
    %595 = vector.load %arg15[%594, %c0_325, %c128_326] : memref<8x8x256xf32, #tpu.memory_space<vmem>>, vector<1x8x128xf32>
    %596 = vector.shape_cast %595 : vector<1x8x128xf32> to vector<8x128xf32>
    %597 = vector.shape_cast %593 : vector<8x128xf32> to vector<1x8x128xf32>
    tpu.vector_store %arg15[%594, %c0_325, %c128_326], %597 {strides = array<i32>} : memref<8x8x256xf32, #tpu.memory_space<vmem>>, vector<1x8x128xf32>,
    %c4_i32_327 = arith.constant 4 : i32
    %c7_i32_328 = arith.constant 7 : i32
    %598 = arith.subi %c7_i32_328, %c4_i32_327 : i32
    %c0_329 = arith.constant 0 : index
    %c0_330 = arith.constant 0 : index
    %599 = vector.load %arg17[%c0_329, %c0_330] : memref<16x128xf32, #tpu.memory_space<vmem>>, vector<16x128xf32>
    %c0_331 = arith.constant 0 : index
    %c0_332 = arith.constant 0 : index
    %600 = vector.load %arg18[%c0_331, %c0_332] : memref<16x128xf32, #tpu.memory_space<vmem>>, vector<16x128xf32>
    %cst_333 = arith.constant dense<0.000000e+00> : vector<16x256xf32>
    %601 = tpu.matmul %599, %413, %cst_333 {dimension_numbers = #tpu.dot_dimension_numbers<[1], [0], [0], [1], [0, 0, 1, 1], [], []>} : vector<16x128xf32>, vector<128x256xf32>, vector<16x256xf32> -> vector<16x256xf32>
    %602 = vector.extract_strided_slice %601 {offsets = [0, 0], sizes = [8, 128], strides = [1, 1]} : vector<16x256xf32> to vector<8x128xf32>
    %603 = arith.index_cast %c4_i32_327 : i32 to index
    %c0_334 = arith.constant 0 : index
    %c0_335 = arith.constant 0 : index
    %604 = vector.load %arg16[%603, %c0_334, %c0_335] : memref<8x8x256xf32, #tpu.memory_space<vmem>>, vector<1x8x128xf32>
    %605 = vector.shape_cast %604 : vector<1x8x128xf32> to vector<8x128xf32>
    %606 = arith.addf %602, %605 : vector<8x128xf32>
    %607 = vector.extract_strided_slice %601 {offsets = [8, 128], sizes = [8, 128], strides = [1, 1]} : vector<16x256xf32> to vector<8x128xf32>
    %608 = arith.index_cast %598 : i32 to index
    %c0_336 = arith.constant 0 : index
    %c128_337 = arith.constant 128 : index
    %609 = vector.load %arg16[%608, %c0_336, %c128_337] : memref<8x8x256xf32, #tpu.memory_space<vmem>>, vector<1x8x128xf32>
    %610 = vector.shape_cast %609 : vector<1x8x128xf32> to vector<8x128xf32>
    %611 = arith.addf %607, %610 : vector<8x128xf32>
    %612 = tpu.concatenate %606, %611 in 0 : vector<8x128xf32>, vector<8x128xf32> -> vector<16x128xf32>
    %613 = math.tanh %612 : vector<16x128xf32>
    %614 = arith.negf %612 : vector<16x128xf32>
    %615 = math.exp %614 : vector<16x128xf32>
    %cst_338 = arith.constant 1.000000e+00 : f32
    %616 = vector.broadcast %cst_338 : f32 to vector<16x128xf32>
    %617 = arith.addf %616, %615 : vector<16x128xf32>
    %618 = arith.divf %616, %617 : vector<16x128xf32>
    %619 = arith.select %410, %613, %618 : vector<16x128xi1>, vector<16x128xf32>
    %c112_i32_339 = arith.constant 112 : i32
    %620 = tpu.dynamic_rotate %619 by %c112_i32_339 dim 1 : vector<16x128xf32>, i32 -> vector<16x128xf32>
    %c96_i32_340 = arith.constant 96 : i32
    %621 = tpu.dynamic_rotate %619 by %c96_i32_340 dim 1 : vector<16x128xf32>, i32 -> vector<16x128xf32>
    %c80_i32_341 = arith.constant 80 : i32
    %622 = tpu.dynamic_rotate %619 by %c80_i32_341 dim 1 : vector<16x128xf32>, i32 -> vector<16x128xf32>
    %623 = arith.mulf %620, %600 : vector<16x128xf32>
    %624 = arith.mulf %619, %621 : vector<16x128xf32>
    %625 = arith.addf %623, %624 : vector<16x128xf32>
    %626 = math.tanh %625 : vector<16x128xf32>
    %627 = arith.mulf %622, %626 : vector<16x128xf32>
    %cst_342 = arith.constant 0.000000e+00 : f32
    %628 = vector.broadcast %cst_342 : f32 to vector<16x128xf32>
    %629 = arith.select %412, %627, %628 : vector<16x128xi1>, vector<16x128xf32>
    %cst_343 = arith.constant 0.000000e+00 : f32
    %630 = vector.broadcast %cst_343 : f32 to vector<16x128xf32>
    %631 = arith.select %412, %625, %630 : vector<16x128xi1>, vector<16x128xf32>
    %c0_344 = arith.constant 0 : index
    %c0_345 = arith.constant 0 : index
    %632 = vector.load %arg17[%c0_344, %c0_345] : memref<16x128xf32, #tpu.memory_space<vmem>>, vector<16x128xf32>
    tpu.vector_store %arg17[%c0_344, %c0_345], %629 {strides = array<i32>} : memref<16x128xf32, #tpu.memory_space<vmem>>, vector<16x128xf32>,
    %c0_346 = arith.constant 0 : index
    %c0_347 = arith.constant 0 : index
    %633 = vector.load %arg18[%c0_346, %c0_347] : memref<16x128xf32, #tpu.memory_space<vmem>>, vector<16x128xf32>
    tpu.vector_store %arg18[%c0_346, %c0_347], %631 {strides = array<i32>} : memref<16x128xf32, #tpu.memory_space<vmem>>, vector<16x128xf32>,
    %634 = vector.extract_strided_slice %629 {offsets = [0, 0], sizes = [8, 128], strides = [1, 1]} : vector<16x128xf32> to vector<8x128xf32>
    %635 = arith.index_cast %c4_i32_327 : i32 to index
    %c0_348 = arith.constant 0 : index
    %c0_349 = arith.constant 0 : index
    %636 = vector.load %arg15[%635, %c0_348, %c0_349] : memref<8x8x256xf32, #tpu.memory_space<vmem>>, vector<1x8x128xf32>
    %637 = vector.shape_cast %636 : vector<1x8x128xf32> to vector<8x128xf32>
    %638 = vector.shape_cast %634 : vector<8x128xf32> to vector<1x8x128xf32>
    tpu.vector_store %arg15[%635, %c0_348, %c0_349], %638 {strides = array<i32>} : memref<8x8x256xf32, #tpu.memory_space<vmem>>, vector<1x8x128xf32>,
    %639 = vector.extract_strided_slice %629 {offsets = [8, 0], sizes = [8, 128], strides = [1, 1]} : vector<16x128xf32> to vector<8x128xf32>
    %640 = arith.index_cast %598 : i32 to index
    %c0_350 = arith.constant 0 : index
    %c128_351 = arith.constant 128 : index
    %641 = vector.load %arg15[%640, %c0_350, %c128_351] : memref<8x8x256xf32, #tpu.memory_space<vmem>>, vector<1x8x128xf32>
    %642 = vector.shape_cast %641 : vector<1x8x128xf32> to vector<8x128xf32>
    %643 = vector.shape_cast %639 : vector<8x128xf32> to vector<1x8x128xf32>
    tpu.vector_store %arg15[%640, %c0_350, %c128_351], %643 {strides = array<i32>} : memref<8x8x256xf32, #tpu.memory_space<vmem>>, vector<1x8x128xf32>,
    %c5_i32_352 = arith.constant 5 : i32
    %c7_i32_353 = arith.constant 7 : i32
    %644 = arith.subi %c7_i32_353, %c5_i32_352 : i32
    %c0_354 = arith.constant 0 : index
    %c0_355 = arith.constant 0 : index
    %645 = vector.load %arg17[%c0_354, %c0_355] : memref<16x128xf32, #tpu.memory_space<vmem>>, vector<16x128xf32>
    %c0_356 = arith.constant 0 : index
    %c0_357 = arith.constant 0 : index
    %646 = vector.load %arg18[%c0_356, %c0_357] : memref<16x128xf32, #tpu.memory_space<vmem>>, vector<16x128xf32>
    %cst_358 = arith.constant dense<0.000000e+00> : vector<16x256xf32>
    %647 = tpu.matmul %645, %413, %cst_358 {dimension_numbers = #tpu.dot_dimension_numbers<[1], [0], [0], [1], [0, 0, 1, 1], [], []>} : vector<16x128xf32>, vector<128x256xf32>, vector<16x256xf32> -> vector<16x256xf32>
    %648 = vector.extract_strided_slice %647 {offsets = [0, 0], sizes = [8, 128], strides = [1, 1]} : vector<16x256xf32> to vector<8x128xf32>
    %649 = arith.index_cast %c5_i32_352 : i32 to index
    %c0_359 = arith.constant 0 : index
    %c0_360 = arith.constant 0 : index
    %650 = vector.load %arg16[%649, %c0_359, %c0_360] : memref<8x8x256xf32, #tpu.memory_space<vmem>>, vector<1x8x128xf32>
    %651 = vector.shape_cast %650 : vector<1x8x128xf32> to vector<8x128xf32>
    %652 = arith.addf %648, %651 : vector<8x128xf32>
    %653 = vector.extract_strided_slice %647 {offsets = [8, 128], sizes = [8, 128], strides = [1, 1]} : vector<16x256xf32> to vector<8x128xf32>
    %654 = arith.index_cast %644 : i32 to index
    %c0_361 = arith.constant 0 : index
    %c128_362 = arith.constant 128 : index
    %655 = vector.load %arg16[%654, %c0_361, %c128_362] : memref<8x8x256xf32, #tpu.memory_space<vmem>>, vector<1x8x128xf32>
    %656 = vector.shape_cast %655 : vector<1x8x128xf32> to vector<8x128xf32>
    %657 = arith.addf %653, %656 : vector<8x128xf32>
    %658 = tpu.concatenate %652, %657 in 0 : vector<8x128xf32>, vector<8x128xf32> -> vector<16x128xf32>
    %659 = math.tanh %658 : vector<16x128xf32>
    %660 = arith.negf %658 : vector<16x128xf32>
    %661 = math.exp %660 : vector<16x128xf32>
    %cst_363 = arith.constant 1.000000e+00 : f32
    %662 = vector.broadcast %cst_363 : f32 to vector<16x128xf32>
    %663 = arith.addf %662, %661 : vector<16x128xf32>
    %664 = arith.divf %662, %663 : vector<16x128xf32>
    %665 = arith.select %410, %659, %664 : vector<16x128xi1>, vector<16x128xf32>
    %c112_i32_364 = arith.constant 112 : i32
    %666 = tpu.dynamic_rotate %665 by %c112_i32_364 dim 1 : vector<16x128xf32>, i32 -> vector<16x128xf32>
    %c96_i32_365 = arith.constant 96 : i32
    %667 = tpu.dynamic_rotate %665 by %c96_i32_365 dim 1 : vector<16x128xf32>, i32 -> vector<16x128xf32>
    %c80_i32_366 = arith.constant 80 : i32
    %668 = tpu.dynamic_rotate %665 by %c80_i32_366 dim 1 : vector<16x128xf32>, i32 -> vector<16x128xf32>
    %669 = arith.mulf %666, %646 : vector<16x128xf32>
    %670 = arith.mulf %665, %667 : vector<16x128xf32>
    %671 = arith.addf %669, %670 : vector<16x128xf32>
    %672 = math.tanh %671 : vector<16x128xf32>
    %673 = arith.mulf %668, %672 : vector<16x128xf32>
    %cst_367 = arith.constant 0.000000e+00 : f32
    %674 = vector.broadcast %cst_367 : f32 to vector<16x128xf32>
    %675 = arith.select %412, %673, %674 : vector<16x128xi1>, vector<16x128xf32>
    %cst_368 = arith.constant 0.000000e+00 : f32
    %676 = vector.broadcast %cst_368 : f32 to vector<16x128xf32>
    %677 = arith.select %412, %671, %676 : vector<16x128xi1>, vector<16x128xf32>
    %c0_369 = arith.constant 0 : index
    %c0_370 = arith.constant 0 : index
    %678 = vector.load %arg17[%c0_369, %c0_370] : memref<16x128xf32, #tpu.memory_space<vmem>>, vector<16x128xf32>
    tpu.vector_store %arg17[%c0_369, %c0_370], %675 {strides = array<i32>} : memref<16x128xf32, #tpu.memory_space<vmem>>, vector<16x128xf32>,
    %c0_371 = arith.constant 0 : index
    %c0_372 = arith.constant 0 : index
    %679 = vector.load %arg18[%c0_371, %c0_372] : memref<16x128xf32, #tpu.memory_space<vmem>>, vector<16x128xf32>
    tpu.vector_store %arg18[%c0_371, %c0_372], %677 {strides = array<i32>} : memref<16x128xf32, #tpu.memory_space<vmem>>, vector<16x128xf32>,
    %680 = vector.extract_strided_slice %675 {offsets = [0, 0], sizes = [8, 128], strides = [1, 1]} : vector<16x128xf32> to vector<8x128xf32>
    %681 = arith.index_cast %c5_i32_352 : i32 to index
    %c0_373 = arith.constant 0 : index
    %c0_374 = arith.constant 0 : index
    %682 = vector.load %arg15[%681, %c0_373, %c0_374] : memref<8x8x256xf32, #tpu.memory_space<vmem>>, vector<1x8x128xf32>
    %683 = vector.shape_cast %682 : vector<1x8x128xf32> to vector<8x128xf32>
    %684 = vector.shape_cast %680 : vector<8x128xf32> to vector<1x8x128xf32>
    tpu.vector_store %arg15[%681, %c0_373, %c0_374], %684 {strides = array<i32>} : memref<8x8x256xf32, #tpu.memory_space<vmem>>, vector<1x8x128xf32>,
    %685 = vector.extract_strided_slice %675 {offsets = [8, 0], sizes = [8, 128], strides = [1, 1]} : vector<16x128xf32> to vector<8x128xf32>
    %686 = arith.index_cast %644 : i32 to index
    %c0_375 = arith.constant 0 : index
    %c128_376 = arith.constant 128 : index
    %687 = vector.load %arg15[%686, %c0_375, %c128_376] : memref<8x8x256xf32, #tpu.memory_space<vmem>>, vector<1x8x128xf32>
    %688 = vector.shape_cast %687 : vector<1x8x128xf32> to vector<8x128xf32>
    %689 = vector.shape_cast %685 : vector<8x128xf32> to vector<1x8x128xf32>
    tpu.vector_store %arg15[%686, %c0_375, %c128_376], %689 {strides = array<i32>} : memref<8x8x256xf32, #tpu.memory_space<vmem>>, vector<1x8x128xf32>,
    %c6_i32_377 = arith.constant 6 : i32
    %c7_i32_378 = arith.constant 7 : i32
    %690 = arith.subi %c7_i32_378, %c6_i32_377 : i32
    %c0_379 = arith.constant 0 : index
    %c0_380 = arith.constant 0 : index
    %691 = vector.load %arg17[%c0_379, %c0_380] : memref<16x128xf32, #tpu.memory_space<vmem>>, vector<16x128xf32>
    %c0_381 = arith.constant 0 : index
    %c0_382 = arith.constant 0 : index
    %692 = vector.load %arg18[%c0_381, %c0_382] : memref<16x128xf32, #tpu.memory_space<vmem>>, vector<16x128xf32>
    %cst_383 = arith.constant dense<0.000000e+00> : vector<16x256xf32>
    %693 = tpu.matmul %691, %413, %cst_383 {dimension_numbers = #tpu.dot_dimension_numbers<[1], [0], [0], [1], [0, 0, 1, 1], [], []>} : vector<16x128xf32>, vector<128x256xf32>, vector<16x256xf32> -> vector<16x256xf32>
    %694 = vector.extract_strided_slice %693 {offsets = [0, 0], sizes = [8, 128], strides = [1, 1]} : vector<16x256xf32> to vector<8x128xf32>
    %695 = arith.index_cast %c6_i32_377 : i32 to index
    %c0_384 = arith.constant 0 : index
    %c0_385 = arith.constant 0 : index
    %696 = vector.load %arg16[%695, %c0_384, %c0_385] : memref<8x8x256xf32, #tpu.memory_space<vmem>>, vector<1x8x128xf32>
    %697 = vector.shape_cast %696 : vector<1x8x128xf32> to vector<8x128xf32>
    %698 = arith.addf %694, %697 : vector<8x128xf32>
    %699 = vector.extract_strided_slice %693 {offsets = [8, 128], sizes = [8, 128], strides = [1, 1]} : vector<16x256xf32> to vector<8x128xf32>
    %700 = arith.index_cast %690 : i32 to index
    %c0_386 = arith.constant 0 : index
    %c128_387 = arith.constant 128 : index
    %701 = vector.load %arg16[%700, %c0_386, %c128_387] : memref<8x8x256xf32, #tpu.memory_space<vmem>>, vector<1x8x128xf32>
    %702 = vector.shape_cast %701 : vector<1x8x128xf32> to vector<8x128xf32>
    %703 = arith.addf %699, %702 : vector<8x128xf32>
    %704 = tpu.concatenate %698, %703 in 0 : vector<8x128xf32>, vector<8x128xf32> -> vector<16x128xf32>
    %705 = math.tanh %704 : vector<16x128xf32>
    %706 = arith.negf %704 : vector<16x128xf32>
    %707 = math.exp %706 : vector<16x128xf32>
    %cst_388 = arith.constant 1.000000e+00 : f32
    %708 = vector.broadcast %cst_388 : f32 to vector<16x128xf32>
    %709 = arith.addf %708, %707 : vector<16x128xf32>
    %710 = arith.divf %708, %709 : vector<16x128xf32>
    %711 = arith.select %410, %705, %710 : vector<16x128xi1>, vector<16x128xf32>
    %c112_i32_389 = arith.constant 112 : i32
    %712 = tpu.dynamic_rotate %711 by %c112_i32_389 dim 1 : vector<16x128xf32>, i32 -> vector<16x128xf32>
    %c96_i32_390 = arith.constant 96 : i32
    %713 = tpu.dynamic_rotate %711 by %c96_i32_390 dim 1 : vector<16x128xf32>, i32 -> vector<16x128xf32>
    %c80_i32_391 = arith.constant 80 : i32
    %714 = tpu.dynamic_rotate %711 by %c80_i32_391 dim 1 : vector<16x128xf32>, i32 -> vector<16x128xf32>
    %715 = arith.mulf %712, %692 : vector<16x128xf32>
    %716 = arith.mulf %711, %713 : vector<16x128xf32>
    %717 = arith.addf %715, %716 : vector<16x128xf32>
    %718 = math.tanh %717 : vector<16x128xf32>
    %719 = arith.mulf %714, %718 : vector<16x128xf32>
    %cst_392 = arith.constant 0.000000e+00 : f32
    %720 = vector.broadcast %cst_392 : f32 to vector<16x128xf32>
    %721 = arith.select %412, %719, %720 : vector<16x128xi1>, vector<16x128xf32>
    %cst_393 = arith.constant 0.000000e+00 : f32
    %722 = vector.broadcast %cst_393 : f32 to vector<16x128xf32>
    %723 = arith.select %412, %717, %722 : vector<16x128xi1>, vector<16x128xf32>
    %c0_394 = arith.constant 0 : index
    %c0_395 = arith.constant 0 : index
    %724 = vector.load %arg17[%c0_394, %c0_395] : memref<16x128xf32, #tpu.memory_space<vmem>>, vector<16x128xf32>
    tpu.vector_store %arg17[%c0_394, %c0_395], %721 {strides = array<i32>} : memref<16x128xf32, #tpu.memory_space<vmem>>, vector<16x128xf32>,
    %c0_396 = arith.constant 0 : index
    %c0_397 = arith.constant 0 : index
    %725 = vector.load %arg18[%c0_396, %c0_397] : memref<16x128xf32, #tpu.memory_space<vmem>>, vector<16x128xf32>
    tpu.vector_store %arg18[%c0_396, %c0_397], %723 {strides = array<i32>} : memref<16x128xf32, #tpu.memory_space<vmem>>, vector<16x128xf32>,
    %726 = vector.extract_strided_slice %721 {offsets = [0, 0], sizes = [8, 128], strides = [1, 1]} : vector<16x128xf32> to vector<8x128xf32>
    %727 = arith.index_cast %c6_i32_377 : i32 to index
    %c0_398 = arith.constant 0 : index
    %c0_399 = arith.constant 0 : index
    %728 = vector.load %arg15[%727, %c0_398, %c0_399] : memref<8x8x256xf32, #tpu.memory_space<vmem>>, vector<1x8x128xf32>
    %729 = vector.shape_cast %728 : vector<1x8x128xf32> to vector<8x128xf32>
    %730 = vector.shape_cast %726 : vector<8x128xf32> to vector<1x8x128xf32>
    tpu.vector_store %arg15[%727, %c0_398, %c0_399], %730 {strides = array<i32>} : memref<8x8x256xf32, #tpu.memory_space<vmem>>, vector<1x8x128xf32>,
    %731 = vector.extract_strided_slice %721 {offsets = [8, 0], sizes = [8, 128], strides = [1, 1]} : vector<16x128xf32> to vector<8x128xf32>
    %732 = arith.index_cast %690 : i32 to index
    %c0_400 = arith.constant 0 : index
    %c128_401 = arith.constant 128 : index
    %733 = vector.load %arg15[%732, %c0_400, %c128_401] : memref<8x8x256xf32, #tpu.memory_space<vmem>>, vector<1x8x128xf32>
    %734 = vector.shape_cast %733 : vector<1x8x128xf32> to vector<8x128xf32>
    %735 = vector.shape_cast %731 : vector<8x128xf32> to vector<1x8x128xf32>
    tpu.vector_store %arg15[%732, %c0_400, %c128_401], %735 {strides = array<i32>} : memref<8x8x256xf32, #tpu.memory_space<vmem>>, vector<1x8x128xf32>,
    %c7_i32_402 = arith.constant 7 : i32
    %c7_i32_403 = arith.constant 7 : i32
    %736 = arith.subi %c7_i32_403, %c7_i32_402 : i32
    %c0_404 = arith.constant 0 : index
    %c0_405 = arith.constant 0 : index
    %737 = vector.load %arg17[%c0_404, %c0_405] : memref<16x128xf32, #tpu.memory_space<vmem>>, vector<16x128xf32>
    %c0_406 = arith.constant 0 : index
    %c0_407 = arith.constant 0 : index
    %738 = vector.load %arg18[%c0_406, %c0_407] : memref<16x128xf32, #tpu.memory_space<vmem>>, vector<16x128xf32>
    %cst_408 = arith.constant dense<0.000000e+00> : vector<16x256xf32>
    %739 = tpu.matmul %737, %413, %cst_408 {dimension_numbers = #tpu.dot_dimension_numbers<[1], [0], [0], [1], [0, 0, 1, 1], [], []>} : vector<16x128xf32>, vector<128x256xf32>, vector<16x256xf32> -> vector<16x256xf32>
    %740 = vector.extract_strided_slice %739 {offsets = [0, 0], sizes = [8, 128], strides = [1, 1]} : vector<16x256xf32> to vector<8x128xf32>
    %741 = arith.index_cast %c7_i32_402 : i32 to index
    %c0_409 = arith.constant 0 : index
    %c0_410 = arith.constant 0 : index
    %742 = vector.load %arg16[%741, %c0_409, %c0_410] : memref<8x8x256xf32, #tpu.memory_space<vmem>>, vector<1x8x128xf32>
    %743 = vector.shape_cast %742 : vector<1x8x128xf32> to vector<8x128xf32>
    %744 = arith.addf %740, %743 : vector<8x128xf32>
    %745 = vector.extract_strided_slice %739 {offsets = [8, 128], sizes = [8, 128], strides = [1, 1]} : vector<16x256xf32> to vector<8x128xf32>
    %746 = arith.index_cast %736 : i32 to index
    %c0_411 = arith.constant 0 : index
    %c128_412 = arith.constant 128 : index
    %747 = vector.load %arg16[%746, %c0_411, %c128_412] : memref<8x8x256xf32, #tpu.memory_space<vmem>>, vector<1x8x128xf32>
    %748 = vector.shape_cast %747 : vector<1x8x128xf32> to vector<8x128xf32>
    %749 = arith.addf %745, %748 : vector<8x128xf32>
    %750 = tpu.concatenate %744, %749 in 0 : vector<8x128xf32>, vector<8x128xf32> -> vector<16x128xf32>
    %751 = math.tanh %750 : vector<16x128xf32>
    %752 = arith.negf %750 : vector<16x128xf32>
    %753 = math.exp %752 : vector<16x128xf32>
    %cst_413 = arith.constant 1.000000e+00 : f32
    %754 = vector.broadcast %cst_413 : f32 to vector<16x128xf32>
    %755 = arith.addf %754, %753 : vector<16x128xf32>
    %756 = arith.divf %754, %755 : vector<16x128xf32>
    %757 = arith.select %410, %751, %756 : vector<16x128xi1>, vector<16x128xf32>
    %c112_i32_414 = arith.constant 112 : i32
    %758 = tpu.dynamic_rotate %757 by %c112_i32_414 dim 1 : vector<16x128xf32>, i32 -> vector<16x128xf32>
    %c96_i32_415 = arith.constant 96 : i32
    %759 = tpu.dynamic_rotate %757 by %c96_i32_415 dim 1 : vector<16x128xf32>, i32 -> vector<16x128xf32>
    %c80_i32_416 = arith.constant 80 : i32
    %760 = tpu.dynamic_rotate %757 by %c80_i32_416 dim 1 : vector<16x128xf32>, i32 -> vector<16x128xf32>
    %761 = arith.mulf %758, %738 : vector<16x128xf32>
    %762 = arith.mulf %757, %759 : vector<16x128xf32>
    %763 = arith.addf %761, %762 : vector<16x128xf32>
    %764 = math.tanh %763 : vector<16x128xf32>
    %765 = arith.mulf %760, %764 : vector<16x128xf32>
    %cst_417 = arith.constant 0.000000e+00 : f32
    %766 = vector.broadcast %cst_417 : f32 to vector<16x128xf32>
    %767 = arith.select %412, %765, %766 : vector<16x128xi1>, vector<16x128xf32>
    %cst_418 = arith.constant 0.000000e+00 : f32
    %768 = vector.broadcast %cst_418 : f32 to vector<16x128xf32>
    %769 = arith.select %412, %763, %768 : vector<16x128xi1>, vector<16x128xf32>
    %c0_419 = arith.constant 0 : index
    %c0_420 = arith.constant 0 : index
    %770 = vector.load %arg17[%c0_419, %c0_420] : memref<16x128xf32, #tpu.memory_space<vmem>>, vector<16x128xf32>
    tpu.vector_store %arg17[%c0_419, %c0_420], %767 {strides = array<i32>} : memref<16x128xf32, #tpu.memory_space<vmem>>, vector<16x128xf32>,
    %c0_421 = arith.constant 0 : index
    %c0_422 = arith.constant 0 : index
    %771 = vector.load %arg18[%c0_421, %c0_422] : memref<16x128xf32, #tpu.memory_space<vmem>>, vector<16x128xf32>
    tpu.vector_store %arg18[%c0_421, %c0_422], %769 {strides = array<i32>} : memref<16x128xf32, #tpu.memory_space<vmem>>, vector<16x128xf32>,
    %772 = vector.extract_strided_slice %767 {offsets = [0, 0], sizes = [8, 128], strides = [1, 1]} : vector<16x128xf32> to vector<8x128xf32>
    %773 = arith.index_cast %c7_i32_402 : i32 to index
    %c0_423 = arith.constant 0 : index
    %c0_424 = arith.constant 0 : index
    %774 = vector.load %arg15[%773, %c0_423, %c0_424] : memref<8x8x256xf32, #tpu.memory_space<vmem>>, vector<1x8x128xf32>
    %775 = vector.shape_cast %774 : vector<1x8x128xf32> to vector<8x128xf32>
    %776 = vector.shape_cast %772 : vector<8x128xf32> to vector<1x8x128xf32>
    tpu.vector_store %arg15[%773, %c0_423, %c0_424], %776 {strides = array<i32>} : memref<8x8x256xf32, #tpu.memory_space<vmem>>, vector<1x8x128xf32>,
    %777 = vector.extract_strided_slice %767 {offsets = [8, 0], sizes = [8, 128], strides = [1, 1]} : vector<16x128xf32> to vector<8x128xf32>
    %778 = arith.index_cast %736 : i32 to index
    %c0_425 = arith.constant 0 : index
    %c128_426 = arith.constant 128 : index
    %779 = vector.load %arg15[%778, %c0_425, %c128_426] : memref<8x8x256xf32, #tpu.memory_space<vmem>>, vector<1x8x128xf32>
    %780 = vector.shape_cast %779 : vector<1x8x128xf32> to vector<8x128xf32>
    %781 = vector.shape_cast %777 : vector<8x128xf32> to vector<1x8x128xf32>
    tpu.vector_store %arg15[%778, %c0_425, %c128_426], %781 {strides = array<i32>} : memref<8x8x256xf32, #tpu.memory_space<vmem>>, vector<1x8x128xf32>,
    %c8_i32_427 = arith.constant 8 : i32
    %c0_428 = arith.constant 0 : index
    %782 = memref.load %arg0[%c0_428] : memref<3xf32, #tpu.memory_space<smem>>
    %c0_429 = arith.constant 0 : index
    %c0_430 = arith.constant 0 : index
    %c0_431 = arith.constant 0 : index
    %783 = vector.load %arg1[%c0_429, %c0_430, %c0_431] : memref<8x8x256xf32, #tpu.memory_space<vmem>>, vector<8x8x256xf32>
    %784 = vector.broadcast %782 : f32 to vector<8x8x256xf32>
    %785 = arith.mulf %784, %783 : vector<8x8x256xf32>
    %c1 = arith.constant 1 : index
    %786 = memref.load %arg0[%c1] : memref<3xf32, #tpu.memory_space<smem>>
    %c0_432 = arith.constant 0 : index
    %c0_433 = arith.constant 0 : index
    %c0_434 = arith.constant 0 : index
    %787 = vector.load %arg14[%c0_432, %c0_433, %c0_434] : memref<8x8x256xf32, #tpu.memory_space<vmem>>, vector<8x8x256xf32>
    %788 = vector.broadcast %786 : f32 to vector<8x8x256xf32>
    %789 = arith.mulf %788, %787 : vector<8x8x256xf32>
    %790 = arith.addf %785, %789 : vector<8x8x256xf32>
    %c2 = arith.constant 2 : index
    %791 = memref.load %arg0[%c2] : memref<3xf32, #tpu.memory_space<smem>>
    %c0_435 = arith.constant 0 : index
    %c0_436 = arith.constant 0 : index
    %c0_437 = arith.constant 0 : index
    %792 = vector.load %arg15[%c0_435, %c0_436, %c0_437] : memref<8x8x256xf32, #tpu.memory_space<vmem>>, vector<8x8x256xf32>
    %793 = vector.broadcast %791 : f32 to vector<8x8x256xf32>
    %794 = arith.mulf %793, %792 : vector<8x8x256xf32>
    %795 = arith.addf %790, %794 : vector<8x8x256xf32>
    %796 = vector.shape_cast %795 : vector<8x8x256xf32> to vector<64x256xf32>
    %797 = arith.truncf %796 : vector<64x256xf32> to vector<64x256xbf16>
    %c0_438 = arith.constant 0 : index
    %c0_439 = arith.constant 0 : index
    %798 = vector.load %arg8[%c0_438, %c0_439] : memref<256x128xbf16, #tpu.memory_space<vmem>>, vector<256x128xbf16>
    %cst_440 = arith.constant dense<0.000000e+00> : vector<64x128xf32>
    %799 = tpu.matmul %797, %798, %cst_440 {dimension_numbers = #tpu.dot_dimension_numbers<[1], [0], [0], [1], [0, 0, 1, 1], [], []>} : vector<64x256xbf16>, vector<256x128xbf16>, vector<64x128xf32> -> vector<64x128xf32>
    %c0_441 = arith.constant 0 : index
    %c0_442 = arith.constant 0 : index
    %800 = vector.load %arg10[%c0_441, %c0_442] : memref<1x128xf32, #tpu.memory_space<vmem>>, vector<1x128xf32>
    %801 = vector.broadcast %800 : vector<1x128xf32> to vector<64x128xf32>
    %802 = arith.addf %799, %801 : vector<64x128xf32>
    %803 = vector.shape_cast %802 : vector<64x128xf32> to vector<8x8x128xf32>
    %c0_443 = arith.constant 0 : index
    %c0_444 = arith.constant 0 : index
    %c0_445 = arith.constant 0 : index
    %804 = vector.load %arg16[%c0_443, %c0_444, %c0_445] : memref<8x8x256xf32, #tpu.memory_space<vmem>>, vector<8x8x128xf32>
    tpu.vector_store %arg16[%c0_443, %c0_444, %c0_445], %803 {strides = array<i32>} : memref<8x8x256xf32, #tpu.memory_space<vmem>>, vector<8x8x128xf32>,
    %cst_446 = arith.constant 0.000000e+00 : f32
    %805 = vector.broadcast %cst_446 : f32 to vector<16x128xf32>
    %c0_447 = arith.constant 0 : index
    %c0_448 = arith.constant 0 : index
    %806 = vector.load %arg17[%c0_447, %c0_448] : memref<16x128xf32, #tpu.memory_space<vmem>>, vector<16x128xf32>
    tpu.vector_store %arg17[%c0_447, %c0_448], %805 {strides = array<i32>} : memref<16x128xf32, #tpu.memory_space<vmem>>, vector<16x128xf32>,
    %cst_449 = arith.constant 0.000000e+00 : f32
    %807 = vector.broadcast %cst_449 : f32 to vector<16x128xf32>
    %c0_450 = arith.constant 0 : index
    %c0_451 = arith.constant 0 : index
    %808 = vector.load %arg18[%c0_450, %c0_451] : memref<16x128xf32, #tpu.memory_space<vmem>>, vector<16x128xf32>
    tpu.vector_store %arg18[%c0_450, %c0_451], %807 {strides = array<i32>} : memref<16x128xf32, #tpu.memory_space<vmem>>, vector<16x128xf32>,
    %809 = tpu.iota {dimensions = array<i32: 1>} : vector<8x128xi32>
    %c64_i32 = arith.constant 64 : i32
    %810 = vector.broadcast %c64_i32 : i32 to vector<8x128xi32>
    %811 = arith.cmpi sge, %809, %810 : vector<8x128xi32>
    %c96_i32_452 = arith.constant 96 : i32
    %812 = vector.broadcast %c96_i32_452 : i32 to vector<8x128xi32>
    %813 = arith.cmpi slt, %809, %812 : vector<8x128xi32>
    %814 = arith.andi %811, %813 : vector<8x128xi1>
    %c32_i32_453 = arith.constant 32 : i32
    %815 = vector.broadcast %c32_i32_453 : i32 to vector<8x128xi32>
    %816 = arith.cmpi slt, %809, %815 : vector<8x128xi32>
    %c0_454 = arith.constant 0 : index
    %c0_455 = arith.constant 0 : index
    %817 = vector.load %arg9[%c0_454, %c0_455] : memref<128x128xf32, #tpu.memory_space<vmem>>, vector<128x128xf32>
    %c0_i32_456 = arith.constant 0 : i32
    %c0_457 = arith.constant 0 : index
    %c0_458 = arith.constant 0 : index
    %818 = vector.load %arg17[%c0_457, %c0_458] : memref<16x128xf32, #tpu.memory_space<vmem>>, vector<8x128xf32>
    %c0_459 = arith.constant 0 : index
    %c0_460 = arith.constant 0 : index
    %819 = vector.load %arg18[%c0_459, %c0_460] : memref<16x128xf32, #tpu.memory_space<vmem>>, vector<8x128xf32>
    %cst_461 = arith.constant dense<0.000000e+00> : vector<8x128xf32>
    %820 = tpu.matmul %818, %817, %cst_461 {dimension_numbers = #tpu.dot_dimension_numbers<[1], [0], [0], [1], [0, 0, 1, 1], [], []>} : vector<8x128xf32>, vector<128x128xf32>, vector<8x128xf32> -> vector<8x128xf32>
    %821 = arith.index_cast %c0_i32_456 : i32 to index
    %c0_462 = arith.constant 0 : index
    %c0_463 = arith.constant 0 : index
    %822 = vector.load %arg16[%821, %c0_462, %c0_463] : memref<8x8x256xf32, #tpu.memory_space<vmem>>, vector<1x8x128xf32>
    %823 = vector.shape_cast %822 : vector<1x8x128xf32> to vector<8x128xf32>
    %824 = arith.addf %820, %823 : vector<8x128xf32>
    %825 = math.tanh %824 : vector<8x128xf32>
    %826 = arith.negf %824 : vector<8x128xf32>
    %827 = math.exp %826 : vector<8x128xf32>
    %cst_464 = arith.constant 1.000000e+00 : f32
    %828 = vector.broadcast %cst_464 : f32 to vector<8x128xf32>
    %829 = arith.addf %828, %827 : vector<8x128xf32>
    %830 = arith.divf %828, %829 : vector<8x128xf32>
    %831 = arith.select %814, %825, %830 : vector<8x128xi1>, vector<8x128xf32>
    %c96_i32_465 = arith.constant 96 : i32
    %832 = tpu.dynamic_rotate %831 by %c96_i32_465 dim 1 : vector<8x128xf32>, i32 -> vector<8x128xf32>
    %c64_i32_466 = arith.constant 64 : i32
    %833 = tpu.dynamic_rotate %831 by %c64_i32_466 dim 1 : vector<8x128xf32>, i32 -> vector<8x128xf32>
    %c32_i32_467 = arith.constant 32 : i32
    %834 = tpu.dynamic_rotate %831 by %c32_i32_467 dim 1 : vector<8x128xf32>, i32 -> vector<8x128xf32>
    %835 = arith.mulf %832, %819 : vector<8x128xf32>
    %836 = arith.mulf %831, %833 : vector<8x128xf32>
    %837 = arith.addf %835, %836 : vector<8x128xf32>
    %838 = math.tanh %837 : vector<8x128xf32>
    %839 = arith.mulf %834, %838 : vector<8x128xf32>
    %cst_468 = arith.constant 0.000000e+00 : f32
    %840 = vector.broadcast %cst_468 : f32 to vector<8x128xf32>
    %841 = arith.select %816, %839, %840 : vector<8x128xi1>, vector<8x128xf32>
    %cst_469 = arith.constant 0.000000e+00 : f32
    %842 = vector.broadcast %cst_469 : f32 to vector<8x128xf32>
    %843 = arith.select %816, %837, %842 : vector<8x128xi1>, vector<8x128xf32>
    %c0_470 = arith.constant 0 : index
    %c0_471 = arith.constant 0 : index
    %844 = vector.load %arg17[%c0_470, %c0_471] : memref<16x128xf32, #tpu.memory_space<vmem>>, vector<8x128xf32>
    tpu.vector_store %arg17[%c0_470, %c0_471], %841 {strides = array<i32>} : memref<16x128xf32, #tpu.memory_space<vmem>>, vector<8x128xf32>,
    %c0_472 = arith.constant 0 : index
    %c0_473 = arith.constant 0 : index
    %845 = vector.load %arg18[%c0_472, %c0_473] : memref<16x128xf32, #tpu.memory_space<vmem>>, vector<8x128xf32>
    tpu.vector_store %arg18[%c0_472, %c0_473], %843 {strides = array<i32>} : memref<16x128xf32, #tpu.memory_space<vmem>>, vector<8x128xf32>,
    %c1_i32_474 = arith.constant 1 : i32
    %c0_475 = arith.constant 0 : index
    %c0_476 = arith.constant 0 : index
    %846 = vector.load %arg17[%c0_475, %c0_476] : memref<16x128xf32, #tpu.memory_space<vmem>>, vector<8x128xf32>
    %c0_477 = arith.constant 0 : index
    %c0_478 = arith.constant 0 : index
    %847 = vector.load %arg18[%c0_477, %c0_478] : memref<16x128xf32, #tpu.memory_space<vmem>>, vector<8x128xf32>
    %cst_479 = arith.constant dense<0.000000e+00> : vector<8x128xf32>
    %848 = tpu.matmul %846, %817, %cst_479 {dimension_numbers = #tpu.dot_dimension_numbers<[1], [0], [0], [1], [0, 0, 1, 1], [], []>} : vector<8x128xf32>, vector<128x128xf32>, vector<8x128xf32> -> vector<8x128xf32>
    %849 = arith.index_cast %c1_i32_474 : i32 to index
    %c0_480 = arith.constant 0 : index
    %c0_481 = arith.constant 0 : index
    %850 = vector.load %arg16[%849, %c0_480, %c0_481] : memref<8x8x256xf32, #tpu.memory_space<vmem>>, vector<1x8x128xf32>
    %851 = vector.shape_cast %850 : vector<1x8x128xf32> to vector<8x128xf32>
    %852 = arith.addf %848, %851 : vector<8x128xf32>
    %853 = math.tanh %852 : vector<8x128xf32>
    %854 = arith.negf %852 : vector<8x128xf32>
    %855 = math.exp %854 : vector<8x128xf32>
    %cst_482 = arith.constant 1.000000e+00 : f32
    %856 = vector.broadcast %cst_482 : f32 to vector<8x128xf32>
    %857 = arith.addf %856, %855 : vector<8x128xf32>
    %858 = arith.divf %856, %857 : vector<8x128xf32>
    %859 = arith.select %814, %853, %858 : vector<8x128xi1>, vector<8x128xf32>
    %c96_i32_483 = arith.constant 96 : i32
    %860 = tpu.dynamic_rotate %859 by %c96_i32_483 dim 1 : vector<8x128xf32>, i32 -> vector<8x128xf32>
    %c64_i32_484 = arith.constant 64 : i32
    %861 = tpu.dynamic_rotate %859 by %c64_i32_484 dim 1 : vector<8x128xf32>, i32 -> vector<8x128xf32>
    %c32_i32_485 = arith.constant 32 : i32
    %862 = tpu.dynamic_rotate %859 by %c32_i32_485 dim 1 : vector<8x128xf32>, i32 -> vector<8x128xf32>
    %863 = arith.mulf %860, %847 : vector<8x128xf32>
    %864 = arith.mulf %859, %861 : vector<8x128xf32>
    %865 = arith.addf %863, %864 : vector<8x128xf32>
    %866 = math.tanh %865 : vector<8x128xf32>
    %867 = arith.mulf %862, %866 : vector<8x128xf32>
    %cst_486 = arith.constant 0.000000e+00 : f32
    %868 = vector.broadcast %cst_486 : f32 to vector<8x128xf32>
    %869 = arith.select %816, %867, %868 : vector<8x128xi1>, vector<8x128xf32>
    %cst_487 = arith.constant 0.000000e+00 : f32
    %870 = vector.broadcast %cst_487 : f32 to vector<8x128xf32>
    %871 = arith.select %816, %865, %870 : vector<8x128xi1>, vector<8x128xf32>
    %c0_488 = arith.constant 0 : index
    %c0_489 = arith.constant 0 : index
    %872 = vector.load %arg17[%c0_488, %c0_489] : memref<16x128xf32, #tpu.memory_space<vmem>>, vector<8x128xf32>
    tpu.vector_store %arg17[%c0_488, %c0_489], %869 {strides = array<i32>} : memref<16x128xf32, #tpu.memory_space<vmem>>, vector<8x128xf32>,
    %c0_490 = arith.constant 0 : index
    %c0_491 = arith.constant 0 : index
    %873 = vector.load %arg18[%c0_490, %c0_491] : memref<16x128xf32, #tpu.memory_space<vmem>>, vector<8x128xf32>
    tpu.vector_store %arg18[%c0_490, %c0_491], %871 {strides = array<i32>} : memref<16x128xf32, #tpu.memory_space<vmem>>, vector<8x128xf32>,
    %c2_i32_492 = arith.constant 2 : i32
    %c0_493 = arith.constant 0 : index
    %c0_494 = arith.constant 0 : index
    %874 = vector.load %arg17[%c0_493, %c0_494] : memref<16x128xf32, #tpu.memory_space<vmem>>, vector<8x128xf32>
    %c0_495 = arith.constant 0 : index
    %c0_496 = arith.constant 0 : index
    %875 = vector.load %arg18[%c0_495, %c0_496] : memref<16x128xf32, #tpu.memory_space<vmem>>, vector<8x128xf32>
    %cst_497 = arith.constant dense<0.000000e+00> : vector<8x128xf32>
    %876 = tpu.matmul %874, %817, %cst_497 {dimension_numbers = #tpu.dot_dimension_numbers<[1], [0], [0], [1], [0, 0, 1, 1], [], []>} : vector<8x128xf32>, vector<128x128xf32>, vector<8x128xf32> -> vector<8x128xf32>
    %877 = arith.index_cast %c2_i32_492 : i32 to index
    %c0_498 = arith.constant 0 : index
    %c0_499 = arith.constant 0 : index
    %878 = vector.load %arg16[%877, %c0_498, %c0_499] : memref<8x8x256xf32, #tpu.memory_space<vmem>>, vector<1x8x128xf32>
    %879 = vector.shape_cast %878 : vector<1x8x128xf32> to vector<8x128xf32>
    %880 = arith.addf %876, %879 : vector<8x128xf32>
    %881 = math.tanh %880 : vector<8x128xf32>
    %882 = arith.negf %880 : vector<8x128xf32>
    %883 = math.exp %882 : vector<8x128xf32>
    %cst_500 = arith.constant 1.000000e+00 : f32
    %884 = vector.broadcast %cst_500 : f32 to vector<8x128xf32>
    %885 = arith.addf %884, %883 : vector<8x128xf32>
    %886 = arith.divf %884, %885 : vector<8x128xf32>
    %887 = arith.select %814, %881, %886 : vector<8x128xi1>, vector<8x128xf32>
    %c96_i32_501 = arith.constant 96 : i32
    %888 = tpu.dynamic_rotate %887 by %c96_i32_501 dim 1 : vector<8x128xf32>, i32 -> vector<8x128xf32>
    %c64_i32_502 = arith.constant 64 : i32
    %889 = tpu.dynamic_rotate %887 by %c64_i32_502 dim 1 : vector<8x128xf32>, i32 -> vector<8x128xf32>
    %c32_i32_503 = arith.constant 32 : i32
    %890 = tpu.dynamic_rotate %887 by %c32_i32_503 dim 1 : vector<8x128xf32>, i32 -> vector<8x128xf32>
    %891 = arith.mulf %888, %875 : vector<8x128xf32>
    %892 = arith.mulf %887, %889 : vector<8x128xf32>
    %893 = arith.addf %891, %892 : vector<8x128xf32>
    %894 = math.tanh %893 : vector<8x128xf32>
    %895 = arith.mulf %890, %894 : vector<8x128xf32>
    %cst_504 = arith.constant 0.000000e+00 : f32
    %896 = vector.broadcast %cst_504 : f32 to vector<8x128xf32>
    %897 = arith.select %816, %895, %896 : vector<8x128xi1>, vector<8x128xf32>
    %cst_505 = arith.constant 0.000000e+00 : f32
    %898 = vector.broadcast %cst_505 : f32 to vector<8x128xf32>
    %899 = arith.select %816, %893, %898 : vector<8x128xi1>, vector<8x128xf32>
    %c0_506 = arith.constant 0 : index
    %c0_507 = arith.constant 0 : index
    %900 = vector.load %arg17[%c0_506, %c0_507] : memref<16x128xf32, #tpu.memory_space<vmem>>, vector<8x128xf32>
    tpu.vector_store %arg17[%c0_506, %c0_507], %897 {strides = array<i32>} : memref<16x128xf32, #tpu.memory_space<vmem>>, vector<8x128xf32>,
    %c0_508 = arith.constant 0 : index
    %c0_509 = arith.constant 0 : index
    %901 = vector.load %arg18[%c0_508, %c0_509] : memref<16x128xf32, #tpu.memory_space<vmem>>, vector<8x128xf32>
    tpu.vector_store %arg18[%c0_508, %c0_509], %899 {strides = array<i32>} : memref<16x128xf32, #tpu.memory_space<vmem>>, vector<8x128xf32>,
    %c3_i32_510 = arith.constant 3 : i32
    %c0_511 = arith.constant 0 : index
    %c0_512 = arith.constant 0 : index
    %902 = vector.load %arg17[%c0_511, %c0_512] : memref<16x128xf32, #tpu.memory_space<vmem>>, vector<8x128xf32>
    %c0_513 = arith.constant 0 : index
    %c0_514 = arith.constant 0 : index
    %903 = vector.load %arg18[%c0_513, %c0_514] : memref<16x128xf32, #tpu.memory_space<vmem>>, vector<8x128xf32>
    %cst_515 = arith.constant dense<0.000000e+00> : vector<8x128xf32>
    %904 = tpu.matmul %902, %817, %cst_515 {dimension_numbers = #tpu.dot_dimension_numbers<[1], [0], [0], [1], [0, 0, 1, 1], [], []>} : vector<8x128xf32>, vector<128x128xf32>, vector<8x128xf32> -> vector<8x128xf32>
    %905 = arith.index_cast %c3_i32_510 : i32 to index
    %c0_516 = arith.constant 0 : index
    %c0_517 = arith.constant 0 : index
    %906 = vector.load %arg16[%905, %c0_516, %c0_517] : memref<8x8x256xf32, #tpu.memory_space<vmem>>, vector<1x8x128xf32>
    %907 = vector.shape_cast %906 : vector<1x8x128xf32> to vector<8x128xf32>
    %908 = arith.addf %904, %907 : vector<8x128xf32>
    %909 = math.tanh %908 : vector<8x128xf32>
    %910 = arith.negf %908 : vector<8x128xf32>
    %911 = math.exp %910 : vector<8x128xf32>
    %cst_518 = arith.constant 1.000000e+00 : f32
    %912 = vector.broadcast %cst_518 : f32 to vector<8x128xf32>
    %913 = arith.addf %912, %911 : vector<8x128xf32>
    %914 = arith.divf %912, %913 : vector<8x128xf32>
    %915 = arith.select %814, %909, %914 : vector<8x128xi1>, vector<8x128xf32>
    %c96_i32_519 = arith.constant 96 : i32
    %916 = tpu.dynamic_rotate %915 by %c96_i32_519 dim 1 : vector<8x128xf32>, i32 -> vector<8x128xf32>
    %c64_i32_520 = arith.constant 64 : i32
    %917 = tpu.dynamic_rotate %915 by %c64_i32_520 dim 1 : vector<8x128xf32>, i32 -> vector<8x128xf32>
    %c32_i32_521 = arith.constant 32 : i32
    %918 = tpu.dynamic_rotate %915 by %c32_i32_521 dim 1 : vector<8x128xf32>, i32 -> vector<8x128xf32>
    %919 = arith.mulf %916, %903 : vector<8x128xf32>
    %920 = arith.mulf %915, %917 : vector<8x128xf32>
    %921 = arith.addf %919, %920 : vector<8x128xf32>
    %922 = math.tanh %921 : vector<8x128xf32>
    %923 = arith.mulf %918, %922 : vector<8x128xf32>
    %cst_522 = arith.constant 0.000000e+00 : f32
    %924 = vector.broadcast %cst_522 : f32 to vector<8x128xf32>
    %925 = arith.select %816, %923, %924 : vector<8x128xi1>, vector<8x128xf32>
    %cst_523 = arith.constant 0.000000e+00 : f32
    %926 = vector.broadcast %cst_523 : f32 to vector<8x128xf32>
    %927 = arith.select %816, %921, %926 : vector<8x128xi1>, vector<8x128xf32>
    %c0_524 = arith.constant 0 : index
    %c0_525 = arith.constant 0 : index
    %928 = vector.load %arg17[%c0_524, %c0_525] : memref<16x128xf32, #tpu.memory_space<vmem>>, vector<8x128xf32>
    tpu.vector_store %arg17[%c0_524, %c0_525], %925 {strides = array<i32>} : memref<16x128xf32, #tpu.memory_space<vmem>>, vector<8x128xf32>,
    %c0_526 = arith.constant 0 : index
    %c0_527 = arith.constant 0 : index
    %929 = vector.load %arg18[%c0_526, %c0_527] : memref<16x128xf32, #tpu.memory_space<vmem>>, vector<8x128xf32>
    tpu.vector_store %arg18[%c0_526, %c0_527], %927 {strides = array<i32>} : memref<16x128xf32, #tpu.memory_space<vmem>>, vector<8x128xf32>,
    %c4_i32_528 = arith.constant 4 : i32
    %c0_529 = arith.constant 0 : index
    %c0_530 = arith.constant 0 : index
    %930 = vector.load %arg17[%c0_529, %c0_530] : memref<16x128xf32, #tpu.memory_space<vmem>>, vector<8x128xf32>
    %c0_531 = arith.constant 0 : index
    %c0_532 = arith.constant 0 : index
    %931 = vector.load %arg18[%c0_531, %c0_532] : memref<16x128xf32, #tpu.memory_space<vmem>>, vector<8x128xf32>
    %cst_533 = arith.constant dense<0.000000e+00> : vector<8x128xf32>
    %932 = tpu.matmul %930, %817, %cst_533 {dimension_numbers = #tpu.dot_dimension_numbers<[1], [0], [0], [1], [0, 0, 1, 1], [], []>} : vector<8x128xf32>, vector<128x128xf32>, vector<8x128xf32> -> vector<8x128xf32>
    %933 = arith.index_cast %c4_i32_528 : i32 to index
    %c0_534 = arith.constant 0 : index
    %c0_535 = arith.constant 0 : index
    %934 = vector.load %arg16[%933, %c0_534, %c0_535] : memref<8x8x256xf32, #tpu.memory_space<vmem>>, vector<1x8x128xf32>
    %935 = vector.shape_cast %934 : vector<1x8x128xf32> to vector<8x128xf32>
    %936 = arith.addf %932, %935 : vector<8x128xf32>
    %937 = math.tanh %936 : vector<8x128xf32>
    %938 = arith.negf %936 : vector<8x128xf32>
    %939 = math.exp %938 : vector<8x128xf32>
    %cst_536 = arith.constant 1.000000e+00 : f32
    %940 = vector.broadcast %cst_536 : f32 to vector<8x128xf32>
    %941 = arith.addf %940, %939 : vector<8x128xf32>
    %942 = arith.divf %940, %941 : vector<8x128xf32>
    %943 = arith.select %814, %937, %942 : vector<8x128xi1>, vector<8x128xf32>
    %c96_i32_537 = arith.constant 96 : i32
    %944 = tpu.dynamic_rotate %943 by %c96_i32_537 dim 1 : vector<8x128xf32>, i32 -> vector<8x128xf32>
    %c64_i32_538 = arith.constant 64 : i32
    %945 = tpu.dynamic_rotate %943 by %c64_i32_538 dim 1 : vector<8x128xf32>, i32 -> vector<8x128xf32>
    %c32_i32_539 = arith.constant 32 : i32
    %946 = tpu.dynamic_rotate %943 by %c32_i32_539 dim 1 : vector<8x128xf32>, i32 -> vector<8x128xf32>
    %947 = arith.mulf %944, %931 : vector<8x128xf32>
    %948 = arith.mulf %943, %945 : vector<8x128xf32>
    %949 = arith.addf %947, %948 : vector<8x128xf32>
    %950 = math.tanh %949 : vector<8x128xf32>
    %951 = arith.mulf %946, %950 : vector<8x128xf32>
    %cst_540 = arith.constant 0.000000e+00 : f32
    %952 = vector.broadcast %cst_540 : f32 to vector<8x128xf32>
    %953 = arith.select %816, %951, %952 : vector<8x128xi1>, vector<8x128xf32>
    %cst_541 = arith.constant 0.000000e+00 : f32
    %954 = vector.broadcast %cst_541 : f32 to vector<8x128xf32>
    %955 = arith.select %816, %949, %954 : vector<8x128xi1>, vector<8x128xf32>
    %c0_542 = arith.constant 0 : index
    %c0_543 = arith.constant 0 : index
    %956 = vector.load %arg17[%c0_542, %c0_543] : memref<16x128xf32, #tpu.memory_space<vmem>>, vector<8x128xf32>
    tpu.vector_store %arg17[%c0_542, %c0_543], %953 {strides = array<i32>} : memref<16x128xf32, #tpu.memory_space<vmem>>, vector<8x128xf32>,
    %c0_544 = arith.constant 0 : index
    %c0_545 = arith.constant 0 : index
    %957 = vector.load %arg18[%c0_544, %c0_545] : memref<16x128xf32, #tpu.memory_space<vmem>>, vector<8x128xf32>
    tpu.vector_store %arg18[%c0_544, %c0_545], %955 {strides = array<i32>} : memref<16x128xf32, #tpu.memory_space<vmem>>, vector<8x128xf32>,
    %c5_i32_546 = arith.constant 5 : i32
    %c0_547 = arith.constant 0 : index
    %c0_548 = arith.constant 0 : index
    %958 = vector.load %arg17[%c0_547, %c0_548] : memref<16x128xf32, #tpu.memory_space<vmem>>, vector<8x128xf32>
    %c0_549 = arith.constant 0 : index
    %c0_550 = arith.constant 0 : index
    %959 = vector.load %arg18[%c0_549, %c0_550] : memref<16x128xf32, #tpu.memory_space<vmem>>, vector<8x128xf32>
    %cst_551 = arith.constant dense<0.000000e+00> : vector<8x128xf32>
    %960 = tpu.matmul %958, %817, %cst_551 {dimension_numbers = #tpu.dot_dimension_numbers<[1], [0], [0], [1], [0, 0, 1, 1], [], []>} : vector<8x128xf32>, vector<128x128xf32>, vector<8x128xf32> -> vector<8x128xf32>
    %961 = arith.index_cast %c5_i32_546 : i32 to index
    %c0_552 = arith.constant 0 : index
    %c0_553 = arith.constant 0 : index
    %962 = vector.load %arg16[%961, %c0_552, %c0_553] : memref<8x8x256xf32, #tpu.memory_space<vmem>>, vector<1x8x128xf32>
    %963 = vector.shape_cast %962 : vector<1x8x128xf32> to vector<8x128xf32>
    %964 = arith.addf %960, %963 : vector<8x128xf32>
    %965 = math.tanh %964 : vector<8x128xf32>
    %966 = arith.negf %964 : vector<8x128xf32>
    %967 = math.exp %966 : vector<8x128xf32>
    %cst_554 = arith.constant 1.000000e+00 : f32
    %968 = vector.broadcast %cst_554 : f32 to vector<8x128xf32>
    %969 = arith.addf %968, %967 : vector<8x128xf32>
    %970 = arith.divf %968, %969 : vector<8x128xf32>
    %971 = arith.select %814, %965, %970 : vector<8x128xi1>, vector<8x128xf32>
    %c96_i32_555 = arith.constant 96 : i32
    %972 = tpu.dynamic_rotate %971 by %c96_i32_555 dim 1 : vector<8x128xf32>, i32 -> vector<8x128xf32>
    %c64_i32_556 = arith.constant 64 : i32
    %973 = tpu.dynamic_rotate %971 by %c64_i32_556 dim 1 : vector<8x128xf32>, i32 -> vector<8x128xf32>
    %c32_i32_557 = arith.constant 32 : i32
    %974 = tpu.dynamic_rotate %971 by %c32_i32_557 dim 1 : vector<8x128xf32>, i32 -> vector<8x128xf32>
    %975 = arith.mulf %972, %959 : vector<8x128xf32>
    %976 = arith.mulf %971, %973 : vector<8x128xf32>
    %977 = arith.addf %975, %976 : vector<8x128xf32>
    %978 = math.tanh %977 : vector<8x128xf32>
    %979 = arith.mulf %974, %978 : vector<8x128xf32>
    %cst_558 = arith.constant 0.000000e+00 : f32
    %980 = vector.broadcast %cst_558 : f32 to vector<8x128xf32>
    %981 = arith.select %816, %979, %980 : vector<8x128xi1>, vector<8x128xf32>
    %cst_559 = arith.constant 0.000000e+00 : f32
    %982 = vector.broadcast %cst_559 : f32 to vector<8x128xf32>
    %983 = arith.select %816, %977, %982 : vector<8x128xi1>, vector<8x128xf32>
    %c0_560 = arith.constant 0 : index
    %c0_561 = arith.constant 0 : index
    %984 = vector.load %arg17[%c0_560, %c0_561] : memref<16x128xf32, #tpu.memory_space<vmem>>, vector<8x128xf32>
    tpu.vector_store %arg17[%c0_560, %c0_561], %981 {strides = array<i32>} : memref<16x128xf32, #tpu.memory_space<vmem>>, vector<8x128xf32>,
    %c0_562 = arith.constant 0 : index
    %c0_563 = arith.constant 0 : index
    %985 = vector.load %arg18[%c0_562, %c0_563] : memref<16x128xf32, #tpu.memory_space<vmem>>, vector<8x128xf32>
    tpu.vector_store %arg18[%c0_562, %c0_563], %983 {strides = array<i32>} : memref<16x128xf32, #tpu.memory_space<vmem>>, vector<8x128xf32>,
    %c6_i32_564 = arith.constant 6 : i32
    %c0_565 = arith.constant 0 : index
    %c0_566 = arith.constant 0 : index
    %986 = vector.load %arg17[%c0_565, %c0_566] : memref<16x128xf32, #tpu.memory_space<vmem>>, vector<8x128xf32>
    %c0_567 = arith.constant 0 : index
    %c0_568 = arith.constant 0 : index
    %987 = vector.load %arg18[%c0_567, %c0_568] : memref<16x128xf32, #tpu.memory_space<vmem>>, vector<8x128xf32>
    %cst_569 = arith.constant dense<0.000000e+00> : vector<8x128xf32>
    %988 = tpu.matmul %986, %817, %cst_569 {dimension_numbers = #tpu.dot_dimension_numbers<[1], [0], [0], [1], [0, 0, 1, 1], [], []>} : vector<8x128xf32>, vector<128x128xf32>, vector<8x128xf32> -> vector<8x128xf32>
    %989 = arith.index_cast %c6_i32_564 : i32 to index
    %c0_570 = arith.constant 0 : index
    %c0_571 = arith.constant 0 : index
    %990 = vector.load %arg16[%989, %c0_570, %c0_571] : memref<8x8x256xf32, #tpu.memory_space<vmem>>, vector<1x8x128xf32>
    %991 = vector.shape_cast %990 : vector<1x8x128xf32> to vector<8x128xf32>
    %992 = arith.addf %988, %991 : vector<8x128xf32>
    %993 = math.tanh %992 : vector<8x128xf32>
    %994 = arith.negf %992 : vector<8x128xf32>
    %995 = math.exp %994 : vector<8x128xf32>
    %cst_572 = arith.constant 1.000000e+00 : f32
    %996 = vector.broadcast %cst_572 : f32 to vector<8x128xf32>
    %997 = arith.addf %996, %995 : vector<8x128xf32>
    %998 = arith.divf %996, %997 : vector<8x128xf32>
    %999 = arith.select %814, %993, %998 : vector<8x128xi1>, vector<8x128xf32>
    %c96_i32_573 = arith.constant 96 : i32
    %1000 = tpu.dynamic_rotate %999 by %c96_i32_573 dim 1 : vector<8x128xf32>, i32 -> vector<8x128xf32>
    %c64_i32_574 = arith.constant 64 : i32
    %1001 = tpu.dynamic_rotate %999 by %c64_i32_574 dim 1 : vector<8x128xf32>, i32 -> vector<8x128xf32>
    %c32_i32_575 = arith.constant 32 : i32
    %1002 = tpu.dynamic_rotate %999 by %c32_i32_575 dim 1 : vector<8x128xf32>, i32 -> vector<8x128xf32>
    %1003 = arith.mulf %1000, %987 : vector<8x128xf32>
    %1004 = arith.mulf %999, %1001 : vector<8x128xf32>
    %1005 = arith.addf %1003, %1004 : vector<8x128xf32>
    %1006 = math.tanh %1005 : vector<8x128xf32>
    %1007 = arith.mulf %1002, %1006 : vector<8x128xf32>
    %cst_576 = arith.constant 0.000000e+00 : f32
    %1008 = vector.broadcast %cst_576 : f32 to vector<8x128xf32>
    %1009 = arith.select %816, %1007, %1008 : vector<8x128xi1>, vector<8x128xf32>
    %cst_577 = arith.constant 0.000000e+00 : f32
    %1010 = vector.broadcast %cst_577 : f32 to vector<8x128xf32>
    %1011 = arith.select %816, %1005, %1010 : vector<8x128xi1>, vector<8x128xf32>
    %c0_578 = arith.constant 0 : index
    %c0_579 = arith.constant 0 : index
    %1012 = vector.load %arg17[%c0_578, %c0_579] : memref<16x128xf32, #tpu.memory_space<vmem>>, vector<8x128xf32>
    tpu.vector_store %arg17[%c0_578, %c0_579], %1009 {strides = array<i32>} : memref<16x128xf32, #tpu.memory_space<vmem>>, vector<8x128xf32>,
    %c0_580 = arith.constant 0 : index
    %c0_581 = arith.constant 0 : index
    %1013 = vector.load %arg18[%c0_580, %c0_581] : memref<16x128xf32, #tpu.memory_space<vmem>>, vector<8x128xf32>
    tpu.vector_store %arg18[%c0_580, %c0_581], %1011 {strides = array<i32>} : memref<16x128xf32, #tpu.memory_space<vmem>>, vector<8x128xf32>,
    %c7_i32_582 = arith.constant 7 : i32
    %c0_583 = arith.constant 0 : index
    %c0_584 = arith.constant 0 : index
    %1014 = vector.load %arg17[%c0_583, %c0_584] : memref<16x128xf32, #tpu.memory_space<vmem>>, vector<8x128xf32>
    %c0_585 = arith.constant 0 : index
    %c0_586 = arith.constant 0 : index
    %1015 = vector.load %arg18[%c0_585, %c0_586] : memref<16x128xf32, #tpu.memory_space<vmem>>, vector<8x128xf32>
    %cst_587 = arith.constant dense<0.000000e+00> : vector<8x128xf32>
    %1016 = tpu.matmul %1014, %817, %cst_587 {dimension_numbers = #tpu.dot_dimension_numbers<[1], [0], [0], [1], [0, 0, 1, 1], [], []>} : vector<8x128xf32>, vector<128x128xf32>, vector<8x128xf32> -> vector<8x128xf32>
    %1017 = arith.index_cast %c7_i32_582 : i32 to index
    %c0_588 = arith.constant 0 : index
    %c0_589 = arith.constant 0 : index
    %1018 = vector.load %arg16[%1017, %c0_588, %c0_589] : memref<8x8x256xf32, #tpu.memory_space<vmem>>, vector<1x8x128xf32>
    %1019 = vector.shape_cast %1018 : vector<1x8x128xf32> to vector<8x128xf32>
    %1020 = arith.addf %1016, %1019 : vector<8x128xf32>
    %1021 = math.tanh %1020 : vector<8x128xf32>
    %1022 = arith.negf %1020 : vector<8x128xf32>
    %1023 = math.exp %1022 : vector<8x128xf32>
    %cst_590 = arith.constant 1.000000e+00 : f32
    %1024 = vector.broadcast %cst_590 : f32 to vector<8x128xf32>
    %1025 = arith.addf %1024, %1023 : vector<8x128xf32>
    %1026 = arith.divf %1024, %1025 : vector<8x128xf32>
    %1027 = arith.select %814, %1021, %1026 : vector<8x128xi1>, vector<8x128xf32>
    %c96_i32_591 = arith.constant 96 : i32
    %1028 = tpu.dynamic_rotate %1027 by %c96_i32_591 dim 1 : vector<8x128xf32>, i32 -> vector<8x128xf32>
    %c64_i32_592 = arith.constant 64 : i32
    %1029 = tpu.dynamic_rotate %1027 by %c64_i32_592 dim 1 : vector<8x128xf32>, i32 -> vector<8x128xf32>
    %c32_i32_593 = arith.constant 32 : i32
    %1030 = tpu.dynamic_rotate %1027 by %c32_i32_593 dim 1 : vector<8x128xf32>, i32 -> vector<8x128xf32>
    %1031 = arith.mulf %1028, %1015 : vector<8x128xf32>
    %1032 = arith.mulf %1027, %1029 : vector<8x128xf32>
    %1033 = arith.addf %1031, %1032 : vector<8x128xf32>
    %1034 = math.tanh %1033 : vector<8x128xf32>
    %1035 = arith.mulf %1030, %1034 : vector<8x128xf32>
    %cst_594 = arith.constant 0.000000e+00 : f32
    %1036 = vector.broadcast %cst_594 : f32 to vector<8x128xf32>
    %1037 = arith.select %816, %1035, %1036 : vector<8x128xi1>, vector<8x128xf32>
    %cst_595 = arith.constant 0.000000e+00 : f32
    %1038 = vector.broadcast %cst_595 : f32 to vector<8x128xf32>
    %1039 = arith.select %816, %1033, %1038 : vector<8x128xi1>, vector<8x128xf32>
    %c0_596 = arith.constant 0 : index
    %c0_597 = arith.constant 0 : index
    %1040 = vector.load %arg17[%c0_596, %c0_597] : memref<16x128xf32, #tpu.memory_space<vmem>>, vector<8x128xf32>
    tpu.vector_store %arg17[%c0_596, %c0_597], %1037 {strides = array<i32>} : memref<16x128xf32, #tpu.memory_space<vmem>>, vector<8x128xf32>,
    %c0_598 = arith.constant 0 : index
    %c0_599 = arith.constant 0 : index
    %1041 = vector.load %arg18[%c0_598, %c0_599] : memref<16x128xf32, #tpu.memory_space<vmem>>, vector<8x128xf32>
    tpu.vector_store %arg18[%c0_598, %c0_599], %1039 {strides = array<i32>} : memref<16x128xf32, #tpu.memory_space<vmem>>, vector<8x128xf32>,
    %c8_i32_600 = arith.constant 8 : i32
    %c0_601 = arith.constant 0 : index
    %c0_602 = arith.constant 0 : index
    %1042 = vector.load %arg17[%c0_601, %c0_602] : memref<16x128xf32, #tpu.memory_space<vmem>>, vector<8x128xf32>
    %c0_603 = arith.constant 0 : index
    %c0_604 = arith.constant 0 : index
    %1043 = vector.load %arg11[%c0_603, %c0_604] : memref<128x128xf32, #tpu.memory_space<vmem>>, vector<128x128xf32>
    %cst_605 = arith.constant dense<0.000000e+00> : vector<8x128xf32>
    %1044 = tpu.matmul %1042, %1043, %cst_605 {dimension_numbers = #tpu.dot_dimension_numbers<[1], [0], [0], [1], [0, 0, 1, 1], [], []>} : vector<8x128xf32>, vector<128x128xf32>, vector<8x128xf32> -> vector<8x128xf32>
    %c0_606 = arith.constant 0 : index
    %c0_607 = arith.constant 0 : index
    %1045 = vector.load %arg12[%c0_606, %c0_607] : memref<1x128xf32, #tpu.memory_space<vmem>>, vector<1x128xf32>
    %1046 = vector.broadcast %1045 : vector<1x128xf32> to vector<8x128xf32>
    %1047 = arith.addf %1044, %1046 : vector<8x128xf32>
    %c0_608 = arith.constant 0 : index
    %c0_609 = arith.constant 0 : index
    %1048 = vector.load %arg13[%c0_608, %c0_609] : memref<8x128xf32, #tpu.memory_space<vmem>>, vector<8x128xf32>
    tpu.vector_store %arg13[%c0_608, %c0_609], %1047 {strides = array<i32>} : memref<8x128xf32, #tpu.memory_space<vmem>>, vector<8x128xf32>,
    return
  }
}

</mosaic_0001>

<bundles_post_ra>
// kernel: lstm_model_forward.1
= control target key start
LH: loop header
LB: loop body
LE: loop exit
PB: predicated region body
PF: predicated region fallthrough
CT: control target
= control target key end

     0   :  { %18 = vsyncpa [#allocation9], 0  ;;  %s8080_s0 = inlined_call_operand.vmem [shape: f32[3], index: 0, kind: input, shape index: {}]   ;;  %s8081_s1 = inlined_call_operand.vmem [shape: f32[8,8,256], index: 1, kind: input, shape index: {}]   ;;  %s8082_s2 = inlined_call_operand.vmem [shape: bf16[256,256], index: 2, kind: input, shape index: {}]   ;;  %s8083_s3 = inlined_call_operand.vmem [shape: f32[128,256], index: 3, kind: input, shape index: {}]   ;;  %s8084_s4 = inlined_call_operand.vmem [shape: f32[1,256], index: 4, kind: input, shape index: {}]   ;;  %s8085_s5 = inlined_call_operand.hbm [shape: bf16[256,256], index: 5, kind: input, shape index: {}]   ;;  %s8086_s6 = inlined_call_operand.hbm [shape: f32[128,256], index: 6, kind: input, shape index: {}]   ;;  %s8087_s7 = inlined_call_operand.vmem [shape: f32[1,256], index: 7, kind: input, shape index: {}]   ;;  %s8088_s8 = inlined_call_operand.hbm [shape: bf16[256,128], index: 8, kind: input, shape index: {}]   ;;  %s8089_s9 = inlined_call_operand.hbm [shape: f32[128,128], index: 9, kind: input, shape index: {}]   ;;  %s8090_s10 = inlined_call_operand.vmem [shape: f32[1,128], index: 10, kind: input, shape index: {}]   ;;  %s8091_s11 = inlined_call_operand.hbm [shape: f32[128,128], index: 11, kind: input, shape index: {}]   ;;  %s8092_s12 = inlined_call_operand.vmem [shape: f32[1,128], index: 12, kind: input, shape index: {}]   ;;  %s8093_s13 = inlined_call_operand.vmem [shape: f32[8,128], index: 13, kind: output, shape index: {}]  }
   0x1   :  { %19 = vsyncpa [#allocation8], 0 }
   0x2   :  { %20 = vsyncpa [#allocation12], 0 }
   0x3   :  { %21 = vsyncpa [#allocation15], 0  ;;  %s6201_s25 = smov [#allocation11]   ;;  %s6071_s29 = scalar_lea.hbm %s8086_s6, 4096 }
   0x4   :  { %s57_s26 = sshll.u32 %s6201_s25, 4  ;;  %p6072_p0 = scmp.ne.s32.totalorder %s8086_s6, %s6071_s29  ;;  %s58_s26 = int_to_ptr.vmem [resolvable:$true] %s57_s26 }
   0x5   :  { %p6075_p1 = scmp.lt.u32.totalorder %s6071_s29, %s8086_s6 }
   0x7   :  { %p6077_p2 = pnand %p6075_p1, %p6072_p0 }
   0x9   :  { %6080 = shalt.err (!%p6077_p2)
}
   0xa   :  { %s6081_s17 = scalar_lea.vmem %s58_s26, 4096  ;;  %p6086_p4 = scmp.lt.s32.totalorder %s58_s26, %s58_s26 }
   0xb   :  { %p6082_p3 = scmp.ne.s32.totalorder %s58_s26, %s6081_s17  ;;  %p6087_p5 = scmp.lt.s32.totalorder %s6081_s17, %s6081_s17 }
   0xd   :  { %p6088_p6 = por %p6087_p5, %p6086_p4 }
   0xf   :  { %p6089_p7 = pnand %p6088_p6, %p6082_p3 }
  0x11   :  { %6092 = shalt.err (!%p6089_p7)
}
  0x12   :  { %s6202_s18 = smov 256   ;;  %s6203_s19 = smov 16  }
  0x13   :  { %63 = dma.hbm_to_vmem [thread:$0]  %s8086_s6, 4096, %s58_s26, [#allocation12], %s6202_s18, %s6202_s18, %s6203_s19  }
  0x14   :  { %s6204_s22 = smov [#allocation14]   ;;  %s28_s27 = sshll.u32 %s8080_s0, 4  ;;  %s29_s27 = int_to_ptr.vmem [resolvable:$true] %s28_s27 }
  0x15   :  { %s83_s23 = sshll.u32 %s6204_s22, 4  ;;  %s6093_s30 = scalar_lea.hbm %s8089_s9, 2048  ;;  %s84_s23 = int_to_ptr.vmem [resolvable:$true] %s83_s23 }
  0x16   :  { %p6094_p8 = scmp.ne.s32.totalorder %s8089_s9, %s6093_s30  ;;  %p6097_p9 = scmp.lt.u32.totalorder %s6093_s30, %s8089_s9 }
  0x18   :  { %p6099_p10 = pnand %p6097_p9, %p6094_p8 }
  0x1a   :  { %6102 = shalt.err (!%p6099_p10)
}
  0x1b   :  { %s6103_s6 = scalar_lea.vmem %s84_s23, 2048  ;;  %p6108_p12 = scmp.lt.s32.totalorder %s84_s23, %s84_s23 }
  0x1c   :  { %p6104_p11 = scmp.ne.s32.totalorder %s84_s23, %s6103_s6  ;;  %p6109_p13 = scmp.lt.s32.totalorder %s6103_s6, %s6103_s6 }
  0x1e   :  { %p6110_p0 = por %p6109_p13, %p6108_p12 }
  0x20   :  { %p6111_p1 = pnand %p6110_p0, %p6104_p11 }
  0x22   :  { %6114 = shalt.err (!%p6111_p1)
}
  0x23   :  { %s6205_s0 = smov 128   ;;  %s6206_s26 = smov 8  }
  0x24   :  { %89 = dma.hbm_to_vmem [thread:$0]  %s8089_s9, 2048, %s84_s23, [#allocation15], %s6205_s0, %s6205_s0, %s6206_s26  }
  0x25   :  { %s6115_s20 = scalar_lea.vmem %s29_s27, 16  ;;  %p6120_p3 = scmp.lt.s32.totalorder %s29_s27, %s29_s27 }
  0x26   :  { %p6116_p2 = scmp.ne.s32.totalorder %s29_s27, %s6115_s20  ;;  %p6121_p4 = scmp.lt.s32.totalorder %s6115_s20, %s6115_s20 }
  0x28   :  { %p6122_p5 = por %p6121_p4, %p6120_p3 }
  0x2a   :  { %p6123_p6 = pnand %p6122_p5, %p6116_p2 }
  0x2c   :  { %6126 = shalt.err (!%p6123_p6)
}
  0x2d   :  { %s6207_s21 = smov [#allocation7]   ;;  %s6208_s22 = smov [#allocation10]  }
  0x2e   :  { %31 = dma.vmem_to_smem %s29_s27, 16, %s6207_s21, [#allocation9]  }
  0x2f   :  { %s45_s24 = sshll.u32 %s6208_s22, 4  ;;  %s6209_s25 = smov [#allocation13]   ;;  %s46_s24 = int_to_ptr.vmem [resolvable:$true] %s45_s24 }
  0x30   :  { %s71_s28 = sshll.u32 %s6209_s25, 4  ;;  %s6127_s14 = scalar_lea.hbm %s8085_s5, 4096  ;;  %s72_s28 = int_to_ptr.vmem [resolvable:$true] %s71_s28 }
  0x31   :  { %p6128_p7 = scmp.ne.s32.totalorder %s8085_s5, %s6127_s14  ;;  %p6131_p8 = scmp.lt.u32.totalorder %s6127_s14, %s8085_s5 }
  0x33   :  { %p6133_p9 = pnand %p6131_p8, %p6128_p7 }
  0x35   :  { %6136 = shalt.err (!%p6133_p9)
}
  0x36   :  { %s6137_s27 = scalar_lea.vmem %s46_s24, 4096  ;;  %p6142_p11 = scmp.lt.s32.totalorder %s46_s24, %s46_s24 }
  0x37   :  { %p6138_p10 = scmp.ne.s32.totalorder %s46_s24, %s6137_s27  ;;  %p6143_p12 = scmp.lt.s32.totalorder %s6137_s27, %s6137_s27 }
  0x39   :  { %p6144_p13 = por %p6143_p12, %p6142_p11 }
  0x3b   :  { %p6145_p0 = pnand %p6144_p13, %p6138_p10 }
  0x3d   :  { %6148 = shalt.err (!%p6145_p0)
}
  0x3e   :  { %51 = dma.hbm_to_vmem [thread:$0]  %s8085_s5, 4096, %s46_s24, [#allocation8], %s6205_s0, %s6205_s0, %s6206_s26  }
  0x3f   :  { %s6149_s20 = scalar_lea.hbm %s8088_s8, 2048 }
  0x40   :  { %p6150_p1 = scmp.ne.s32.totalorder %s8088_s8, %s6149_s20  ;;  %p6153_p2 = scmp.lt.u32.totalorder %s6149_s20, %s8088_s8 }
  0x42   :  { %p6155_p3 = pnand %p6153_p2, %p6150_p1 }
  0x44   :  { %6158 = shalt.err (!%p6155_p3)
}
  0x45   :  { %s6159_s30 = scalar_lea.vmem %s72_s28, 2048  ;;  %p6164_p5 = scmp.lt.s32.totalorder %s72_s28, %s72_s28 }
  0x46   :  { %p6160_p4 = scmp.ne.s32.totalorder %s72_s28, %s6159_s30  ;;  %p6165_p6 = scmp.lt.s32.totalorder %s6159_s30, %s6159_s30 }
  0x48   :  { %p6166_p7 = por %p6165_p6, %p6164_p5 }
  0x4a   :  { %p6167_p8 = pnand %p6166_p7, %p6160_p4 }
  0x4c   :  { %6170 = shalt.err (!%p6167_p8)
}
  0x4d   :  { %s6210_s5 = smov 64   ;;  %s6211_s24 = smov 4  }
  0x4e   :  { %77 = dma.hbm_to_vmem [thread:$0]  %s8088_s8, 2048, %s72_s28, [#allocation12], %s6210_s5, %s6210_s5, %s6211_s24  }
  0x4f   :  { %s6212_s9 = smov [#allocation16]   ;;  %s6171_s17 = scalar_lea.hbm %s8091_s11, 2048 }
  0x50   :  { %s97_s23 = sshll.u32 %s6212_s9, 4  ;;  %p6172_p9 = scmp.ne.s32.totalorder %s8091_s11, %s6171_s17  ;;  %s98_s23 = int_to_ptr.vmem [resolvable:$true] %s97_s23 }
  0x51   :  { %p6175_p10 = scmp.lt.u32.totalorder %s6171_s17, %s8091_s11 }
  0x53   :  { %p6177_p11 = pnand %p6175_p10, %p6172_p9 }
  0x55   :  { %6180 = shalt.err (!%p6177_p11)
}
  0x56   :  { %s6181_s21 = scalar_lea.vmem %s98_s23, 2048  ;;  %p6186_p13 = scmp.lt.s32.totalorder %s98_s23, %s98_s23 }
  0x57   :  { %p6182_p12 = scmp.ne.s32.totalorder %s98_s23, %s6181_s21  ;;  %p6187_p0 = scmp.lt.s32.totalorder %s6181_s21, %s6181_s21 }
  0x59   :  { %p6188_p1 = por %p6187_p0, %p6186_p13 }
  0x5b   :  { %p6189_p2 = pnand %p6188_p1, %p6182_p12 }
  0x5d   :  { %6192 = shalt.err (!%p6189_p2)
}
  0x5e   :  { %103 = dma.hbm_to_vmem [thread:$0]  %s8091_s11, 2048, %s98_s23, [#allocation15], %s6205_s0, %s6205_s0, %s6206_s26  }
  0x5f   :  { %6193 = dma.done.wait [#allocation9], 16  }
  0x60   :  { %6194 = vsyncadd [#allocation9], 4294967280 }
  0x61   :  { %6195 = dma.done.wait [#allocation8], 4096  }
  0x62   :  { %6196 = vsyncadd [#allocation8], 4294963200 }
  0x63   :  { %6197 = dma.done.wait [#allocation12], 6144  }
  0x64   :  { %6198 = vsyncadd [#allocation12], 4294961152 }
  0x65   :  { %6199 = dma.done.wait [#allocation15], 4096  }
  0x66   :  { %6200 = vsyncadd [#allocation15], 4294963200 }
  0x67   :  { %124 = sfence }
  0x68   :  { %v5639_v0 = vld [vmem:[%s8082_s2 + $0x4] ss:$8 sps:$4 sm:$0xff]   ;;  %v5641_v1 = vld [vmem:[%s8082_s2] ss:$8 sps:$4 sm:$0xff]   ;;  %v8094_v2 = vmov 0.0   ;;  %v456_v11 = vld [vmem:[%s8083_s3 + $0x18] sm:$0xff] }
  0x69   :  { %553 = vmatprep.mubr.f32.mxu1 %v8094_v2  ;;  %354 = vmatprep.subr.bf16.mxu0 %v5639_v0  ;;  %v5642_v3 = vld [vmem:[%s8082_s2 + $0x14] ss:$8 sps:$4 sm:$0xff]   ;;  %v5644_v4 = vld [vmem:[%s8082_s2 + $0x10] ss:$8 sps:$4 sm:$0xff]   ;;  %v5645_v5 = vld [vmem:[%s8082_s2 + $0x24] ss:$8 sps:$4 sm:$0xff]  }
  0x6a   :  { %355 = vmatpush1.bf16.msra.mxu0 %v5641_v1  ;;  %v5647_v6 = vld [vmem:[%s8082_s2 + $0x20] ss:$8 sps:$4 sm:$0xff]   ;;  %v5648_v7 = vld [vmem:[%s8082_s2 + $0x34] ss:$8 sps:$4 sm:$0xff]   ;;  %v5650_v8 = vld [vmem:[%s8082_s2 + $0x30] ss:$8 sps:$4 sm:$0xff]  }
  0x6b   :  { %356 = vmatprep.subr.bf16.mxu0 %v5642_v3  ;;  %v5651_v9 = vld [vmem:[%s8082_s2 + $0x44] ss:$8 sps:$4 sm:$0xff]   ;;  %v455_v14 = vld [vmem:[%s8083_s3 + $0x10] sm:$0xff]  ;;  %v5653_v15 = vld [vmem:[%s8082_s2 + $0x40] ss:$8 sps:$4 sm:$0xff]   ;;  %s6215_s0 = smov 96  }
  0x6c   :  { %v454_v10 = vld [vmem:[%s8083_s3 + $0x8] sm:$0xff]  ;;  %v453_v12 = vld [vmem:[%s8083_s3] sm:$0xff]  ;;  %v460_v18 = vld [vmem:[%s8083_s3 + $0x38] sm:$0xff]  ;;  %s6216_s26 = smov 80   ;;  %s4297_s14 = sld [smem:[#allocation7 + $0x2]]  ;;  %vm6218_vm5 = vmmov 0  }
  0x6d   :  { %v6401_v13 = vpack.c.bf16 %v456_v11, %v454_v10  ;;  %v6409_v16 = vpack.c.bf16 %v455_v14, %v453_v12  ;;  %v458_v17 = vld [vmem:[%s8083_s3 + $0x28] sm:$0xff]  ;;  %v457_v19 = vld [vmem:[%s8083_s3 + $0x20] sm:$0xff]  ;;  %v459_v20 = vld [vmem:[%s8083_s3 + $0x30] sm:$0xff] }
  0x6e   :  { %357 = vmatpush1.bf16.msra.mxu0 %v5644_v4  ;;  %v5654_v21 = vld [vmem:[%s8082_s2 + $0x54] ss:$8 sps:$4 sm:$0xff]   ;;  %v6428_v22 = vpack.c.bf16 %v460_v18, %v458_v17  ;;  %v6430_v23 = vpack.c.bf16 %v459_v20, %v457_v19  ;;  %v462_v24 = vld [vmem:[%s8083_s3 + $0x48] sm:$0xff]  ;;  %v461_v27 = vld [vmem:[%s8083_s3 + $0x40] sm:$0xff] }
  0x6f   :  { %358 = vmatprep.subr.bf16.mxu0 %v5645_v5  ;;  %4893 = vmatprep.subr.bf16.mxu1 %v6401_v13  ;;  %v464_v25 = vld [vmem:[%s8083_s3 + $0x58] sm:$0xff]  ;;  %v463_v28 = vld [vmem:[%s8083_s3 + $0x50] sm:$0xff]  ;;  %v5657_v30 = vld [vmem:[%s8082_s2 + $0x64] ss:$8 sps:$4 sm:$0xff]  }
  0x70   :  { %4895 = vmatpush1.bf16.msra.mxu1 %v6409_v16  ;;  %v6439_v26 = vpack.c.bf16 %v464_v25, %v462_v24  ;;  %v5656_v29 = vld [vmem:[%s8082_s2 + $0x50] ss:$8 sps:$4 sm:$0xff]   ;;  %v6454_v31 = vpack.c.bf16 %v463_v28, %v461_v27  ;;  %v466_v32 = vld [vmem:[%s8083_s3 + $0x68] sm:$0xff]  ;;  %v465_v34 = vld [vmem:[%s8083_s3 + $0x60] sm:$0xff] }
  0x71   :  { %4897 = vmatprep.subr.bf16.mxu1 %v6428_v22  ;;  %v468_v33 = vld [vmem:[%s8083_s3 + $0x78] sm:$0xff]  ;;  %v467_v36 = vld [vmem:[%s8083_s3 + $0x70] sm:$0xff]  ;;  %v470_v37 = vld [vmem:[%s8083_s3 + $0x88] sm:$0xff] }
  0x72   :  { %359 = vmatpush1.bf16.msra.mxu0 %v5647_v6  ;;  %v6466_v35 = vpack.c.bf16 %v468_v33, %v466_v32  ;;  %v5659_v38 = vld [vmem:[%s8082_s2 + $0x60] ss:$8 sps:$4 sm:$0xff]   ;;  %v472_v39 = vld [vmem:[%s8083_s3 + $0x98] sm:$0xff]  ;;  %v6484_v41 = vpack.c.bf16 %v467_v36, %v465_v34  ;;  %v471_v44 = vld [vmem:[%s8083_s3 + $0x90] sm:$0xff] }
  0x73   :  { %360 = vmatprep.subr.bf16.mxu0 %v5648_v7  ;;  %v5660_v40 = vld [vmem:[%s8082_s2 + $0x74] ss:$8 sps:$4 sm:$0xff]   ;;  %v6487_v42 = vpack.c.bf16 %v472_v39, %v470_v37  ;;  %v469_v43 = vld [vmem:[%s8083_s3 + $0x80] sm:$0xff]  ;;  %v474_v45 = vld [vmem:[%s8083_s3 + $0xa8] sm:$0xff] }
  0x74   :  { %4899 = vmatpush1.bf16.msra.mxu1 %v6430_v23  ;;  %v476_v46 = vld [vmem:[%s8083_s3 + $0xb8] sm:$0xff]  ;;  %v5663_v48 = vld [vmem:[%s8082_s2 + $0x84] ss:$8 sps:$4 sm:$0xff]   ;;  %v6508_v49 = vpack.c.bf16 %v471_v44, %v469_v43  ;;  %v475_v52 = vld [vmem:[%s8083_s3 + $0xb0] sm:$0xff] }
  0x75   :  { %4901 = vmatprep.subr.bf16.mxu1 %v6439_v26  ;;  %v5662_v47 = vld [vmem:[%s8082_s2 + $0x70] ss:$8 sps:$4 sm:$0xff]   ;;  %v473_v50 = vld [vmem:[%s8083_s3 + $0xa0] sm:$0xff]  ;;  %v6514_v51 = vpack.c.bf16 %v476_v46, %v474_v45  ;;  %v478_v53 = vld [vmem:[%s8083_s3 + $0xc8] sm:$0xff] }
  0x76   :  { %361 = vmatpush1.bf16.msra.mxu0 %v5650_v8  ;;  %v480_v54 = vld [vmem:[%s8083_s3 + $0xd8] sm:$0xff]  ;;  %v5665_v55 = vld [vmem:[%s8082_s2 + $0x80] ss:$8 sps:$4 sm:$0xff]   ;;  %v6538_v59 = vpack.c.bf16 %v475_v52, %v473_v50  ;;  %v479_v63 = vld [vmem:[%s8083_s3 + $0xd0] sm:$0xff] }
  0x77   :  { %362 = vmatprep.subr.bf16.mxu0 %v5651_v9  ;;  %v127_v56 = vld [vmem:[%s8081_s1 + $0x8] sm:$0xff]  ;;  %v129_v57 = vld [vmem:[%s8081_s1 + $0x18] sm:$0xff]  ;;  %v6541_v61 = vpack.c.bf16 %v480_v54, %v478_v53  ;;  %v477_v62 = vld [vmem:[%s8083_s3 + $0xc0] sm:$0xff] }
  0x78   :  { %4903 = vmatpush1.bf16.msra.mxu1 %v6454_v31  ;;  %v5666_v58 = vld [vmem:[%s8082_s2 + $0x94] ss:$8 sps:$4 sm:$0xff]   ;;  %v143_v60 = vpack.c.bf16 %v129_v57, %v127_v56  ;;  %v482_v0 = vld [vmem:[%s8083_s3 + $0xe8] sm:$0xff]  ;;  %v5668_v3 = vld [vmem:[%s8082_s2 + $0x90] ss:$8 sps:$4 sm:$0xff]   ;;  %v6562_v5 = vpack.c.bf16 %v479_v63, %v477_v62 }
  0x79   :  { %4905 = vmatprep.subr.bf16.mxu1 %v6466_v35  ;;  %v484_v1 = vld [vmem:[%s8083_s3 + $0xf8] sm:$0xff]  ;;  %v5669_v4 = vld [vmem:[%s8082_s2 + $0xa4] ss:$8 sps:$4 sm:$0xff]   ;;  %v5671_v6 = vld [vmem:[%s8082_s2 + $0xa0] ss:$8 sps:$4 sm:$0xff]  }
  0x7a   :  { %363 = vmatpush1.bf16.msra.mxu0 %v5653_v15  ;;  %386 = vmatprep.mubr.bf16.mxu0 %v143_v60  ;;  %v6568_v7 = vpack.c.bf16 %v484_v1, %v482_v0  ;;  %v481_v8 = vld [vmem:[%s8083_s3 + $0xe0] sm:$0xff]  ;;  %v483_v9 = vld [vmem:[%s8083_s3 + $0xf0] sm:$0xff]  ;;  %v131_v28 = vld [vmem:[%s8081_s1 + $0x28] sm:$0xff]  ;;  %s2955_s3 = sld [smem:[#allocation7]] }
  0x7b   :  { %364 = vmatprep.subr.bf16.mxu0 %v5654_v21  ;;  %v5672_v10 = vld [vmem:[%s8082_s2 + $0xb4] ss:$8 sps:$4 sm:$0xff]   ;;  %v6580_v11 = vpack.c.bf16 %v483_v9, %v481_v8  ;;  %v5674_v12 = vld [vmem:[%s8082_s2 + $0xb0] ss:$8 sps:$4 sm:$0xff]   ;;  %v5675_v14 = vld [vmem:[%s8082_s2 + $0xc4] ss:$8 sps:$4 sm:$0xff]  }
  0x7c   :  { %4907 = vmatpush1.bf16.msra.mxu1 %v6484_v41  ;;  %v5677_v15 = vld [vmem:[%s8082_s2 + $0xc0] ss:$8 sps:$4 sm:$0xff]   ;;  %v5678_v17 = vld [vmem:[%s8082_s2 + $0xd4] ss:$8 sps:$4 sm:$0xff]   ;;  %v5680_v18 = vld [vmem:[%s8082_s2 + $0xd0] ss:$8 sps:$4 sm:$0xff]  }
  0x7d   :  { %4909 = vmatprep.subr.bf16.mxu1 %v6487_v42  ;;  %v5681_v19 = vld [vmem:[%s8082_s2 + $0xe4] ss:$8 sps:$4 sm:$0xff]   ;;  %v5683_v20 = vld [vmem:[%s8082_s2 + $0xe0] ss:$8 sps:$4 sm:$0xff]   ;;  %v5684_v21 = vld [vmem:[%s8082_s2 + $0xf4] ss:$8 sps:$4 sm:$0xff]  }
  0x7e   :  { %365 = vmatpush1.bf16.msra.mxu0 %v5656_v29  ;;  %v5686_v24 = vld [vmem:[%s8082_s2 + $0xf0] ss:$8 sps:$4 sm:$0xff]   ;;  %v126_v25 = vld [vmem:[%s8081_s1] sm:$0xff]  ;;  %v135_v36 = vld [vmem:[%s8081_s1 + $0x48] sm:$0xff] }
  0x7f   :  { %366 = vmatprep.subr.bf16.mxu0 %v5657_v30  ;;  %v128_v27 = vld [vmem:[%s8081_s1 + $0x10] sm:$0xff]  ;;  %v133_v29 = vld [vmem:[%s8081_s1 + $0x38] sm:$0xff]  ;;  %v130_v33 = vld [vmem:[%s8081_s1 + $0x20] sm:$0xff] }
  0x80   :  { %4911 = vmatpush1.bf16.msra.mxu1 %v6508_v49  ;;  %v142_v30 = vpack.c.bf16 %v128_v27, %v126_v25  ;;  %v145_v32 = vpack.c.bf16 %v133_v29, %v131_v28  ;;  %v132_v34 = vld [vmem:[%s8081_s1 + $0x30] sm:$0xff]  ;;  %v137_v37 = vld [vmem:[%s8081_s1 + $0x58] sm:$0xff]  ;;  %v139_v44 = vld [vmem:[%s8081_s1 + $0x68] sm:$0xff] }
  0x81   :  { %4913 = vmatprep.subr.bf16.mxu1 %v6514_v51  ;;  %v147_v39 = vpack.c.bf16 %v137_v37, %v135_v36  ;;  %v136_v43 = vld [vmem:[%s8081_s1 + $0x50] sm:$0xff]  ;;  %v141_v45 = vld [vmem:[%s8081_s1 + $0x78] sm:$0xff]  ;;  %v182_v62 = vld [vmem:[%s8084_s4] sm:$0x3]  ;;  %s6214_s4 = smov 112  }
  0x82   :  { %367 = vmatpush1.bf16.msra.mxu0 %v5659_v38  ;;  %v144_v38 = vpack.c.bf16 %v132_v34, %v130_v33  ;;  %v140_v50 = vld [vmem:[%s8081_s1 + $0x70] sm:$0xff] }
  0x83   :  { %368 = vmatprep.subr.bf16.mxu0 %v5660_v40  ;;  %v134_v40 = vld [vmem:[%s8081_s1 + $0x40] sm:$0xff] }
  0x84   :  { %4915 = vmatpush1.bf16.msra.mxu1 %v6538_v59  ;;  %v146_v46 = vpack.c.bf16 %v136_v43, %v134_v40 }
  0x85   :  { %4917 = vmatprep.subr.bf16.mxu1 %v6541_v61 }
  0x86   :  { %369 = vmatpush1.bf16.msra.mxu0 %v5662_v47  ;;  %v149_v47 = vpack.c.bf16 %v141_v45, %v139_v44 }
  0x87   :  { %370 = vmatprep.subr.bf16.mxu0 %v5663_v48  ;;  %v138_v48 = vld [vmem:[%s8081_s1 + $0x60] sm:$0xff] }
  0x88   :  { %4919 = vmatpush1.bf16.msra.mxu1 %v6562_v5  ;;  %v148_v52 = vpack.c.bf16 %v140_v50, %v138_v48 }
  0x89   :  { %4921 = vmatprep.subr.bf16.mxu1 %v6568_v7 }
  0x8a   :  { %371 = vmatpush1.bf16.msra.mxu0 %v5665_v55  ;;  %v184_v55 = vlaneseq }
  0x8b   :  { %372 = vmatprep.subr.bf16.mxu0 %v5666_v58 }
  0x8c   :  { %4923 = vmatpush1.bf16.msra.mxu1 %v6580_v11  ;;  %v6692_v58 = vshrl.u32 %v184_v55, 7  ;;  %v6725_v43 = vand.u32 127, %v184_v55 }
  0x8d   :  { %4925 = vmatprep.subr.bf16.mxu1 %v6401_v13 }
  0x8e   :  { %373 = vmatpush1.bf16.msra.mxu0 %v5668_v3  ;;  %v186_v60 = vsub.s32 0, %v6692_v58  ;;  %v190_v63 = vsub.s32 1, %v6692_v58  ;;  %vm449_vm0 = vcmp.ge.s32.totalorder %v6725_v43, 32  ;;  %vm450_vm1 = vcmp.lt.s32.totalorder %v6725_v43, 48 }
  0x8f   :  { %374 = vmatprep.subr.bf16.mxu0 %v5669_v4  ;;  %554 = vmatmul.mubr.f32.vlgmr.msra.gmra.mrb[0].mxu1 %v8094_v2  ;;  %vm6735_vm2 = vmand %vm449_vm0, %vm450_vm1  ;;  %vm452_vm3 = vcmp.lt.s32.totalorder %v6725_v43, 16  ;;  %vm3309_vm6 = vcmp.ge.s32.totalorder %v6725_v43, 64  ;;  %vm3310_vm7 = vcmp.lt.s32.totalorder %v6725_v43, 96  ;;  %vm3312_vm9 = vcmp.lt.s32.totalorder %v6725_v43, 32 }
  0x90   :  { %558 = vmatprep.mubr.f32.mxu1 %v8094_v2  ;;  %4927 = vmatpush1.bf16.msra.mxu1 %v6409_v16  ;;  %v187_v0 = vrot.slane %v182_v62, %v186_v60  ;;  %v191_v1 = vrot.slane %v182_v62, %v190_v63  ;;  %vm7139_vm4 = vmpackc.low %vm452_vm3, %vm452_vm3 }
  0x91   :  { %4929 = vmatprep.subr.bf16.mxu1 %v6428_v22  ;;  %vm7894_vm8 = vmand %vm3309_vm6, %vm3310_vm7 }
  0x92   :  { %375 = vmatpush1.bf16.msra.mxu0 %v5671_v6 }
  0x93   :  { %376 = vmatprep.subr.bf16.mxu0 %v5672_v10  ;;  %559 = vmatmul.mubr.f32.gmra.mrb[2].mxu1 %v8094_v2 }
  0x94   :  { %686 = vmatprep.mubr.f32.mxu1 %v8094_v2  ;;  %4931 = vmatpush1.bf16.msra.mxu1 %v6430_v23 }
  0x95   :  { %4933 = vmatprep.subr.bf16.mxu1 %v6439_v26 }
  0x96   :  { %377 = vmatpush1.bf16.msra.mxu0 %v5674_v12 }
  0x97   :  { %378 = vmatprep.subr.bf16.mxu0 %v5675_v14 }
  0x98   :  { %4935 = vmatpush1.bf16.msra.mxu1 %v6454_v31 }
  0x99   :  { %4937 = vmatprep.subr.bf16.mxu1 %v6466_v35 }
  0x9a   :  { %379 = vmatpush1.bf16.msra.mxu0 %v5677_v15 }
  0x9b   :  { %380 = vmatprep.subr.bf16.mxu0 %v5678_v17 }
  0x9c   :  { %4939 = vmatpush1.bf16.msra.mxu1 %v6484_v41 }
  0x9d   :  { %4941 = vmatprep.subr.bf16.mxu1 %v6487_v42 }
  0x9e   :  { %381 = vmatpush1.bf16.msra.mxu0 %v5680_v18 }
  0x9f   :  { %382 = vmatprep.subr.bf16.mxu0 %v5681_v19 }
  0xa0   :  { %4943 = vmatpush1.bf16.msra.mxu1 %v6508_v49 }
  0xa1   :  { %4945 = vmatprep.subr.bf16.mxu1 %v6514_v51 }
  0xa2   :  { %383 = vmatpush1.bf16.msra.mxu0 %v5683_v20 }
  0xa3   :  { %384 = vmatprep.subr.bf16.mxu0 %v5684_v21 }
  0xa4   :  { %4947 = vmatpush1.bf16.msra.mxu1 %v6538_v59 }
  0xa5   :  { %4949 = vmatprep.subr.bf16.mxu1 %v6541_v61 }
  0xa6   :  { %385 = vmatpush1.bf16.msra.mxu0 %v5686_v24 }
  0xa7   :  { %4957 = vmatprep.subr.bf16.mxu0 %v6401_v13 }
  0xa8   :  { %4951 = vmatpush1.bf16.msra.mxu1 %v6562_v5 }
  0xa9   :  { %387 = vmatmul.mubr.bf16.vlgmr.msra.gmra.mrb[0].mxu0 %v142_v30  ;;  %4953 = vmatprep.subr.bf16.mxu1 %v6568_v7 }
  0xaa   :  { %396 = vmatprep.mubr.bf16.mxu0 %v145_v32  ;;  %4959 = vmatpush1.bf16.msra.mxu0 %v6409_v16 }
  0xab   :  { %4961 = vmatprep.subr.bf16.mxu0 %v6428_v22 }
  0xac   :  { %4955 = vmatpush1.bf16.msra.mxu1 %v6580_v11 }
  0xad   :  { %4989 = vmatprep.subr.bf16.mxu1 %v6401_v13 }
  0xae   :  { %4963 = vmatpush1.bf16.msra.mxu0 %v6430_v23 }
  0xaf   :  { %4965 = vmatprep.subr.bf16.mxu0 %v6439_v26 }
  0xb1   :  { %397 = vmatmul.mubr.bf16.gmra.mrb[4].mxu0 %v144_v38 }
  0xb2   :  { %406 = vmatprep.mubr.bf16.mxu0 %v147_v39  ;;  %4967 = vmatpush1.bf16.msra.mxu0 %v6454_v31 }
  0xb3   :  { %4969 = vmatprep.subr.bf16.mxu0 %v6466_v35 }
  0xb6   :  { %4971 = vmatpush1.bf16.msra.mxu0 %v6484_v41 }
  0xb7   :  { %4973 = vmatprep.subr.bf16.mxu0 %v6487_v42 }
  0xb9   :  { %407 = vmatmul.mubr.bf16.gmra.mrb[8].mxu0 %v146_v46 }
  0xba   :  { %416 = vmatprep.mubr.bf16.mxu0 %v149_v47  ;;  %4975 = vmatpush1.bf16.msra.mxu0 %v6508_v49 }
  0xbb   :  { %4977 = vmatprep.subr.bf16.mxu0 %v6514_v51 }
  0xbe   :  { %4979 = vmatpush1.bf16.msra.mxu0 %v6538_v59 }
  0xbf   :  { %4981 = vmatprep.subr.bf16.mxu0 %v6541_v61 }
  0xc1   :  { %417 = vmatmul.mubr.bf16.gmra.mrb[12].mxu0 %v148_v52 }
  0xc2   :  { %4983 = vmatpush1.bf16.msra.mxu0 %v6562_v5  ;;  %821 = vmatprep.mubr.f32.mxu0 %v8094_v2 }
  0xc3   :  { %4985 = vmatprep.subr.bf16.mxu0 %v6568_v7 }
  0xc6   :  { %4987 = vmatpush1.bf16.msra.mxu0 %v6580_v11 }
  0xc7   :  { %5021 = vmatprep.subr.bf16.mxu0 %v6401_v13 }
 0x162   :  { %v555_v53 = vpop.f32.mrb[0].mxu1 }
 0x163   :  { %v557_v54 = vpop.f32.mrb[1].mxu1 }
 0x166   :  { %v560_v56 = vpop.f32.mrb[2].mxu1 }
 0x167   :  { %v561_v57 = vpop.f32.mrb[3].mxu1 }
 0x17c   :  { %v388_v3 = vpop.f32.mrb[0].mxu0 }
 0x17d   :  { %v389_v4 = vadd.f32 %v388_v3, %v187_v0  ;;  %v390_v6 = vpop.f32.mrb[1].mxu0 }
 0x17e   :  { %v6703_v8 = vadd.f32 %v390_v6, %v191_v1  ;;  %v392_v9 = vpop.f32.mrb[2].mxu0 }
 0x17f   :  { %v6705_v10 = vadd.f32 %v392_v9, %v187_v0  ;;  %v565_v12 = vadd.f32 %v555_v53, %v389_v4  ;;  %v394_v14 = vpop.f32.mrb[3].mxu0 }
 0x180   :  { %v6707_v15 = vadd.f32 %v394_v14, %v191_v1 }
 0x181   :  { %v4232_v17 = vmul.f32 -1.442695, %v565_v12 }
 0x183   :  { %5751 = vpow2.f32 %v4232_v17 }
 0x184   :  { %v398_v18 = vpop.f32.mrb[4].mxu0  ;;  %5753 = vtanh.f32 %v565_v12 }
 0x185   :  { %v6709_v19 = vadd.f32 %v398_v18, %v187_v0  ;;  %v400_v20 = vpop.f32.mrb[5].mxu0 }
 0x186   :  { %v6711_v21 = vadd.f32 %v400_v20, %v191_v1  ;;  %v402_v24 = vpop.f32.mrb[6].mxu0 }
 0x187   :  { %v6713_v25 = vadd.f32 %v402_v24, %v187_v0  ;;  %v404_v27 = vpop.f32.mrb[7].mxu0 }
 0x188   :  { %v6715_v28 = vadd.f32 %v404_v27, %v191_v1 }
 0x18c   :  { %v408_v29 = vpop.f32.mrb[8].mxu0 }
 0x18d   :  { %v5752_v30 = vpop.eup %5751  ;;  %v6717_v32 = vadd.f32 %v408_v29, %v187_v0  ;;  %v410_v33 = vpop.f32.mrb[9].mxu0 }
 0x18e   :  { %v577_v34 = vadd.f32 1.0, %v5752_v30  ;;  %v6719_v36 = vadd.f32 %v410_v33, %v191_v1  ;;  %v412_v37 = vpop.f32.mrb[10].mxu0  ;;  %v5754_v55 = vpop.eup %5753 }
 0x18f   :  { %v6721_v38 = vadd.f32 %v412_v37, %v187_v0  ;;  %v414_v39 = vpop.f32.mrb[11].mxu0 }
 0x190   :  { %5755 = vrcp.f32 %v577_v34  ;;  %v6723_v40 = vadd.f32 %v414_v39, %v191_v1 }
 0x194   :  { %v418_v44 = vpop.f32.mrb[12].mxu0 }
 0x195   :  { %v6729_v45 = vadd.f32 %v418_v44, %v187_v0  ;;  %v420_v46 = vpop.f32.mrb[13].mxu0 }
 0x196   :  { %v6731_v47 = vadd.f32 %v420_v46, %v191_v1  ;;  %v422_v48 = vpop.f32.mrb[14].mxu0 }
 0x197   :  { %v6733_v50 = vadd.f32 %v422_v48, %v187_v0  ;;  %v424_v52 = vpop.f32.mrb[15].mxu0 }
 0x198   :  { %v425_v54 = vadd.f32 %v424_v52, %v191_v1 }
 0x19a   :  { %v5756_v56 = vpop.eup %5755  ;;  %v568_v62 = vadd.f32 %v561_v57, %v425_v54 }
 0x19b   :  { %v583_v3 = vsel %vm6735_vm2, %v5754_v55, %v5756_v56 }
 0x19c   :  { %v4233_v4 = vmul.f32 -1.442695, %v568_v62  ;;  %585 = vrot.lane.b32.xlu0 %v583_v3, %s6214_s4 }
 0x19e   :  { %5757 = vpow2.f32 %v4233_v4 }
 0x19f   :  { %5759 = vtanh.f32 %v568_v62 }
 0x1a0   :  { %589 = vrot.lane.b32.xlu0 %v583_v3, %s6215_s0 }
 0x1a4   :  { %593 = vrot.lane.b32.xlu0 %v583_v3, %s6216_s26 }
 0x1a8   :  { %v5758_v0 = vpop.eup %5757 }
 0x1a9   :  { %v578_v6 = vadd.f32 1.0, %v5758_v0  ;;  %v5760_v1 = vpop.eup %5759 }
 0x1ab   :  { %5761 = vrcp.f32 %v578_v6 }
 0x1b5   :  { %v5762_v57 = vpop.eup %5761 }
 0x1b6   :  { %v584_v9 = vsel %vm6735_vm2, %v5760_v1, %v5762_v57 }
 0x1b7   :  { %587 = vrot.lane.b32.xlu1 %v584_v9, %s6214_s4 }
 0x1bb   :  { %591 = vrot.lane.b32.xlu1 %v584_v9, %s6215_s0 }
 0x1bf   :  { %595 = vrot.lane.b32.xlu1 %v584_v9, %s6216_s26 }
 0x20e   :  { %v586_v12 = vpop.permute.xlu0 %585 }
 0x20f   :  { %v597_v17 = vmul.f32 0.0, %v586_v12 }
 0x212   :  { %v590_v14 = vpop.permute.xlu0 %589 }
 0x213   :  { %v599_v18 = vmul.f32 %v590_v14, %v583_v3 }
 0x215   :  { %v6749_v20 = vadd.f32 %v599_v18, %v597_v17 }
 0x216   :  { %v594_v27 = vpop.permute.xlu0 %593 }
 0x217   :  { %5763 = vtanh.f32 %v6749_v20 }
 0x221   :  { %v5764_v24 = vpop.eup %5763 }
 0x222   :  { %v6752_v29 = vmul.f32 %v5764_v24, %v594_v27 }
 0x224   :  { %4324 = vmatmul.mubr.msk.f32.vlgmr.msra.gmra.mrb[4].mxu1 %vm452_vm3, %v6752_v29 }
 0x225   :  { %691 = vmatprep.mubr.f32.mxu1 %v8094_v2  ;;  %4991 = vmatpush1.bf16.msra.mxu1 %v6409_v16 }
 0x226   :  { %4993 = vmatprep.subr.bf16.mxu1 %v6428_v22 }
 0x229   :  { %v588_v30 = vpop.permute.xlu1 %587  ;;  %4995 = vmatpush1.bf16.msra.mxu1 %v6430_v23 }
 0x22a   :  { %4997 = vmatprep.subr.bf16.mxu1 %v6439_v26  ;;  %v598_v34 = vmul.f32 0.0, %v588_v30  ;;  %v609_v30 = vsel %vm452_vm3, %v6749_v20, 0.0 }
 0x22d   :  { %v592_v33 = vpop.permute.xlu1 %591  ;;  %4999 = vmatpush1.bf16.msra.mxu1 %v6454_v31 }
 0x22e   :  { %v600_v37 = vmul.f32 %v592_v33, %v584_v9  ;;  %5001 = vmatprep.subr.bf16.mxu1 %v6466_v35 }
 0x230   :  { %v602_v39 = vadd.f32 %v600_v37, %v598_v34 }
 0x231   :  { %5003 = vmatpush1.bf16.msra.mxu1 %v6484_v41  ;;  %v596_v46 = vpop.permute.xlu1 %595 }
 0x232   :  { %5765 = vtanh.f32 %v602_v39  ;;  %5005 = vmatprep.subr.bf16.mxu1 %v6487_v42 }
 0x235   :  { %5007 = vmatpush1.bf16.msra.mxu1 %v6508_v49 }
 0x236   :  { %5009 = vmatprep.subr.bf16.mxu1 %v6514_v51 }
 0x239   :  { %5011 = vmatpush1.bf16.msra.mxu1 %v6538_v59 }
 0x23a   :  { %5013 = vmatprep.subr.bf16.mxu1 %v6541_v61 }
 0x23c   :  { %v5766_v44 = vpop.eup %5765 }
 0x23d   :  { %v6771_v48 = vmul.f32 %v5766_v44, %v596_v46  ;;  %5015 = vmatpush1.bf16.msra.mxu1 %v6562_v5  ;;  %v610_v46 = vsel %vm452_vm3, %v602_v39, 0.0 }
 0x23e   :  { %5017 = vmatprep.subr.bf16.mxu1 %v6568_v7 }
 0x23f   :  { %4325 = vmatmul.mubr.msk.f32.gmra.mrb[6].mxu1 %vm452_vm3, %v6771_v48 }
 0x240   :  { %956 = vmatprep.mubr.f32.mxu1 %v8094_v2 }
 0x241   :  { %5019 = vmatpush1.bf16.msra.mxu1 %v6580_v11 }
 0x242   :  { %5053 = vmatprep.subr.bf16.mxu1 %v6401_v13 }
 0x2f7   :  { %v688_v52 = vpop.f32.mrb[4].mxu1 }
 0x2f8   :  { %v699_v54 = vadd.f32 %v688_v52, %v6705_v10  ;;  %v690_v55 = vpop.f32.mrb[5].mxu1 }
 0x2fa   :  { %v4234_v56 = vmul.f32 -1.442695, %v699_v54 }
 0x2fc   :  { %5767 = vpow2.f32 %v4234_v56 }
 0x2fd   :  { %5769 = vtanh.f32 %v699_v54 }
 0x306   :  { %v5768_v62 = vpop.eup %5767 }
 0x307   :  { %v711_v3 = vadd.f32 1.0, %v5768_v62  ;;  %v5770_v4 = vpop.eup %5769 }
 0x309   :  { %5771 = vrcp.f32 %v711_v3 }
 0x312   :  { %v693_v0 = vpop.f32.mrb[6].mxu1 }
 0x313   :  { %v5772_v6 = vpop.eup %5771  ;;  %v694_v1 = vpop.f32.mrb[7].mxu1 }
 0x314   :  { %v702_v57 = vadd.f32 %v694_v1, %v6731_v47  ;;  %v717_v9 = vsel %vm6735_vm2, %v5770_v4, %v5772_v6 }
 0x315   :  { %723 = vrot.lane.b32.xlu1 %v717_v9, %s6215_s0  ;;  %719 = vrot.lane.b32.xlu0 %v717_v9, %s6214_s4 }
 0x316   :  { %v4235_v10 = vmul.f32 -1.442695, %v702_v57 }
 0x318   :  { %5773 = vpow2.f32 %v4235_v10 }
 0x319   :  { %5775 = vtanh.f32 %v702_v57 }
 0x322   :  { %v5774_v12 = vpop.eup %5773 }
 0x323   :  { %v712_v14 = vadd.f32 1.0, %v5774_v12  ;;  %v5776_v17 = vpop.eup %5775 }
 0x325   :  { %5777 = vrcp.f32 %v712_v14 }
 0x32f   :  { %v5778_v18 = vpop.eup %5777 }
 0x330   :  { %v718_v24 = vsel %vm6735_vm2, %v5776_v17, %v5778_v18 }
 0x331   :  { %725 = vrot.lane.b32.xlu1 %v718_v24, %s6215_s0  ;;  %721 = vrot.lane.b32.xlu0 %v718_v24, %s6214_s4 }
 0x335   :  { %729 = vrot.lane.b32.xlu1 %v718_v24, %s6216_s26  ;;  %727 = vrot.lane.b32.xlu0 %v717_v9, %s6216_s26 }
 0x387   :  { %v724_v47 = vpop.permute.xlu1 %723  ;;  %v720_v27 = vpop.permute.xlu0 %719 }
 0x388   :  { %v733_v33 = vmul.f32 %v724_v47, %v717_v9  ;;  %v731_v34 = vmul.f32 %v720_v27, %v609_v30 }
 0x38a   :  { %v6796_v37 = vadd.f32 %v733_v33, %v731_v34 }
 0x38c   :  { %5779 = vtanh.f32 %v6796_v37 }
 0x396   :  { %v5780_v62 = vpop.eup %5779 }
 0x3a3   :  { %v726_v44 = vpop.permute.xlu1 %725  ;;  %v722_v52 = vpop.permute.xlu0 %721 }
 0x3a4   :  { %v734_v54 = vmul.f32 %v726_v44, %v718_v24  ;;  %v732_v55 = vmul.f32 %v722_v52, %v610_v46  ;;  %v743_v52 = vsel %vm452_vm3, %v6796_v37, 0.0 }
 0x3a6   :  { %v6801_v56 = vadd.f32 %v734_v54, %v732_v55 }
 0x3a7   :  { %v728_v3 = vpop.permute.xlu0 %727  ;;  %v730_v4 = vpop.permute.xlu1 %729 }
 0x3a8   :  { %5781 = vtanh.f32 %v6801_v56  ;;  %v6804_v20 = vmul.f32 %v5780_v62, %v728_v3 }
 0x3aa   :  { %4326 = vmatmul.mubr.msk.f32.vlgmr.msra.gmra.mrb[16].mxu0 %vm452_vm3, %v6804_v20 }
 0x3ab   :  { %826 = vmatprep.mubr.f32.mxu0 %v8094_v2  ;;  %5023 = vmatpush1.bf16.msra.mxu0 %v6409_v16 }
 0x3ac   :  { %5025 = vmatprep.subr.bf16.mxu0 %v6428_v22 }
 0x3af   :  { %5027 = vmatpush1.bf16.msra.mxu0 %v6430_v23 }
 0x3b0   :  { %5029 = vmatprep.subr.bf16.mxu0 %v6439_v26 }
 0x3b2   :  { %v5782_v39 = vpop.eup %5781 }
 0x3b3   :  { %v6814_v0 = vmul.f32 %v5782_v39, %v730_v4  ;;  %5031 = vmatpush1.bf16.msra.mxu0 %v6454_v31  ;;  %v744_v4 = vsel %vm452_vm3, %v6801_v56, 0.0 }
 0x3b4   :  { %5033 = vmatprep.subr.bf16.mxu0 %v6466_v35 }
 0x3b5   :  { %4327 = vmatmul.mubr.msk.f32.gmra.mrb[18].mxu0 %vm452_vm3, %v6814_v0 }
 0x3b6   :  { %1091 = vmatprep.mubr.f32.mxu0 %v8094_v2 }
 0x3b7   :  { %5035 = vmatpush1.bf16.msra.mxu0 %v6484_v41 }
 0x3b8   :  { %5037 = vmatprep.subr.bf16.mxu0 %v6487_v42 }
 0x3bb   :  { %5039 = vmatpush1.bf16.msra.mxu0 %v6508_v49 }
 0x3bc   :  { %5041 = vmatprep.subr.bf16.mxu0 %v6514_v51 }
 0x3bf   :  { %5043 = vmatpush1.bf16.msra.mxu0 %v6538_v59 }
 0x3c0   :  { %5045 = vmatprep.subr.bf16.mxu0 %v6541_v61 }
 0x3c3   :  { %5047 = vmatpush1.bf16.msra.mxu0 %v6562_v5 }
 0x3c4   :  { %5049 = vmatprep.subr.bf16.mxu0 %v6568_v7 }
 0x3c7   :  { %5051 = vmatpush1.bf16.msra.mxu0 %v6580_v11 }
 0x3c8   :  { %5085 = vmatprep.subr.bf16.mxu0 %v6401_v13 }
 0x47d   :  { %v823_v6 = vpop.f32.mrb[16].mxu0 }
 0x47e   :  { %v834_v1 = vadd.f32 %v823_v6, %v6709_v19  ;;  %v825_v57 = vpop.f32.mrb[17].mxu0 }
 0x480   :  { %v4236_v9 = vmul.f32 -1.442695, %v834_v1 }
 0x482   :  { %5783 = vpow2.f32 %v4236_v9 }
 0x483   :  { %5785 = vtanh.f32 %v834_v1 }
 0x488   :  { %v828_v10 = vpop.f32.mrb[18].mxu0 }
 0x489   :  { %v829_v12 = vpop.f32.mrb[19].mxu0 }
 0x48a   :  { %v837_v14 = vadd.f32 %v829_v12, %v6723_v40 }
 0x48c   :  { %v5784_v17 = vpop.eup %5783  ;;  %v4237_v18 = vmul.f32 -1.442695, %v837_v14 }
 0x48d   :  { %v846_v24 = vadd.f32 1.0, %v5784_v17  ;;  %v5786_v47 = vpop.eup %5785 }
 0x48e   :  { %5787 = vpow2.f32 %v4237_v18 }
 0x48f   :  { %5789 = vrcp.f32 %v846_v24 }
 0x490   :  { %5791 = vtanh.f32 %v837_v14 }
 0x498   :  { %v5788_v27 = vpop.eup %5787 }
 0x499   :  { %v5790_v30 = vpop.eup %5789  ;;  %v847_v33 = vadd.f32 1.0, %v5788_v27 }
 0x49a   :  { %v852_v19 = vsel %vm6735_vm2, %v5786_v47, %v5790_v30  ;;  %v5792_v40 = vpop.eup %5791 }
 0x49b   :  { %5793 = vrcp.f32 %v847_v33  ;;  %858 = vrot.lane.b32.xlu1 %v852_v19, %s6215_s0  ;;  %854 = vrot.lane.b32.xlu0 %v852_v19, %s6214_s4 }
 0x4a5   :  { %v5794_v34 = vpop.eup %5793 }
 0x4a6   :  { %v853_v44 = vsel %vm6735_vm2, %v5792_v40, %v5794_v34 }
 0x4a7   :  { %860 = vrot.lane.b32.xlu1 %v853_v44, %s6215_s0  ;;  %856 = vrot.lane.b32.xlu0 %v853_v44, %s6214_s4 }
 0x4ab   :  { %864 = vrot.lane.b32.xlu1 %v853_v44, %s6216_s26  ;;  %862 = vrot.lane.b32.xlu0 %v852_v19, %s6216_s26 }
 0x50d   :  { %v859_v46 = vpop.permute.xlu1 %858  ;;  %v855_v54 = vpop.permute.xlu0 %854 }
 0x50e   :  { %v868_v55 = vmul.f32 %v859_v46, %v852_v19  ;;  %v866_v62 = vmul.f32 %v855_v54, %v743_v52 }
 0x510   :  { %v6847_v3 = vadd.f32 %v868_v55, %v866_v62 }
 0x512   :  { %5795 = vtanh.f32 %v6847_v3 }
 0x519   :  { %v861_v39 = vpop.permute.xlu1 %860  ;;  %v857_v6 = vpop.permute.xlu0 %856 }
 0x51a   :  { %v869_v1 = vmul.f32 %v861_v39, %v853_v44  ;;  %v867_v57 = vmul.f32 %v857_v6, %v744_v4  ;;  %v878_v4 = vsel %vm452_vm3, %v6847_v3, 0.0 }
 0x51c   :  { %v5796_v9 = vpop.eup %5795  ;;  %v6853_v10 = vadd.f32 %v869_v1, %v867_v57 }
 0x51d   :  { %v863_v12 = vpop.permute.xlu0 %862  ;;  %v865_v14 = vpop.permute.xlu1 %864 }
 0x51e   :  { %5797 = vtanh.f32 %v6853_v10  ;;  %v6856_v37 = vmul.f32 %v5796_v9, %v863_v12 }
 0x520   :  { %4328 = vmatmul.mubr.msk.f32.vlgmr.msra.gmra.mrb[8].mxu1 %vm452_vm3, %v6856_v37 }
 0x521   :  { %961 = vmatprep.mubr.f32.mxu1 %v8094_v2  ;;  %5055 = vmatpush1.bf16.msra.mxu1 %v6409_v16 }
 0x522   :  { %5057 = vmatprep.subr.bf16.mxu1 %v6428_v22 }
 0x525   :  { %5059 = vmatpush1.bf16.msra.mxu1 %v6430_v23 }
 0x526   :  { %5061 = vmatprep.subr.bf16.mxu1 %v6439_v26 }
 0x528   :  { %v5798_v56 = vpop.eup %5797 }
 0x529   :  { %v6866_v17 = vmul.f32 %v5798_v56, %v865_v14  ;;  %5063 = vmatpush1.bf16.msra.mxu1 %v6454_v31  ;;  %v879_v56 = vsel %vm452_vm3, %v6853_v10, 0.0 }
 0x52a   :  { %5065 = vmatprep.subr.bf16.mxu1 %v6466_v35 }
 0x52b   :  { %4329 = vmatmul.mubr.msk.f32.gmra.mrb[10].mxu1 %vm452_vm3, %v6866_v17 }
 0x52c   :  { %1222 = vmatprep.mubr.f32.mxu1 %v8094_v2 }
 0x52d   :  { %5067 = vmatpush1.bf16.msra.mxu1 %v6484_v41 }
 0x52e   :  { %5069 = vmatprep.subr.bf16.mxu1 %v6487_v42 }
 0x531   :  { %5071 = vmatpush1.bf16.msra.mxu1 %v6508_v49 }
 0x532   :  { %5073 = vmatprep.subr.bf16.mxu1 %v6514_v51 }
 0x535   :  { %5075 = vmatpush1.bf16.msra.mxu1 %v6538_v59 }
 0x536   :  { %5077 = vmatprep.subr.bf16.mxu1 %v6541_v61 }
 0x539   :  { %5079 = vmatpush1.bf16.msra.mxu1 %v6562_v5 }
 0x53a   :  { %5081 = vmatprep.subr.bf16.mxu1 %v6568_v7 }
 0x53d   :  { %5083 = vmatpush1.bf16.msra.mxu1 %v6580_v11 }
 0x53e   :  { %5117 = vmatprep.subr.bf16.mxu1 %v6401_v13 }
 0x5f3   :  { %v958_v18 = vpop.f32.mrb[8].mxu1 }
 0x5f4   :  { %v969_v24 = vadd.f32 %v958_v18, %v6713_v25  ;;  %v960_v47 = vpop.f32.mrb[9].mxu1 }
 0x5f6   :  { %v4238_v27 = vmul.f32 -1.442695, %v969_v24 }
 0x5f8   :  { %5799 = vpow2.f32 %v4238_v27 }
 0x5f9   :  { %5801 = vtanh.f32 %v969_v24 }
 0x5fe   :  { %v963_v30 = vpop.f32.mrb[10].mxu1 }
 0x5ff   :  { %v964_v33 = vpop.f32.mrb[11].mxu1 }
 0x600   :  { %v972_v19 = vadd.f32 %v964_v33, %v6719_v36 }
 0x602   :  { %v5800_v40 = vpop.eup %5799  ;;  %v4239_v34 = vmul.f32 -1.442695, %v972_v19 }
 0x603   :  { %v981_v44 = vadd.f32 1.0, %v5800_v40  ;;  %v5802_v46 = vpop.eup %5801 }
 0x604   :  { %5803 = vpow2.f32 %v4239_v34 }
 0x605   :  { %5805 = vrcp.f32 %v981_v44 }
 0x606   :  { %5807 = vtanh.f32 %v972_v19 }
 0x60e   :  { %v5804_v52 = vpop.eup %5803 }
 0x60f   :  { %v5806_v54 = vpop.eup %5805  ;;  %v982_v13 = vadd.f32 1.0, %v5804_v52 }
 0x610   :  { %v987_v25 = vsel %vm6735_vm2, %v5802_v46, %v5806_v54  ;;  %v5808_v36 = vpop.eup %5807 }
 0x611   :  { %5809 = vrcp.f32 %v982_v13  ;;  %993 = vrot.lane.b32.xlu1 %v987_v25, %s6215_s0  ;;  %989 = vrot.lane.b32.xlu0 %v987_v25, %s6214_s4 }
 0x61b   :  { %v5810_v55 = vpop.eup %5809 }
 0x61c   :  { %v988_v62 = vsel %vm6735_vm2, %v5808_v36, %v5810_v55 }
 0x61d   :  { %995 = vrot.lane.b32.xlu1 %v988_v62, %s6215_s0  ;;  %991 = vrot.lane.b32.xlu0 %v988_v62, %s6214_s4 }
 0x621   :  { %999 = vrot.lane.b32.xlu1 %v988_v62, %s6216_s26  ;;  %997 = vrot.lane.b32.xlu0 %v987_v25, %s6216_s26 }
 0x683   :  { %v994_v39 = vpop.permute.xlu1 %993  ;;  %v990_v6 = vpop.permute.xlu0 %989 }
 0x684   :  { %v1003_v1 = vmul.f32 %v994_v39, %v987_v25  ;;  %v1001_v57 = vmul.f32 %v990_v6, %v878_v4 }
 0x686   :  { %v6899_v9 = vadd.f32 %v1003_v1, %v1001_v57 }
 0x688   :  { %5811 = vtanh.f32 %v6899_v9 }
 0x68f   :  { %v996_v12 = vpop.permute.xlu1 %995  ;;  %v992_v14 = vpop.permute.xlu0 %991 }
 0x690   :  { %v1004_v18 = vmul.f32 %v996_v12, %v988_v62  ;;  %v1002_v24 = vmul.f32 %v992_v14, %v879_v56  ;;  %v1013_v56 = vsel %vm452_vm3, %v6899_v9, 0.0 }
 0x692   :  { %v5812_v47 = vpop.eup %5811  ;;  %v6905_v27 = vadd.f32 %v1004_v18, %v1002_v24 }
 0x693   :  { %v998_v30 = vpop.permute.xlu0 %997  ;;  %v1000_v33 = vpop.permute.xlu1 %999 }
 0x694   :  { %5813 = vtanh.f32 %v6905_v27  ;;  %v6908_v3 = vmul.f32 %v5812_v47, %v998_v30 }
 0x696   :  { %4330 = vmatmul.mubr.msk.f32.vlgmr.msra.gmra.mrb[20].mxu0 %vm452_vm3, %v6908_v3 }
 0x697   :  { %1096 = vmatprep.mubr.f32.mxu0 %v8094_v2  ;;  %5087 = vmatpush1.bf16.msra.mxu0 %v6409_v16 }
 0x698   :  { %5089 = vmatprep.subr.bf16.mxu0 %v6428_v22 }
 0x69b   :  { %5091 = vmatpush1.bf16.msra.mxu0 %v6430_v23 }
 0x69c   :  { %5093 = vmatprep.subr.bf16.mxu0 %v6439_v26 }
 0x69e   :  { %v5814_v10 = vpop.eup %5813 }
 0x69f   :  { %v6918_v19 = vmul.f32 %v5814_v10, %v1000_v33  ;;  %5095 = vmatpush1.bf16.msra.mxu0 %v6454_v31  ;;  %v1014_v10 = vsel %vm452_vm3, %v6905_v27, 0.0 }
 0x6a0   :  { %5097 = vmatprep.subr.bf16.mxu0 %v6466_v35 }
 0x6a1   :  { %4331 = vmatmul.mubr.msk.f32.gmra.mrb[22].mxu0 %vm452_vm3, %v6918_v19 }
 0x6a2   :  { %1353 = vmatprep.mubr.f32.mxu0 %v8094_v2 }
 0x6a3   :  { %5099 = vmatpush1.bf16.msra.mxu0 %v6484_v41 }
 0x6a4   :  { %5101 = vmatprep.subr.bf16.mxu0 %v6487_v42 }
 0x6a7   :  { %5103 = vmatpush1.bf16.msra.mxu0 %v6508_v49 }
 0x6a8   :  { %5105 = vmatprep.subr.bf16.mxu0 %v6514_v51 }
 0x6ab   :  { %5107 = vmatpush1.bf16.msra.mxu0 %v6538_v59 }
 0x6ac   :  { %5109 = vmatprep.subr.bf16.mxu0 %v6541_v61 }
 0x6af   :  { %5111 = vmatpush1.bf16.msra.mxu0 %v6562_v5 }
 0x6b0   :  { %5113 = vmatprep.subr.bf16.mxu0 %v6568_v7 }
 0x6b3   :  { %5115 = vmatpush1.bf16.msra.mxu0 %v6580_v11 }
 0x769   :  { %v1093_v40 = vpop.f32.mrb[20].mxu0 }
 0x76a   :  { %v1103_v34 = vadd.f32 %v1093_v40, %v6717_v32  ;;  %v1095_v44 = vpop.f32.mrb[21].mxu0 }
 0x76c   :  { %v4240_v46 = vmul.f32 -1.442695, %v1103_v34 }
 0x76e   :  { %5815 = vpow2.f32 %v4240_v46 }
 0x76f   :  { %5817 = vtanh.f32 %v1103_v34 }
 0x774   :  { %v1098_v52 = vpop.f32.mrb[22].mxu0 }
 0x775   :  { %v1099_v54 = vpop.f32.mrb[23].mxu0 }
 0x776   :  { %v1105_v13 = vadd.f32 %v1099_v54, %v6715_v28 }
 0x778   :  { %v5816_v25 = vpop.eup %5815  ;;  %v4241_v36 = vmul.f32 -1.442695, %v1105_v13 }
 0x779   :  { %v1114_v55 = vadd.f32 1.0, %v5816_v25  ;;  %v5818_v62 = vpop.eup %5817 }
 0x77a   :  { %5819 = vpow2.f32 %v4241_v36 }
 0x77b   :  { %5821 = vrcp.f32 %v1114_v55 }
 0x77c   :  { %5823 = vtanh.f32 %v1105_v13 }
 0x784   :  { %v5820_v39 = vpop.eup %5819 }
 0x785   :  { %v5822_v4 = vpop.eup %5821  ;;  %v1115_v6 = vadd.f32 1.0, %v5820_v39 }
 0x786   :  { %v1120_v32 = vsel %vm6735_vm2, %v5818_v62, %v5822_v4  ;;  %v5824_v28 = vpop.eup %5823 }
 0x787   :  { %5825 = vrcp.f32 %v1115_v6  ;;  %1126 = vrot.lane.b32.xlu1 %v1120_v32, %s6215_s0  ;;  %1122 = vrot.lane.b32.xlu0 %v1120_v32, %s6214_s4 }
 0x791   :  { %v5826_v1 = vpop.eup %5825 }
 0x792   :  { %v1121_v57 = vsel %vm6735_vm2, %v5824_v28, %v5826_v1 }
 0x793   :  { %1128 = vrot.lane.b32.xlu1 %v1121_v57, %s6215_s0  ;;  %1124 = vrot.lane.b32.xlu0 %v1121_v57, %s6214_s4 }
 0x797   :  { %1132 = vrot.lane.b32.xlu1 %v1121_v57, %s6216_s26  ;;  %1130 = vrot.lane.b32.xlu0 %v1120_v32, %s6216_s26 }
 0x7f9   :  { %v1127_v12 = vpop.permute.xlu1 %1126  ;;  %v1123_v14 = vpop.permute.xlu0 %1122 }
 0x7fa   :  { %v1136_v18 = vmul.f32 %v1127_v12, %v1120_v32  ;;  %v1134_v24 = vmul.f32 %v1123_v14, %v1013_v56 }
 0x7fc   :  { %v6950_v47 = vadd.f32 %v1136_v18, %v1134_v24 }
 0x7fe   :  { %5827 = vtanh.f32 %v6950_v47  ;;  %v1146_v55 = vsel %vm452_vm3, %v6950_v47, 0.0 }
 0x805   :  { %v1129_v30 = vpop.permute.xlu1 %1128  ;;  %v1125_v33 = vpop.permute.xlu0 %1124 }
 0x806   :  { %v1137_v40 = vmul.f32 %v1129_v30, %v1121_v57  ;;  %v1135_v34 = vmul.f32 %v1125_v33, %v1014_v10 }
 0x808   :  { %v5828_v44 = vpop.eup %5827  ;;  %v6956_v46 = vadd.f32 %v1137_v40, %v1135_v34 }
 0x809   :  { %v1131_v52 = vpop.permute.xlu0 %1130  ;;  %v1133_v54 = vpop.permute.xlu1 %1132 }
 0x80a   :  { %5829 = vtanh.f32 %v6956_v46  ;;  %v6959_v9 = vmul.f32 %v5828_v44, %v1131_v52  ;;  %v1147_v28 = vsel %vm452_vm3, %v6956_v46, 0.0 }
 0x80c   :  { %4332 = vmatmul.mubr.msk.f32.vlgmr.msra.gmra.mrb[12].mxu1 %vm452_vm3, %v6959_v9 }
 0x80d   :  { %1227 = vmatprep.mubr.f32.mxu1 %v8094_v2  ;;  %5119 = vmatpush1.bf16.msra.mxu1 %v6409_v16 }
 0x80e   :  { %5121 = vmatprep.subr.bf16.mxu1 %v6428_v22 }
 0x811   :  { %5123 = vmatpush1.bf16.msra.mxu1 %v6430_v23 }
 0x812   :  { %5125 = vmatprep.subr.bf16.mxu1 %v6439_v26 }
 0x814   :  { %v5830_v27 = vpop.eup %5829 }
 0x815   :  { %v6969_v13 = vmul.f32 %v5830_v27, %v1133_v54  ;;  %5127 = vmatpush1.bf16.msra.mxu1 %v6454_v31 }
 0x816   :  { %5129 = vmatprep.subr.bf16.mxu1 %v6466_v35 }
 0x817   :  { %4333 = vmatmul.mubr.msk.f32.gmra.mrb[14].mxu1 %vm452_vm3, %v6969_v13 }
 0x818   :  { %1484 = vmatprep.mubr.f32.mxu1 %v8094_v2 }
 0x819   :  { %5131 = vmatpush1.bf16.msra.mxu1 %v6484_v41 }
 0x81a   :  { %5133 = vmatprep.subr.bf16.mxu1 %v6487_v42 }
 0x81d   :  { %5135 = vmatpush1.bf16.msra.mxu1 %v6508_v49 }
 0x81e   :  { %5137 = vmatprep.subr.bf16.mxu1 %v6514_v51 }
 0x821   :  { %5139 = vmatpush1.bf16.msra.mxu1 %v6538_v59 }
 0x822   :  { %5141 = vmatprep.subr.bf16.mxu1 %v6541_v61 }
 0x825   :  { %5143 = vmatpush1.bf16.msra.mxu1 %v6562_v5 }
 0x826   :  { %5145 = vmatprep.subr.bf16.mxu1 %v6568_v7 }
 0x829   :  { %5147 = vmatpush1.bf16.msra.mxu1 %v6580_v11 }
 0x8df   :  { %v1224_v16 = vpop.f32.mrb[12].mxu1 }
 0x8e0   :  { %v1234_v22 = vadd.f32 %v1224_v16, %v6721_v38  ;;  %v1226_v23 = vpop.f32.mrb[13].mxu1 }
 0x8e2   :  { %v4242_v26 = vmul.f32 -1.442695, %v1234_v22 }
 0x8e4   :  { %5831 = vpow2.f32 %v4242_v26 }
 0x8e5   :  { %5833 = vtanh.f32 %v1234_v22 }
 0x8ea   :  { %v1229_v31 = vpop.f32.mrb[14].mxu1 }
 0x8eb   :  { %v1230_v35 = vpop.f32.mrb[15].mxu1 }
 0x8ec   :  { %v1236_v41 = vadd.f32 %v1230_v35, %v6711_v21 }
 0x8ee   :  { %v5832_v42 = vpop.eup %5831  ;;  %v4243_v49 = vmul.f32 -1.442695, %v1236_v41 }
 0x8ef   :  { %v1245_v51 = vadd.f32 1.0, %v5832_v42  ;;  %v5834_v59 = vpop.eup %5833 }
 0x8f0   :  { %5835 = vpow2.f32 %v4243_v49 }
 0x8f1   :  { %5837 = vrcp.f32 %v1245_v51 }
 0x8f2   :  { %5839 = vtanh.f32 %v1236_v41 }
 0x8fa   :  { %v5836_v61 = vpop.eup %5835 }
 0x8fb   :  { %v5838_v5 = vpop.eup %5837  ;;  %v1246_v7 = vadd.f32 1.0, %v5836_v61 }
 0x8fc   :  { %v1251_v11 = vsel %vm6735_vm2, %v5834_v59, %v5838_v5  ;;  %v5840_v21 = vpop.eup %5839 }
 0x8fd   :  { %5841 = vrcp.f32 %v1246_v7  ;;  %1257 = vrot.lane.b32.xlu1 %v1251_v11, %s6215_s0  ;;  %1253 = vrot.lane.b32.xlu0 %v1251_v11, %s6214_s4 }
 0x907   :  { %v5842_v38 = vpop.eup %5841 }
 0x908   :  { %v1252_v25 = vsel %vm6735_vm2, %v5840_v21, %v5842_v38 }
 0x909   :  { %1259 = vrot.lane.b32.xlu1 %v1252_v25, %s6215_s0  ;;  %1255 = vrot.lane.b32.xlu0 %v1252_v25, %s6214_s4 }
 0x90d   :  { %1263 = vrot.lane.b32.xlu1 %v1252_v25, %s6216_s26  ;;  %1261 = vrot.lane.b32.xlu0 %v1251_v11, %s6216_s26 }
 0x96f   :  { %v1258_v36 = vpop.permute.xlu1 %1257  ;;  %v1254_v62 = vpop.permute.xlu0 %1253 }
 0x970   :  { %v1267_v39 = vmul.f32 %v1258_v36, %v1251_v11  ;;  %v1265_v4 = vmul.f32 %v1254_v62, %v1146_v55 }
 0x972   :  { %v1269_v6 = vadd.f32 %v1267_v39, %v1265_v4 }
 0x974   :  { %5843 = vtanh.f32 %v1269_v6  ;;  %v1277_v51 = vsel %vm452_vm3, %v1269_v6, 0.0 }
 0x97b   :  { %v1260_v32 = vpop.permute.xlu1 %1259  ;;  %v1256_v1 = vpop.permute.xlu0 %1255 }
 0x97c   :  { %v1268_v57 = vmul.f32 %v1260_v32, %v1252_v25  ;;  %v1266_v12 = vmul.f32 %v1256_v1, %v1147_v28  ;;  %v5687_v1 = vld [vmem:[#allocation10] ss:$8 sps:$4 sm:$0xff]  }
 0x97e   :  { %v5844_v56 = vpop.eup %5843  ;;  %v1270_v14 = vadd.f32 %v1268_v57, %v1266_v12  ;;  %v5689_v57 = vld [vmem:[#allocation10 + $0x4] ss:$8 sps:$4 sm:$0xff]   ;;  %v5692_v12 = vld [vmem:[#allocation10 + $0x14] ss:$8 sps:$4 sm:$0xff]  }
 0x97f   :  { %v1262_v18 = vpop.permute.xlu0 %1261  ;;  %v1264_v30 = vpop.permute.xlu1 %1263  ;;  %1775 = vmatprep.subr.bf16.mxu0 %v5689_v57 }
 0x980   :  { %5845 = vtanh.f32 %v1270_v14  ;;  %v7004_v24 = vmul.f32 %v5844_v56, %v1262_v18  ;;  %v1278_v21 = vsel %vm452_vm3, %v1270_v14, 0.0  ;;  %v5690_v56 = vld [vmem:[#allocation10 + $0x10] ss:$8 sps:$4 sm:$0xff]   ;;  %v5695_v14 = vld [vmem:[#allocation10 + $0x24] ss:$8 sps:$4 sm:$0xff]  }
 0x981   :  { %v1869_v18 = vld [vmem:[#allocation11 + $0x8] sm:$0xff] }
 0x982   :  { %4334 = vmatmul.mubr.msk.f32.vlgmr.msra.gmra.mrb[24].mxu0 %vm452_vm3, %v7004_v24 }
 0x983   :  { %1358 = vmatprep.mubr.f32.mxu0 %v8094_v2  ;;  %1776 = vmatpush1.bf16.msra.mxu0 %v5687_v1 }
 0x984   :  { %1777 = vmatprep.subr.bf16.mxu0 %v5692_v12 }
 0x987   :  { %1778 = vmatpush1.bf16.msra.mxu0 %v5690_v56 }
 0x988   :  { %1779 = vmatprep.subr.bf16.mxu0 %v5695_v14 }
 0x98a   :  { %v5846_v47 = vpop.eup %5845 }
 0x98b   :  { %v7010_v10 = vmul.f32 %v5846_v47, %v1264_v30  ;;  %v1871_v47 = vld [vmem:[#allocation11 + $0x18] sm:$0xff]  ;;  %v1868_v30 = vld [vmem:[#allocation11] sm:$0xff] }
 0x98d   :  { %4335 = vmatmul.mubr.msk.f32.gmra.mrb[26].mxu0 %vm452_vm3, %v7010_v10 }
 0xa55   :  { %v1355_v33 = vpop.f32.mrb[24].mxu0 }
 0xa56   :  { %v1365_v40 = vadd.f32 %v1355_v33, %v6729_v45  ;;  %v1357_v34 = vpop.f32.mrb[25].mxu0  ;;  %v5693_v33 = vld [vmem:[#allocation10 + $0x20] ss:$8 sps:$4 sm:$0xff]  }
 0xa57   :  { %v7049_v34 = vpack.c.bf16 %v1871_v47, %v1869_v18  ;;  %1780 = vmatpush1.bf16.msra.mxu0 %v5693_v33 }
 0xa58   :  { %v4244_v44 = vmul.f32 -1.442695, %v1365_v40 }
 0xa59   :  { %5149 = vmatprep.subr.bf16.mxu1 %v7049_v34 }
 0xa5a   :  { %5847 = vpow2.f32 %v4244_v44  ;;  %v1870_v44 = vld [vmem:[#allocation11 + $0x10] sm:$0xff] }
 0xa5b   :  { %5849 = vtanh.f32 %v1365_v40  ;;  %v5698_v40 = vld [vmem:[#allocation10 + $0x34] ss:$8 sps:$4 sm:$0xff]  }
 0xa5c   :  { %1781 = vmatprep.subr.bf16.mxu0 %v5698_v40 }
 0xa60   :  { %v1360_v46 = vpop.f32.mrb[26].mxu0 }
 0xa61   :  { %v1361_v52 = vpop.f32.mrb[27].mxu0  ;;  %v7051_v46 = vpack.c.bf16 %v1870_v44, %v1868_v30  ;;  %v5722_v44 = vld [vmem:[#allocation10 + $0xb4] ss:$8 sps:$4 sm:$0xff]  }
 0xa62   :  { %v1367_v27 = vadd.f32 %v1361_v52, %v6707_v15  ;;  %v1873_v52 = vld [vmem:[#allocation11 + $0x28] sm:$0xff] }
 0xa64   :  { %v5848_v54 = vpop.eup %5847  ;;  %v4245_v16 = vmul.f32 -1.442695, %v1367_v27 }
 0xa65   :  { %v1376_v22 = vadd.f32 1.0, %v5848_v54  ;;  %v5850_v23 = vpop.eup %5849  ;;  %v1872_v54 = vld [vmem:[#allocation11 + $0x20] sm:$0xff] }
 0xa66   :  { %5851 = vpow2.f32 %v4245_v16 }
 0xa67   :  { %5853 = vrcp.f32 %v1376_v22  ;;  %v1874_v22 = vld [vmem:[#allocation11 + $0x30] sm:$0xff] }
 0xa68   :  { %5855 = vtanh.f32 %v1367_v27  ;;  %v1875_v27 = vld [vmem:[#allocation11 + $0x38] sm:$0xff] }
 0xa69   :  { %v7054_v16 = vpack.c.bf16 %v1875_v27, %v1873_v52 }
 0xa70   :  { %v5852_v26 = vpop.eup %5851 }
 0xa71   :  { %v5854_v31 = vpop.eup %5853  ;;  %v1377_v35 = vadd.f32 1.0, %v5852_v26  ;;  %v1877_v26 = vld [vmem:[#allocation11 + $0x48] sm:$0xff] }
 0xa72   :  { %v1382_v45 = vsel %vm6735_vm2, %v5850_v23, %v5854_v31  ;;  %v5856_v15 = vpop.eup %5855  ;;  %v7057_v23 = vpack.c.bf16 %v1874_v22, %v1872_v54  ;;  %v1879_v31 = vld [vmem:[#allocation11 + $0x58] sm:$0xff]  ;;  %v1881_v22 = vld [vmem:[#allocation11 + $0x68] sm:$0xff] }
 0xa73   :  { %5857 = vrcp.f32 %v1377_v35  ;;  %1388 = vrot.lane.b32.xlu1 %v1382_v45, %s6215_s0  ;;  %1384 = vrot.lane.b32.xlu0 %v1382_v45, %s6214_s4  ;;  %v5696_v35 = vld [vmem:[#allocation10 + $0x30] ss:$8 sps:$4 sm:$0xff]  }
 0xa74   :  { %1782 = vmatpush1.bf16.msra.mxu0 %v5696_v35  ;;  %v5720_v54 = vld [vmem:[#allocation10 + $0xb0] ss:$8 sps:$4 sm:$0xff]  }
 0xa75   :  { %v1882_v35 = vld [vmem:[#allocation11 + $0x70] sm:$0xff] }
 0xa7d   :  { %v5858_v41 = vpop.eup %5857 }
 0xa7e   :  { %v1383_v42 = vsel %vm6735_vm2, %v5856_v15, %v5858_v41  ;;  %v1876_v15 = vld [vmem:[#allocation11 + $0x40] sm:$0xff]  ;;  %v1878_v41 = vld [vmem:[#allocation11 + $0x50] sm:$0xff] }
 0xa7f   :  { %1390 = vrot.lane.b32.xlu1 %v1383_v42, %s6215_s0  ;;  %1386 = vrot.lane.b32.xlu0 %v1383_v42, %s6214_s4 }
 0xa83   :  { %1394 = vrot.lane.b32.xlu1 %v1383_v42, %s6216_s26  ;;  %1392 = vrot.lane.b32.xlu0 %v1382_v45, %s6216_s26 }
 0xae5   :  { %v1389_v49 = vpop.permute.xlu1 %1388  ;;  %v1385_v59 = vpop.permute.xlu0 %1384 }
 0xae6   :  { %v1398_v61 = vmul.f32 %v1389_v49, %v1382_v45  ;;  %v1396_v5 = vmul.f32 %v1385_v59, %v1277_v51  ;;  %v7060_v45 = vpack.c.bf16 %v1879_v31, %v1877_v26  ;;  %v7063_v49 = vpack.c.bf16 %v1878_v41, %v1876_v15  ;;  %v5699_v51 = vld [vmem:[#allocation10 + $0x40] ss:$8 sps:$4 sm:$0xff]   ;;  %v5704_v59 = vld [vmem:[#allocation10 + $0x54] ss:$8 sps:$4 sm:$0xff]   ;;  %v5725_v15 = vld [vmem:[#allocation10 + $0xc4] ss:$8 sps:$4 sm:$0xff]  }
 0xae7   :  { %v1883_v26 = vld [vmem:[#allocation11 + $0x78] sm:$0xff]  ;;  %v1880_v31 = vld [vmem:[#allocation11 + $0x60] sm:$0xff] }
 0xae8   :  { %v7029_v7 = vadd.f32 %v1398_v61, %v1396_v5  ;;  %v5702_v61 = vld [vmem:[#allocation10 + $0x50] ss:$8 sps:$4 sm:$0xff]   ;;  %v5707_v5 = vld [vmem:[#allocation10 + $0x64] ss:$8 sps:$4 sm:$0xff]   ;;  %v5723_v41 = vld [vmem:[#allocation10 + $0xc0] ss:$8 sps:$4 sm:$0xff]  }
 0xaea   :  { %5859 = vtanh.f32 %v7029_v7 }
 0xaf1   :  { %v1391_v11 = vpop.permute.xlu1 %1390  ;;  %v1387_v38 = vpop.permute.xlu0 %1386 }
 0xaf2   :  { %v1399_v25 = vmul.f32 %v1391_v11, %v1383_v42  ;;  %v1397_v36 = vmul.f32 %v1387_v38, %v1278_v21  ;;  %v5701_v42 = vld [vmem:[#allocation10 + $0x44] ss:$8 sps:$4 sm:$0xff]   ;;  %v5705_v11 = vld [vmem:[#allocation10 + $0x60] ss:$8 sps:$4 sm:$0xff]   ;;  %v5710_v21 = vld [vmem:[#allocation10 + $0x74] ss:$8 sps:$4 sm:$0xff]  }
 0xaf3   :  { %1783 = vmatprep.subr.bf16.mxu0 %v5701_v42  ;;  %v5708_v38 = vld [vmem:[#allocation10 + $0x70] ss:$8 sps:$4 sm:$0xff]   ;;  %v1885_v42 = vld [vmem:[#allocation11 + $0x88] sm:$0xff] }
 0xaf4   :  { %v5860_v55 = vpop.eup %5859  ;;  %v7034_v62 = vadd.f32 %v1399_v25, %v1397_v36  ;;  %1784 = vmatpush1.bf16.msra.mxu0 %v5699_v51  ;;  %v5713_v25 = vld [vmem:[#allocation10 + $0x84] ss:$8 sps:$4 sm:$0xff]   ;;  %v5711_v36 = vld [vmem:[#allocation10 + $0x80] ss:$8 sps:$4 sm:$0xff]   ;;  %v1887_v51 = vld [vmem:[#allocation11 + $0x98] sm:$0xff] }
 0xaf5   :  { %v1393_v39 = vpop.permute.xlu0 %1392  ;;  %v1395_v32 = vpop.permute.xlu1 %1394  ;;  %1785 = vmatprep.subr.bf16.mxu0 %v5704_v59  ;;  %v7075_v59 = vpack.c.bf16 %v1887_v51, %v1885_v42  ;;  %v1898_v42 = vld [vmem:[#allocation11 + $0xf0] sm:$0xff] }
 0xaf6   :  { %5861 = vtanh.f32 %v7034_v62  ;;  %v7037_v4 = vmul.f32 %v5860_v55, %v1393_v39  ;;  %v5716_v55 = vld [vmem:[#allocation10 + $0x94] ss:$8 sps:$4 sm:$0xff]   ;;  %v5714_v39 = vld [vmem:[#allocation10 + $0x90] ss:$8 sps:$4 sm:$0xff]  }
 0xaf8   :  { %8101 = vst [vmem:[#allocation21_spill] sm:$0xff] %v7037_v4  ;;  %4336 = vmatmul.mubr.msk.f32.vlgmr.msra.gmra.mrb[16].mxu1 %vm452_vm3, %v7037_v4  ;;  %1786 = vmatpush1.bf16.msra.mxu0 %v5702_v61  ;;  %v1884_v61 = vld [vmem:[#allocation11 + $0x80] sm:$0xff] }
 0xaf9   :  { %1489 = vmatprep.mubr.f32.mxu1 %v8094_v2  ;;  %5151 = vmatpush1.bf16.msra.mxu1 %v7051_v46 }
 0xafa   :  { %5153 = vmatprep.subr.bf16.mxu1 %v7054_v16  ;;  %1787 = vmatprep.subr.bf16.mxu0 %v5707_v5  ;;  %v1886_v5 = vld [vmem:[#allocation11 + $0x90] sm:$0xff] }
 0xafc   :  { %1788 = vmatpush1.bf16.msra.mxu0 %v5705_v11  ;;  %v7077_v11 = vpack.c.bf16 %v1886_v5, %v1884_v61  ;;  %v1409_v5 = vsel %vm452_vm3, %v7034_v62, 0.0 }
 0xafd   :  { %5155 = vmatpush1.bf16.msra.mxu1 %v7057_v23  ;;  %1789 = vmatprep.subr.bf16.mxu0 %v5710_v21  ;;  %v5728_v21 = vld [vmem:[#allocation10 + $0xd4] ss:$8 sps:$4 sm:$0xff]  }
 0xafe   :  { %5157 = vmatprep.subr.bf16.mxu1 %v7060_v45 }
 0xb00   :  { %v5862_v6 = vpop.eup %5861  ;;  %1790 = vmatpush1.bf16.msra.mxu0 %v5708_v38  ;;  %v5726_v38 = vld [vmem:[#allocation10 + $0xd0] ss:$8 sps:$4 sm:$0xff]  }
 0xb01   :  { %v7043_v28 = vmul.f32 %v5862_v6, %v1395_v32  ;;  %5159 = vmatpush1.bf16.msra.mxu1 %v7063_v49  ;;  %1791 = vmatprep.subr.bf16.mxu0 %v5713_v25  ;;  %v5719_v6 = vld [vmem:[#allocation10 + $0xa4] ss:$8 sps:$4 sm:$0xff]   ;;  %v5717_v32 = vld [vmem:[#allocation10 + $0xa0] ss:$8 sps:$4 sm:$0xff]  }
 0xb02   :  { %v1889_v25 = vld [vmem:[#allocation11 + $0xa8] sm:$0xff] }
 0xb03   :  { %4337 = vmatmul.mubr.msk.f32.gmra.mrb[18].mxu1 %vm452_vm3, %v7043_v28 }
 0xb04   :  { %1968 = vmatprep.mubr.f32.mxu1 %v8094_v2  ;;  %1792 = vmatpush1.bf16.msra.mxu0 %v5711_v36  ;;  %v1891_v36 = vld [vmem:[#allocation11 + $0xb8] sm:$0xff] }
 0xb05   :  { %1793 = vmatprep.subr.bf16.mxu0 %v5716_v55  ;;  %v7081_v55 = vpack.c.bf16 %v1891_v36, %v1889_v25 }
 0xb08   :  { %1794 = vmatpush1.bf16.msra.mxu0 %v5714_v39  ;;  %v1888_v39 = vld [vmem:[#allocation11 + $0xa0] sm:$0xff] }
 0xb09   :  { %1795 = vmatprep.subr.bf16.mxu0 %v5719_v6  ;;  %v1890_v6 = vld [vmem:[#allocation11 + $0xb0] sm:$0xff] }
 0xb0c   :  { %1796 = vmatpush1.bf16.msra.mxu0 %v5717_v32  ;;  %v7083_v32 = vpack.c.bf16 %v1890_v6, %v1888_v39 }
 0xb0d   :  { %1797 = vmatprep.subr.bf16.mxu0 %v5722_v44 }
 0xb10   :  { %1798 = vmatpush1.bf16.msra.mxu0 %v5720_v54 }
 0xb11   :  { %1799 = vmatprep.subr.bf16.mxu0 %v5725_v15 }
 0xb14   :  { %1800 = vmatpush1.bf16.msra.mxu0 %v5723_v41  ;;  %v1896_v41 = vld [vmem:[#allocation11 + $0xe0] sm:$0xff] }
 0xb15   :  { %1801 = vmatprep.subr.bf16.mxu0 %v5728_v21  ;;  %v7103_v51 = vpack.c.bf16 %v1898_v42, %v1896_v41 }
 0xb18   :  { %1802 = vmatpush1.bf16.msra.mxu0 %v5726_v38 }
 0xbcb   :  { %v1486_v1 = vpop.f32.mrb[16].mxu1 }
 0xbcc   :  { %v1496_v57 = vadd.f32 %v1486_v1, %v6733_v50  ;;  %v1488_v12 = vpop.f32.mrb[17].mxu1  ;;  %v7069_v50 = vpack.c.bf16 %v1883_v26, %v1881_v22  ;;  %v5732_v22 = vld [vmem:[#allocation10 + $0xf0] ss:$8 sps:$4 sm:$0xff]   ;;  %v1897_v26 = vld [vmem:[#allocation11 + $0xe8] sm:$0xff] }
 0xbce   :  { %v4246_v56 = vmul.f32 -1.442695, %v1496_v57  ;;  %5161 = vmatprep.subr.bf16.mxu1 %v7069_v50 }
 0xbd0   :  { %5863 = vpow2.f32 %v4246_v56  ;;  %v5729_v56 = vld [vmem:[#allocation10 + $0xe0] ss:$8 sps:$4 sm:$0xff]  }
 0xbd6   :  { %v1491_v14 = vpop.f32.mrb[18].mxu1 }
 0xbd7   :  { %v1492_v18 = vpop.f32.mrb[19].mxu1  ;;  %v1893_v14 = vld [vmem:[#allocation11 + $0xc8] sm:$0xff] }
 0xbd8   :  { %v1498_v47 = vadd.f32 %v1492_v18, %v6703_v8  ;;  %v7071_v8 = vpack.c.bf16 %v1882_v35, %v1880_v31  ;;  %v1895_v18 = vld [vmem:[#allocation11 + $0xd8] sm:$0xff] }
 0xbd9   :  { %v1899_v31 = vld [vmem:[#allocation11 + $0xf8] sm:$0xff] }
 0xbda   :  { %v4247_v30 = vmul.f32 -1.442695, %v1498_v47  ;;  %v5864_v33 = vpop.eup %5863  ;;  %5163 = vmatpush1.bf16.msra.mxu1 %v7071_v8  ;;  %v7099_v15 = vpack.c.bf16 %v1899_v31, %v1897_v26  ;;  %v4357_v26 = vpack.c.bf16 %v6771_v48, %v6814_v0 }
 0xbdb   :  { %v1507_v52 = vadd.f32 1.0, %v5864_v33  ;;  %5165 = vmatprep.subr.bf16.mxu1 %v7075_v59  ;;  %v1892_v33 = vld [vmem:[#allocation11 + $0xc0] sm:$0xff] }
 0xbdc   :  { %5865 = vpow2.f32 %v4247_v30  ;;  %v7089_v30 = vpack.c.bf16 %v1895_v18, %v1893_v14  ;;  %v4342_v18 = vpack.c.bf16 %v6804_v20, %v6752_v29 }
 0xbdd   :  { %5867 = vtanh.f32 %v1498_v47 }
 0xbde   :  { %5167 = vmatpush1.bf16.msra.mxu1 %v7077_v11 }
 0xbdf   :  { %5169 = vmatprep.subr.bf16.mxu1 %v7081_v55 }
 0xbe2   :  { %5171 = vmatpush1.bf16.msra.mxu1 %v7083_v32 }
 0xbe3   :  { %5173 = vmatprep.subr.bf16.mxu1 %v7089_v30 }
 0xbe6   :  { %v5866_v40 = vpop.eup %5865 }
 0xbe7   :  { %v1508_v27 = vadd.f32 1.0, %v5866_v40  ;;  %v5868_v1 = vpop.eup %5867  ;;  %v1894_v40 = vld [vmem:[#allocation11 + $0xd0] sm:$0xff] }
 0xbe9   :  { %5869 = vrcp.f32 %v1508_v27  ;;  %v5734_v27 = vld [vmem:[#allocation10 + $0xf4] ss:$8 sps:$4 sm:$0xff]  }
 0xbea   :  { %5871 = vrcp.f32 %v1507_v52  ;;  %v7093_v52 = vpack.c.bf16 %v1894_v40, %v1892_v33  ;;  %v4345_v33 = vpack.c.bf16 %v6969_v13, %v7010_v10 }
 0xbeb   :  { %5873 = vtanh.f32 %v1496_v57  ;;  %v5731_v57 = vld [vmem:[#allocation10 + $0xe4] ss:$8 sps:$4 sm:$0xff]  }
 0xbec   :  { %1803 = vmatprep.subr.bf16.mxu0 %v5731_v57  ;;  %5175 = vmatpush1.bf16.msra.mxu1 %v7093_v52 }
 0xbed   :  { %1804 = vmatpush1.bf16.msra.mxu0 %v5729_v56  ;;  %5177 = vmatprep.subr.bf16.mxu1 %v7099_v15 }
 0xbee   :  { %1805 = vmatprep.subr.bf16.mxu0 %v5734_v27  ;;  %v4351_v27 = vpack.c.bf16 %v6866_v17, %v6918_v19 }
 0xbf0   :  { %5179 = vmatpush1.bf16.msra.mxu1 %v7103_v51 }
 0xbf1   :  { %1806 = vmatpush1.bf16.msra.mxu0 %v5732_v22  ;;  %5181 = vmatprep.subr.bf16.mxu1 %v7049_v34 }
 0xbf2   :  { %5213 = vmatprep.subr.bf16.mxu0 %v7049_v34 }
 0xbf3   :  { %v5870_v12 = vpop.eup %5869  ;;  %1969 = vmatmul.mubr.f32.vlgmr.msra.gmra.mrb[20].mxu1 %v8094_v2 }
 0xbf4   :  { %v1514_v47 = vsel %vm6735_vm2, %v5868_v1, %v5870_v12  ;;  %v5872_v44 = vpop.eup %5871  ;;  %1973 = vmatprep.mubr.f32.mxu1 %v8094_v2  ;;  %5183 = vmatpush1.bf16.msra.mxu1 %v7051_v46 }
 0xbf5   :  { %1521 = vrot.lane.b32.xlu1 %v1514_v47, %s6215_s0  ;;  %1517 = vrot.lane.b32.xlu0 %v1514_v47, %s6214_s4  ;;  %v5874_v54 = vpop.eup %5873 }
 0xbf6   :  { %v1513_v35 = vsel %vm6735_vm2, %v5874_v54, %v5872_v44  ;;  %5185 = vmatprep.subr.bf16.mxu1 %v7054_v16  ;;  %v4354_v54 = vpack.c.bf16 %v7004_v24, %v6959_v9 }
 0xbf7   :  { %1974 = vmatmul.mubr.f32.gmra.mrb[22].mxu1 %v8094_v2 }
 0xbf8   :  { %5187 = vmatpush1.bf16.msra.mxu1 %v7057_v23  ;;  %2100 = vmatprep.mubr.f32.mxu1 %v8094_v2 }
 0xbf9   :  { %1515 = vrot.lane.b32.xlu1 %v1513_v35, %s6214_s4  ;;  %1525 = vrot.lane.b32.xlu0 %v1514_v47, %s6216_s26 }
 0xbfa   :  { %5189 = vmatprep.subr.bf16.mxu1 %v7060_v45 }
 0xbfc   :  { %5191 = vmatpush1.bf16.msra.mxu1 %v7063_v49 }
 0xbfd   :  { %1523 = vrot.lane.b32.xlu1 %v1513_v35, %s6216_s26  ;;  %1519 = vrot.lane.b32.xlu0 %v1513_v35, %s6215_s0 }
 0xbfe   :  { %5193 = vmatprep.subr.bf16.mxu1 %v7069_v50 }
 0xc00   :  { %5195 = vmatpush1.bf16.msra.mxu1 %v7071_v8 }
 0xc01   :  { %5197 = vmatprep.subr.bf16.mxu1 %v7075_v59 }
 0xc04   :  { %5199 = vmatpush1.bf16.msra.mxu1 %v7077_v11 }
 0xc05   :  { %5201 = vmatprep.subr.bf16.mxu1 %v7081_v55 }
 0xc08   :  { %5203 = vmatpush1.bf16.msra.mxu1 %v7083_v32 }
 0xc09   :  { %5205 = vmatprep.subr.bf16.mxu1 %v7089_v30 }
 0xc0c   :  { %5207 = vmatpush1.bf16.msra.mxu1 %v7093_v52 }
 0xc0d   :  { %5209 = vmatprep.subr.bf16.mxu1 %v7099_v15 }
 0xc10   :  { %5211 = vmatpush1.bf16.msra.mxu1 %v7103_v51 }
 0xc11   :  { %5245 = vmatprep.subr.bf16.mxu1 %v7049_v34 }
 0xc67   :  { %v1522_v61 = vpop.permute.xlu1 %1521  ;;  %v1518_v21 = vpop.permute.xlu0 %1517 }
 0xc68   :  { %v1530_v38 = vmul.f32 %v1522_v61, %v1514_v47  ;;  %v1528_v25 = vmul.f32 %v1518_v21, %v1409_v5  ;;  %v1408_v47 = vsel %vm452_vm3, %v7029_v7, 0.0  ;;  %v4348_v7 = vpack.c.bf16 %v6908_v3, %v6856_v37 }
 0xc6a   :  { %v1532_v36 = vadd.f32 %v1530_v38, %v1528_v25  ;;  %v1603_v38 = vld [vmem:[%s8087_s7] sm:$0x3]  ;;  %s4296_s7 = sld [smem:[#allocation7 + $0x1]] }
 0xc6b   :  { %v1526_v39 = vpop.permute.xlu0 %1525  ;;  %v1516_v12 = vpop.permute.xlu1 %1515  ;;  %v1608_v25 = vrot.slane %v1603_v38, %v186_v60 }
 0xc6c   :  { %5875 = vtanh.f32 %v1532_v36  ;;  %v1527_v40 = vmul.f32 %v1516_v12, %v1408_v47  ;;  %v1612_v36 = vrot.slane %v1603_v38, %v190_v63 }
 0xc6f   :  { %v1520_v1 = vpop.permute.xlu0 %1519  ;;  %v1524_v31 = vpop.permute.xlu1 %1523 }
 0xc70   :  { %v1529_v14 = vmul.f32 %v1520_v1, %v1513_v35 }
 0xc72   :  { %v1531_v44 = vadd.f32 %v1529_v14, %v1527_v40 }
 0xc74   :  { %5877 = vtanh.f32 %v1531_v44 }
 0xc76   :  { %v5876_v6 = vpop.eup %5875 }
 0xc77   :  { %v7134_v57 = vmul.f32 %v5876_v6, %v1526_v39 }
 0xc79   :  { %8102 = vst [vmem:[#allocation22_spill] sm:$0xff] %v7134_v57  ;;  %v4339_v62 = vpack.c.bf16 %v7043_v28, %v7134_v57 }
 0xc7b   :  { %4340 = vmatprep.mubr.msk.bf16.mxu0 %vm7139_vm4, %v4339_v62 }
 0xc7c   :  { %4343 = vmatmul.mubr.msk.bf16.vlgmr.msra.gmra.mrb[28].mxu0 %vm7139_vm4, %v4342_v18 }
 0xc7d   :  { %4346 = vmatprep.mubr.msk.bf16.mxu0 %vm7139_vm4, %v4345_v33  ;;  %5215 = vmatpush1.bf16.msra.mxu0 %v7051_v46 }
 0xc7e   :  { %5217 = vmatprep.subr.bf16.mxu0 %v7054_v16  ;;  %v5878_v22 = vpop.eup %5877 }
 0xc7f   :  { %v7183_v35 = vmul.f32 %v5878_v22, %v1524_v31 }
 0xc81   :  { %5219 = vmatpush1.bf16.msra.mxu0 %v7057_v23  ;;  %8105 = vst [vmem:[#allocation23_spill] sm:$0xff] %v7183_v35  ;;  %v4360_v41 = vpack.c.bf16 %v7183_v35, %v7037_v4 }
 0xc82   :  { %5221 = vmatprep.subr.bf16.mxu0 %v7060_v45 }
 0xc84   :  { %4349 = vmatmul.mubr.msk.bf16.gmra.mrb[32].mxu0 %vm7139_vm4, %v4348_v7 }
 0xc85   :  { %4352 = vmatprep.mubr.msk.bf16.mxu0 %vm7139_vm4, %v4351_v27  ;;  %5223 = vmatpush1.bf16.msra.mxu0 %v7063_v49 }
 0xc86   :  { %5225 = vmatprep.subr.bf16.mxu0 %v7069_v50 }
 0xc89   :  { %5227 = vmatpush1.bf16.msra.mxu0 %v7071_v8 }
 0xc8a   :  { %5229 = vmatprep.subr.bf16.mxu0 %v7075_v59 }
 0xc8c   :  { %4355 = vmatmul.mubr.msk.bf16.gmra.mrb[36].mxu0 %vm7139_vm4, %v4354_v54 }
 0xc8d   :  { %4358 = vmatprep.mubr.msk.bf16.mxu0 %vm7139_vm4, %v4357_v26  ;;  %5231 = vmatpush1.bf16.msra.mxu0 %v7077_v11 }
 0xc8e   :  { %5233 = vmatprep.subr.bf16.mxu0 %v7081_v55 }
 0xc91   :  { %5235 = vmatpush1.bf16.msra.mxu0 %v7083_v32 }
 0xc92   :  { %5237 = vmatprep.subr.bf16.mxu0 %v7089_v30 }
 0xc94   :  { %4361 = vmatmul.mubr.msk.bf16.gmra.mrb[40].mxu0 %vm7139_vm4, %v4360_v41 }
 0xc95   :  { %5239 = vmatpush1.bf16.msra.mxu0 %v7093_v52  ;;  %2233 = vmatprep.mubr.f32.mxu0 %v8094_v2 }
 0xc96   :  { %5241 = vmatprep.subr.bf16.mxu0 %v7099_v15 }
 0xc99   :  { %5243 = vmatpush1.bf16.msra.mxu0 %v7103_v51 }
 0xc9a   :  { %5277 = vmatprep.subr.bf16.mxu0 %v7049_v34 }
 0xcc6   :  { %v1970_v42 = vpop.f32.mrb[20].mxu1 }
 0xcc7   :  { %v1972_v61 = vpop.f32.mrb[21].mxu1 }
 0xcca   :  { %v1975_v5 = vpop.f32.mrb[22].mxu1 }
 0xccb   :  { %v1976_v21 = vpop.f32.mrb[23].mxu1 }
 0xd4f   :  { %v1809_v39 = vpop.f32.mrb[28].mxu0 }
 0xd50   :  { %v1810_v6 = vadd.f32 %v1809_v39, %v1608_v25  ;;  %v1811_v1 = vpop.f32.mrb[29].mxu0 }
 0xd51   :  { %v7204_v12 = vadd.f32 %v1811_v1, %v1612_v36  ;;  %v1813_v56 = vpop.f32.mrb[30].mxu0 }
 0xd52   :  { %v7206_v62 = vadd.f32 %v1813_v56, %v1608_v25  ;;  %v1980_v14 = vadd.f32 %v1970_v42, %v1810_v6  ;;  %v1815_v18 = vpop.f32.mrb[31].mxu0 }
 0xd53   :  { %v7208_v47 = vadd.f32 %v1815_v18, %v1612_v36 }
 0xd54   :  { %v4280_v33 = vmul.f32 -1.442695, %v1980_v14 }
 0xd56   :  { %5879 = vpow2.f32 %v4280_v33 }
 0xd57   :  { %v1819_v40 = vpop.f32.mrb[32].mxu0  ;;  %5881 = vtanh.f32 %v1980_v14 }
 0xd58   :  { %v7210_v44 = vadd.f32 %v1819_v40, %v1608_v25  ;;  %v1821_v60 = vpop.f32.mrb[33].mxu0 }
 0xd59   :  { %v7212_v58 = vadd.f32 %v1821_v60, %v1612_v36  ;;  %v1823_v63 = vpop.f32.mrb[34].mxu0 }
 0xd5a   :  { %v7214_v7 = vadd.f32 %v1823_v63, %v1608_v25  ;;  %v1825_v27 = vpop.f32.mrb[35].mxu0 }
 0xd5b   :  { %v7216_v54 = vadd.f32 %v1825_v27, %v1612_v36 }
 0xd5f   :  { %v1829_v22 = vpop.f32.mrb[36].mxu0 }
 0xd60   :  { %v5880_v26 = vpop.eup %5879  ;;  %v7218_v31 = vadd.f32 %v1829_v22, %v1608_v25  ;;  %v1831_v41 = vpop.f32.mrb[37].mxu0 }
 0xd61   :  { %v1991_v42 = vadd.f32 1.0, %v5880_v26  ;;  %v7220_v61 = vadd.f32 %v1831_v41, %v1612_v36  ;;  %v1833_v5 = vpop.f32.mrb[38].mxu0  ;;  %v5882_v22 = vpop.eup %5881 }
 0xd62   :  { %v7222_v38 = vadd.f32 %v1833_v5, %v1608_v25  ;;  %v1835_v39 = vpop.f32.mrb[39].mxu0 }
 0xd63   :  { %5883 = vrcp.f32 %v1991_v42  ;;  %v7224_v6 = vadd.f32 %v1835_v39, %v1612_v36 }
 0xd67   :  { %v1839_v1 = vpop.f32.mrb[40].mxu0 }
 0xd68   :  { %v7226_v56 = vadd.f32 %v1839_v1, %v1608_v25  ;;  %v1841_v18 = vpop.f32.mrb[41].mxu0 }
 0xd69   :  { %v7228_v33 = vadd.f32 %v1841_v18, %v1612_v36  ;;  %v1843_v40 = vpop.f32.mrb[42].mxu0 }
 0xd6a   :  { %v7230_v60 = vadd.f32 %v1843_v40, %v1608_v25  ;;  %v1845_v63 = vpop.f32.mrb[43].mxu0 }
 0xd6b   :  { %v1846_v27 = vadd.f32 %v1845_v63, %v1612_v36 }
 0xd6d   :  { %v5884_v26 = vpop.eup %5883  ;;  %v1982_v14 = vadd.f32 %v1976_v21, %v1846_v27 }
 0xd6e   :  { %v1997_v41 = vsel %vm6735_vm2, %v5882_v22, %v5884_v26 }
 0xd6f   :  { %v4281_v42 = vmul.f32 -1.442695, %v1982_v14  ;;  %2003 = vrot.lane.b32.xlu1 %v1997_v41, %s6215_s0  ;;  %1999 = vrot.lane.b32.xlu0 %v1997_v41, %s6214_s4 }
 0xd71   :  { %5885 = vpow2.f32 %v4281_v42 }
 0xd72   :  { %5887 = vtanh.f32 %v1982_v14 }
 0xd7b   :  { %v5886_v5 = vpop.eup %5885 }
 0xd7c   :  { %v1992_v39 = vadd.f32 1.0, %v5886_v5  ;;  %v5888_v25 = vpop.eup %5887 }
 0xd7e   :  { %5889 = vrcp.f32 %v1992_v39 }
 0xd88   :  { %v5890_v1 = vpop.eup %5889 }
 0xd89   :  { %v1998_v36 = vsel %vm6735_vm2, %v5888_v25, %v5890_v1 }
 0xd8a   :  { %2005 = vrot.lane.b32.xlu1 %v1998_v36, %s6215_s0  ;;  %2001 = vrot.lane.b32.xlu0 %v1998_v36, %s6214_s4 }
 0xd8e   :  { %2009 = vrot.lane.b32.xlu1 %v1998_v36, %s6216_s26  ;;  %2007 = vrot.lane.b32.xlu0 %v1997_v41, %s6216_s26 }
 0xde1   :  { %v2004_v21 = vpop.permute.xlu1 %2003  ;;  %v2000_v18 = vpop.permute.xlu0 %1999 }
 0xde2   :  { %v2013_v40 = vmul.f32 %v2004_v21, %v1997_v41  ;;  %v2011_v63 = vmul.f32 0.0, %v2000_v18 }
 0xde4   :  { %v7242_v27 = vadd.f32 %v2013_v40, %v2011_v63 }
 0xde6   :  { %5891 = vtanh.f32 %v7242_v27 }
 0xdf0   :  { %v5892_v39 = vpop.eup %5891 }
 0xdfc   :  { %v2006_v22 = vpop.permute.xlu1 %2005  ;;  %v2002_v26 = vpop.permute.xlu0 %2001 }
 0xdfd   :  { %v2014_v14 = vmul.f32 %v2006_v22, %v1998_v36  ;;  %v2012_v42 = vmul.f32 0.0, %v2002_v26 }
 0xdff   :  { %v7245_v5 = vadd.f32 %v2014_v14, %v2012_v42 }
 0xe00   :  { %v2008_v25 = vpop.permute.xlu0 %2007  ;;  %v2010_v36 = vpop.permute.xlu1 %2009 }
 0xe01   :  { %5893 = vtanh.f32 %v7245_v5  ;;  %v7248_v1 = vmul.f32 %v5892_v39, %v2008_v25 }
 0xe03   :  { %4362 = vmatmul.mubr.msk.f32.vlgmr.msra.gmra.mrb[24].mxu1 %vm452_vm3, %v7248_v1 }
 0xe04   :  { %2105 = vmatprep.mubr.f32.mxu1 %v8094_v2  ;;  %5247 = vmatpush1.bf16.msra.mxu1 %v7051_v46 }
 0xe05   :  { %5249 = vmatprep.subr.bf16.mxu1 %v7054_v16 }
 0xe08   :  { %5251 = vmatpush1.bf16.msra.mxu1 %v7057_v23 }
 0xe09   :  { %5253 = vmatprep.subr.bf16.mxu1 %v7060_v45 }
 0xe0b   :  { %v5894_v41 = vpop.eup %5893 }
 0xe0c   :  { %v7258_v21 = vmul.f32 %v5894_v41, %v2010_v36  ;;  %5255 = vmatpush1.bf16.msra.mxu1 %v7063_v49 }
 0xe0d   :  { %5257 = vmatprep.subr.bf16.mxu1 %v7069_v50 }
 0xe0e   :  { %4363 = vmatmul.mubr.msk.f32.gmra.mrb[26].mxu1 %vm452_vm3, %v7258_v21 }
 0xe0f   :  { %2366 = vmatprep.mubr.f32.mxu1 %v8094_v2 }
 0xe10   :  { %5259 = vmatpush1.bf16.msra.mxu1 %v7071_v8 }
 0xe11   :  { %5261 = vmatprep.subr.bf16.mxu1 %v7075_v59 }
 0xe14   :  { %5263 = vmatpush1.bf16.msra.mxu1 %v7077_v11 }
 0xe15   :  { %5265 = vmatprep.subr.bf16.mxu1 %v7081_v55 }
 0xe18   :  { %5267 = vmatpush1.bf16.msra.mxu1 %v7083_v32 }
 0xe19   :  { %5269 = vmatprep.subr.bf16.mxu1 %v7089_v30 }
 0xe1c   :  { %5271 = vmatpush1.bf16.msra.mxu1 %v7093_v52 }
 0xe1d   :  { %5273 = vmatprep.subr.bf16.mxu1 %v7099_v15 }
 0xe20   :  { %5275 = vmatpush1.bf16.msra.mxu1 %v7103_v51 }
 0xe21   :  { %5309 = vmatprep.subr.bf16.mxu1 %v7049_v34 }
 0xed6   :  { %v2102_v18 = vpop.f32.mrb[24].mxu1 }
 0xed7   :  { %v2112_v40 = vadd.f32 %v2102_v18, %v7206_v62  ;;  %v2104_v63 = vpop.f32.mrb[25].mxu1 }
 0xed9   :  { %v4282_v22 = vmul.f32 -1.442695, %v2112_v40 }
 0xedb   :  { %5895 = vpow2.f32 %v4282_v22 }
 0xedc   :  { %5897 = vtanh.f32 %v2112_v40 }
 0xee1   :  { %v2107_v26 = vpop.f32.mrb[26].mxu1 }
 0xee2   :  { %v2108_v14 = vpop.f32.mrb[27].mxu1 }
 0xee3   :  { %v2114_v42 = vadd.f32 %v2108_v14, %v7228_v33  ;;  %v7294_v14 = vstv %s4296_s7 }
 0xee5   :  { %v5896_v39 = vpop.eup %5895  ;;  %v4283_v25 = vmul.f32 -1.442695, %v2114_v42 }
 0xee6   :  { %v2123_v41 = vadd.f32 1.0, %v5896_v39  ;;  %v5898_v36 = vpop.eup %5897 }
 0xee7   :  { %5899 = vpow2.f32 %v4283_v25  ;;  %v2024_v25 = vsel %vm452_vm3, %v7245_v5, 0.0 }
 0xee8   :  { %5901 = vrcp.f32 %v2123_v41  ;;  %v607_v41 = vsel %vm452_vm3, %v6752_v29, 0.0  ;;  %v2021_v29 = vsel %vm452_vm3, %v7248_v1, 0.0 }
 0xee9   :  { %5903 = vtanh.f32 %v2114_v42  ;;  %v7296_v42 = vstv %s2955_s3 }
 0xef1   :  { %v5900_v2 = vpop.eup %5899 }
 0xef2   :  { %v5902_v35 = vpop.eup %5901  ;;  %v2124_v4 = vadd.f32 1.0, %v5900_v2 }
 0xef3   :  { %v2129_v62 = vsel %vm6735_vm2, %v5898_v36, %v5902_v35  ;;  %v5904_v33 = vpop.eup %5903  ;;  %v741_v36 = vsel %vm452_vm3, %v6804_v20, 0.0  ;;  %v3007_v20 = vmul.f32 %v7294_v14, %v607_v41 }
 0xef4   :  { %5905 = vrcp.f32 %v2124_v4  ;;  %2135 = vrot.lane.b32.xlu1 %v2129_v62, %s6215_s0  ;;  %2131 = vrot.lane.b32.xlu0 %v2129_v62, %s6214_s4  ;;  %v2023_v4 = vsel %vm452_vm3, %v7242_v27, 0.0 }
 0xefe   :  { %v5906_v18 = vpop.eup %5905 }
 0xeff   :  { %v2130_v40 = vsel %vm6735_vm2, %v5904_v33, %v5906_v18 }
 0xf00   :  { %2137 = vrot.lane.b32.xlu1 %v2130_v40, %s6215_s0  ;;  %2133 = vrot.lane.b32.xlu0 %v2130_v40, %s6214_s4 }
 0xf04   :  { %2141 = vrot.lane.b32.xlu1 %v2130_v40, %s6216_s26  ;;  %2139 = vrot.lane.b32.xlu0 %v2129_v62, %s6216_s26 }
 0xf66   :  { %v2136_v2 = vpop.permute.xlu1 %2135  ;;  %v2132_v35 = vpop.permute.xlu0 %2131 }
 0xf67   :  { %v2145_v63 = vmul.f32 %v2136_v2, %v2129_v62  ;;  %v2143_v22 = vmul.f32 %v2132_v35, %v2023_v4  ;;  %v2956_v62 = vld [vmem:[%s8081_s1] sm:$0xff]  ;;  %v2958_v2 = vld [vmem:[%s8081_s1 + $0x10] sm:$0xff]  ;;  %v7313_v4 = vstv %s4297_s14 }
 0xf69   :  { %v7291_v26 = vadd.f32 %v2145_v63, %v2143_v22  ;;  %v3009_v63 = vmul.f32 %v7294_v14, %v741_v36  ;;  %v2975_v22 = vmul.f32 %v7296_v42, %v2958_v2  ;;  %v608_v2 = vsel %vm452_vm3, %v6771_v48, 0.0 }
 0xf6a   :  { %v2022_v48 = vsel %vm452_vm3, %v7258_v21, 0.0 }
 0xf6b   :  { %5907 = vtanh.f32 %v7291_v26  ;;  %v3025_v41 = vadd.f32 %v3009_v63, %v2975_v22  ;;  %v3022_v63 = vmul.f32 %v7294_v14, %v608_v2 }
 0xf72   :  { %v2138_v39 = vpop.permute.xlu1 %2137  ;;  %v2134_v27 = vpop.permute.xlu0 %2133 }
 0xf73   :  { %v2146_v33 = vmul.f32 %v2138_v39, %v2130_v40  ;;  %v2144_v18 = vmul.f32 %v2134_v27, %v2024_v25  ;;  %v2973_v40 = vmul.f32 %v7296_v42, %v2956_v62  ;;  %v3057_v27 = vmul.f32 %v7313_v4, %v2021_v29  ;;  %v2969_v29 = vld [vmem:[%s8081_s1 + $0x68] sm:$0xff] }
 0xf75   :  { %v5908_v5 = vpop.eup %5907  ;;  %v7318_v35 = vadd.f32 %v2146_v33, %v2144_v18  ;;  %v3023_v1 = vadd.f32 %v3007_v20, %v2973_v40  ;;  %v8106_v33 = vmov 0.0  }
 0xf76   :  { %v2140_v39 = vpop.permute.xlu0 %2139 }
 0xf77   :  { %5909 = vtanh.f32 %v7318_v35  ;;  %v2151_v25 = vmul.f32 %v5908_v5, %v2140_v39  ;;  %v7334_v62 = vadd.f32 %v3057_v27, %v3023_v1  ;;  %v742_v5 = vsel %vm452_vm3, %v6814_v0, 0.0 }
 0xf78   :  { %v3020_v40 = vmul.f32 %v7294_v14, %v742_v5  ;;  %v2986_v39 = vmul.f32 %v7296_v42, %v2969_v29  ;;  %v3072_v1 = vmul.f32 %v7313_v4, %v2022_v48 }
 0xf79   :  { %v2153_v57 = vsel %vm452_vm3, %v2151_v25, 0.0  ;;  %4364 = vmatmul.mubr.msk.f32.vlgmr.msra.gmra.mrb[44].mxu0 %vm452_vm3, %v2151_v25  ;;  %v2142_v25 = vpop.permute.xlu1 %2141 }
 0xf7a   :  { %v3059_v36 = vmul.f32 %v7313_v4, %v2153_v57  ;;  %2238 = vmatprep.mubr.f32.mxu0 %v8106_v33  ;;  %5279 = vmatpush1.bf16.msra.mxu0 %v7051_v46  ;;  %v2971_v57 = vld [vmem:[%s8081_s1 + $0x78] sm:$0xff] }
 0xf7b   :  { %5281 = vmatprep.subr.bf16.mxu0 %v7054_v16  ;;  %v2988_v22 = vmul.f32 %v7296_v42, %v2971_v57 }
 0xf7c   :  { %v7336_v18 = vadd.f32 %v3059_v36, %v3025_v41  ;;  %v3036_v36 = vadd.f32 %v3020_v40, %v2986_v39 }
 0xf7d   :  { %v3038_v41 = vadd.f32 %v3022_v63, %v2988_v22 }
 0xf7e   :  { %v3089_v20 = vpack.c.bf16 %v7336_v18, %v7334_v62  ;;  %5283 = vmatpush1.bf16.msra.mxu0 %v7057_v23 }
 0xf7f   :  { %5285 = vmatprep.subr.bf16.mxu0 %v7060_v45  ;;  %v7371_v5 = vadd.f32 %v3072_v1, %v3038_v41 }
 0xf81   :  { %v5910_v0 = vpop.eup %5909 }
 0xf82   :  { %v2152_v27 = vmul.f32 %v5910_v0, %v2142_v25  ;;  %5287 = vmatpush1.bf16.msra.mxu0 %v7063_v49 }
 0xf83   :  { %5289 = vmatprep.subr.bf16.mxu0 %v7069_v50 }
 0xf84   :  { %v2154_v21 = vsel %vm452_vm3, %v2152_v27, 0.0  ;;  %4365 = vmatmul.mubr.msk.f32.gmra.mrb[46].mxu0 %vm452_vm3, %v2152_v27 }
 0xf85   :  { %v3070_v2 = vmul.f32 %v7313_v4, %v2154_v21  ;;  %2499 = vmatprep.mubr.f32.mxu0 %v8106_v33 }
 0xf86   :  { %5291 = vmatpush1.bf16.msra.mxu0 %v7071_v8 }
 0xf87   :  { %v7373_v57 = vadd.f32 %v3070_v2, %v3036_v36  ;;  %5293 = vmatprep.subr.bf16.mxu0 %v7075_v59 }
 0xf8a   :  { %5295 = vmatpush1.bf16.msra.mxu0 %v7077_v11 }
 0xf8b   :  { %5297 = vmatprep.subr.bf16.mxu0 %v7081_v55 }
 0xf8e   :  { %5299 = vmatpush1.bf16.msra.mxu0 %v7083_v32 }
 0xf8f   :  { %5301 = vmatprep.subr.bf16.mxu0 %v7089_v30 }
 0xf92   :  { %5303 = vmatpush1.bf16.msra.mxu0 %v7093_v52 }
 0xf93   :  { %5305 = vmatprep.subr.bf16.mxu0 %v7099_v15 }
 0xf96   :  { %5307 = vmatpush1.bf16.msra.mxu0 %v7103_v51 }
 0xf97   :  { %5341 = vmatprep.subr.bf16.mxu0 %v7049_v34 }
0x104c   :  { %v2235_v48 = vpop.f32.mrb[44].mxu0 }
0x104d   :  { %v2245_v0 = vadd.f32 %v2235_v48, %v7210_v44  ;;  %v2237_v63 = vpop.f32.mrb[45].mxu0 }
0x104f   :  { %v4284_v40 = vmul.f32 -1.442695, %v2245_v0 }
0x1051   :  { %5911 = vpow2.f32 %v4284_v40 }
0x1052   :  { %5913 = vtanh.f32 %v2245_v0 }
0x1057   :  { %v2240_v22 = vpop.f32.mrb[46].mxu0 }
0x1058   :  { %v2241_v39 = vpop.f32.mrb[47].mxu0 }
0x1059   :  { %v2247_v25 = vadd.f32 %v2241_v39, %v7224_v6 }
0x105b   :  { %v5912_v27 = vpop.eup %5911  ;;  %v4285_v1 = vmul.f32 -1.442695, %v2247_v25 }
0x105c   :  { %v2256_v21 = vadd.f32 1.0, %v5912_v27  ;;  %v5914_v41 = vpop.eup %5913 }
0x105d   :  { %5915 = vpow2.f32 %v4285_v1  ;;  %v2156_v1 = vsel %vm452_vm3, %v7318_v35, 0.0 }
0x105e   :  { %5917 = vrcp.f32 %v2256_v21 }
0x105f   :  { %5919 = vtanh.f32 %v2247_v25 }
0x1067   :  { %v5916_v36 = vpop.eup %5915 }
0x1068   :  { %v5918_v2 = vpop.eup %5917  ;;  %v2257_v29 = vadd.f32 1.0, %v5916_v36 }
0x1069   :  { %v2262_v44 = vsel %vm6735_vm2, %v5914_v41, %v5918_v2  ;;  %v5920_v6 = vpop.eup %5919 }
0x106a   :  { %5921 = vrcp.f32 %v2257_v29  ;;  %2268 = vrot.lane.b32.xlu1 %v2262_v44, %s6215_s0  ;;  %2264 = vrot.lane.b32.xlu0 %v2262_v44, %s6214_s4  ;;  %v2155_v29 = vsel %vm452_vm3, %v7291_v26, 0.0 }
0x1074   :  { %v5922_v48 = vpop.eup %5921 }
0x1075   :  { %v2263_v0 = vsel %vm6735_vm2, %v5920_v6, %v5922_v48 }
0x1076   :  { %2270 = vrot.lane.b32.xlu1 %v2263_v0, %s6215_s0  ;;  %2266 = vrot.lane.b32.xlu0 %v2263_v0, %s6214_s4 }
0x107a   :  { %2274 = vrot.lane.b32.xlu1 %v2263_v0, %s6216_s26  ;;  %2272 = vrot.lane.b32.xlu0 %v2262_v44, %s6216_s26 }
0x10dc   :  { %v2269_v63 = vpop.permute.xlu1 %2268  ;;  %v2265_v40 = vpop.permute.xlu0 %2264 }
0x10dd   :  { %v2278_v22 = vmul.f32 %v2269_v63, %v2262_v44  ;;  %v2276_v39 = vmul.f32 %v2265_v40, %v2155_v29 }
0x10df   :  { %v7401_v25 = vadd.f32 %v2278_v22, %v2276_v39 }
0x10e1   :  { %5923 = vtanh.f32 %v7401_v25 }
0x10e8   :  { %v2271_v27 = vpop.permute.xlu1 %2270  ;;  %v2267_v21 = vpop.permute.xlu0 %2266 }
0x10e9   :  { %v2279_v41 = vmul.f32 %v2271_v27, %v2263_v0  ;;  %v2277_v36 = vmul.f32 %v2267_v21, %v2156_v1 }
0x10eb   :  { %v5924_v2 = vpop.eup %5923  ;;  %v7407_v6 = vadd.f32 %v2279_v41, %v2277_v36 }
0x10ec   :  { %v2273_v48 = vpop.permute.xlu0 %2272  ;;  %v2275_v44 = vpop.permute.xlu1 %2274 }
0x10ed   :  { %5925 = vtanh.f32 %v7407_v6  ;;  %v7410_v26 = vmul.f32 %v5924_v2, %v2273_v48 }
0x10ef   :  { %4366 = vmatmul.mubr.msk.f32.vlgmr.msra.gmra.mrb[28].mxu1 %vm452_vm3, %v7410_v26 }
0x10f0   :  { %2371 = vmatprep.mubr.f32.mxu1 %v8106_v33  ;;  %5311 = vmatpush1.bf16.msra.mxu1 %v7051_v46 }
0x10f1   :  { %5313 = vmatprep.subr.bf16.mxu1 %v7054_v16 }
0x10f4   :  { %5315 = vmatpush1.bf16.msra.mxu1 %v7057_v23 }
0x10f5   :  { %5317 = vmatprep.subr.bf16.mxu1 %v7060_v45 }
0x10f7   :  { %v5926_v35 = vpop.eup %5925 }
0x10f8   :  { %v7420_v0 = vmul.f32 %v5926_v35, %v2275_v44  ;;  %5319 = vmatpush1.bf16.msra.mxu1 %v7063_v49 }
0x10f9   :  { %5321 = vmatprep.subr.bf16.mxu1 %v7069_v50 }
0x10fa   :  { %4367 = vmatmul.mubr.msk.f32.gmra.mrb[30].mxu1 %vm452_vm3, %v7420_v0 }
0x10fb   :  { %2630 = vmatprep.mubr.f32.mxu1 %v8106_v33 }
0x10fc   :  { %5323 = vmatpush1.bf16.msra.mxu1 %v7071_v8 }
0x10fd   :  { %5325 = vmatprep.subr.bf16.mxu1 %v7075_v59 }
0x1100   :  { %5327 = vmatpush1.bf16.msra.mxu1 %v7077_v11 }
0x1101   :  { %5329 = vmatprep.subr.bf16.mxu1 %v7081_v55 }
0x1104   :  { %5331 = vmatpush1.bf16.msra.mxu1 %v7083_v32 }
0x1105   :  { %5333 = vmatprep.subr.bf16.mxu1 %v7089_v30 }
0x1108   :  { %5335 = vmatpush1.bf16.msra.mxu1 %v7093_v52 }
0x1109   :  { %5337 = vmatprep.subr.bf16.mxu1 %v7099_v15 }
0x110c   :  { %5339 = vmatpush1.bf16.msra.mxu1 %v7103_v51 }
0x110d   :  { %5373 = vmatprep.subr.bf16.mxu1 %v7049_v34 }
0x11c2   :  { %v2368_v63 = vpop.f32.mrb[28].mxu1 }
0x11c3   :  { %v2378_v29 = vadd.f32 %v2368_v63, %v7214_v7  ;;  %v2370_v40 = vpop.f32.mrb[29].mxu1 }
0x11c4   :  { %v2288_v40 = vsel %vm452_vm3, %v7401_v25, 0.0  ;;  %v1011_v25 = vsel %vm452_vm3, %v6908_v3, 0.0 }
0x11c5   :  { %v4286_v22 = vmul.f32 -1.442695, %v2378_v29  ;;  %v3013_v3 = vmul.f32 %v7294_v14, %v1011_v25  ;;  %v877_v25 = vsel %vm452_vm3, %v6866_v17, 0.0  ;;  %v2287_v17 = vsel %vm452_vm3, %v7420_v0, 0.0 }
0x11c7   :  { %5927 = vpow2.f32 %v4286_v22 }
0x11c8   :  { %5929 = vtanh.f32 %v2378_v29 }
0x11cd   :  { %v2373_v39 = vpop.f32.mrb[30].mxu1 }
0x11ce   :  { %v2374_v27 = vpop.f32.mrb[31].mxu1 }
0x11cf   :  { %v2380_v1 = vadd.f32 %v2374_v27, %v7220_v61 }
0x11d1   :  { %v5928_v21 = vpop.eup %5927  ;;  %v4287_v41 = vmul.f32 -1.442695, %v2380_v1 }
0x11d2   :  { %v2389_v36 = vadd.f32 1.0, %v5928_v21  ;;  %v5930_v2 = vpop.eup %5929 }
0x11d3   :  { %5931 = vpow2.f32 %v4287_v41  ;;  %v2289_v41 = vsel %vm452_vm3, %v7407_v6, 0.0 }
0x11d4   :  { %5933 = vrcp.f32 %v2389_v36 }
0x11d5   :  { %5935 = vtanh.f32 %v2380_v1 }
0x11dd   :  { %v5932_v48 = vpop.eup %5931 }
0x11de   :  { %v5934_v35 = vpop.eup %5933  ;;  %v2390_v34 = vadd.f32 1.0, %v5932_v48  ;;  %v2960_v48 = vld [vmem:[%s8081_s1 + $0x20] sm:$0xff] }
0x11df   :  { %v2395_v7 = vsel %vm6735_vm2, %v5930_v2, %v5934_v35  ;;  %v5936_v61 = vpop.eup %5935  ;;  %v876_v2 = vsel %vm452_vm3, %v6856_v37, 0.0 }
0x11e0   :  { %5937 = vrcp.f32 %v2390_v34  ;;  %2401 = vrot.lane.b32.xlu1 %v2395_v7, %s6215_s0  ;;  %2397 = vrot.lane.b32.xlu0 %v2395_v7, %s6214_s4 }
0x11ea   :  { %v5938_v44 = vpop.eup %5937 }
0x11eb   :  { %v2396_v63 = vsel %vm6735_vm2, %v5936_v61, %v5938_v44  ;;  %v2286_v61 = vsel %vm452_vm3, %v7410_v26, 0.0  ;;  %v3011_v44 = vmul.f32 %v7294_v14, %v876_v2 }
0x11ec   :  { %2403 = vrot.lane.b32.xlu1 %v2396_v63, %s6215_s0  ;;  %2399 = vrot.lane.b32.xlu0 %v2396_v63, %s6214_s4 }
0x11f0   :  { %2407 = vrot.lane.b32.xlu1 %v2396_v63, %s6216_s26  ;;  %2405 = vrot.lane.b32.xlu0 %v2395_v7, %s6216_s26 }
0x1252   :  { %v2402_v29 = vpop.permute.xlu1 %2401  ;;  %v2398_v22 = vpop.permute.xlu0 %2397 }
0x1253   :  { %v2411_v39 = vmul.f32 %v2402_v29, %v2395_v7  ;;  %v2409_v27 = vmul.f32 %v2398_v22, %v2288_v40  ;;  %v2962_v7 = vld [vmem:[%s8081_s1 + $0x30] sm:$0xff]  ;;  %v2977_v29 = vmul.f32 %v7296_v42, %v2960_v48  ;;  %v1012_v48 = vsel %vm452_vm3, %v6918_v19, 0.0 }
0x1255   :  { %v7453_v1 = vadd.f32 %v2411_v39, %v2409_v27  ;;  %v3061_v39 = vmul.f32 %v7313_v4, %v2286_v61  ;;  %v3027_v26 = vadd.f32 %v3011_v44, %v2977_v29  ;;  %v3016_v61 = vmul.f32 %v7294_v14, %v1012_v48 }
0x1257   :  { %5939 = vtanh.f32 %v7453_v1 }
0x125e   :  { %v2404_v21 = vpop.permute.xlu1 %2403  ;;  %v2400_v36 = vpop.permute.xlu0 %2399 }
0x125f   :  { %v2412_v35 = vmul.f32 %v2404_v21, %v2396_v63  ;;  %v2410_v34 = vmul.f32 %v2400_v36, %v2289_v41  ;;  %v2979_v63 = vmul.f32 %v7296_v42, %v2962_v7  ;;  %v7490_v36 = vadd.f32 %v3061_v39, %v3027_v26 }
0x1261   :  { %v5940_v6 = vpop.eup %5939  ;;  %v7474_v37 = vadd.f32 %v2412_v35, %v2410_v34  ;;  %v3029_v21 = vadd.f32 %v3013_v3, %v2979_v63  ;;  %v2967_v35 = vld [vmem:[%s8081_s1 + $0x58] sm:$0xff]  ;;  %v2965_v34 = vld [vmem:[%s8081_s1 + $0x48] sm:$0xff] }
0x1262   :  { %v2406_v40 = vpop.permute.xlu0 %2405  ;;  %v2984_v44 = vmul.f32 %v7296_v42, %v2967_v35  ;;  %v2982_v3 = vmul.f32 %v7296_v42, %v2965_v34  ;;  %v2408_v29 = vpop.permute.xlu1 %2407 }
0x1263   :  { %5941 = vtanh.f32 %v7474_v37  ;;  %v2417_v22 = vmul.f32 %v5940_v6, %v2406_v40  ;;  %v3018_v6 = vmul.f32 %v7294_v14, %v877_v25  ;;  %v3068_v40 = vmul.f32 %v7313_v4, %v2287_v17 }
0x1264   :  { %v3032_v39 = vadd.f32 %v3016_v61, %v2982_v3 }
0x1265   :  { %v2419_v27 = vsel %vm452_vm3, %v2417_v22, 0.0  ;;  %4368 = vmatmul.mubr.msk.f32.vlgmr.msra.gmra.mrb[48].mxu0 %vm452_vm3, %v2417_v22  ;;  %v3034_v22 = vadd.f32 %v3018_v6, %v2984_v44 }
0x1266   :  { %v3063_v41 = vmul.f32 %v7313_v4, %v2419_v27  ;;  %2504 = vmatprep.mubr.f32.mxu0 %v8106_v33  ;;  %5343 = vmatpush1.bf16.msra.mxu0 %v7051_v46 }
0x1267   :  { %5345 = vmatprep.subr.bf16.mxu0 %v7054_v16  ;;  %v7527_v26 = vadd.f32 %v3068_v40, %v3034_v22 }
0x1268   :  { %v7492_v2 = vadd.f32 %v3063_v41, %v3029_v21 }
0x126a   :  { %5347 = vmatpush1.bf16.msra.mxu0 %v7057_v23  ;;  %v3091_v7 = vpack.c.bf16 %v7492_v2, %v7490_v36 }
0x126b   :  { %5349 = vmatprep.subr.bf16.mxu0 %v7060_v45 }
0x126d   :  { %v5942_v19 = vpop.eup %5941 }
0x126e   :  { %v2418_v63 = vmul.f32 %v5942_v19, %v2408_v29  ;;  %5351 = vmatpush1.bf16.msra.mxu0 %v7063_v49 }
0x126f   :  { %5353 = vmatprep.subr.bf16.mxu0 %v7069_v50 }
0x1270   :  { %v2420_v0 = vsel %vm452_vm3, %v2418_v63, 0.0  ;;  %4369 = vmatmul.mubr.msk.f32.gmra.mrb[50].mxu0 %vm452_vm3, %v2418_v63 }
0x1271   :  { %v3066_v27 = vmul.f32 %v7313_v4, %v2420_v0  ;;  %2761 = vmatprep.mubr.f32.mxu0 %v8106_v33 }
0x1272   :  { %5355 = vmatpush1.bf16.msra.mxu0 %v7071_v8 }
0x1273   :  { %v7529_v21 = vadd.f32 %v3066_v27, %v3032_v39  ;;  %5357 = vmatprep.subr.bf16.mxu0 %v7075_v59 }
0x1275   :  { %v3094_v41 = vpack.c.bf16 %v7527_v26, %v7529_v21 }
0x1276   :  { %5359 = vmatpush1.bf16.msra.mxu0 %v7077_v11 }
0x1277   :  { %5361 = vmatprep.subr.bf16.mxu0 %v7081_v55 }
0x127a   :  { %5363 = vmatpush1.bf16.msra.mxu0 %v7083_v32 }
0x127b   :  { %5365 = vmatprep.subr.bf16.mxu0 %v7089_v30 }
0x127e   :  { %5367 = vmatpush1.bf16.msra.mxu0 %v7093_v52 }
0x127f   :  { %5369 = vmatprep.subr.bf16.mxu0 %v7099_v15 }
0x1282   :  { %5371 = vmatpush1.bf16.msra.mxu0 %v7103_v51 }
0x1338   :  { %v2501_v25 = vpop.f32.mrb[48].mxu0 }
0x1339   :  { %v2511_v48 = vadd.f32 %v2501_v25, %v7218_v31  ;;  %v2503_v35 = vpop.f32.mrb[49].mxu0  ;;  %v2421_v25 = vsel %vm452_vm3, %v7453_v1, 0.0 }
0x133b   :  { %v4288_v34 = vmul.f32 -1.442695, %v2511_v48 }
0x133d   :  { %5943 = vpow2.f32 %v4288_v34 }
0x133e   :  { %5945 = vtanh.f32 %v2511_v48 }
0x1343   :  { %v2506_v17 = vpop.f32.mrb[50].mxu0 }
0x1344   :  { %v2507_v19 = vpop.f32.mrb[51].mxu0 }
0x1345   :  { %v2513_v6 = vadd.f32 %v2507_v19, %v7216_v54 }
0x1347   :  { %v5944_v61 = vpop.eup %5943  ;;  %v4289_v44 = vmul.f32 -1.442695, %v2513_v6 }
0x1348   :  { %v2522_v3 = vadd.f32 1.0, %v5944_v61  ;;  %v5946_v29 = vpop.eup %5945 }
0x1349   :  { %5947 = vpow2.f32 %v4289_v44 }
0x134a   :  { %5949 = vrcp.f32 %v2522_v3 }
0x134b   :  { %5951 = vtanh.f32 %v2513_v6  ;;  %v2422_v6 = vsel %vm452_vm3, %v7474_v37, 0.0 }
0x1353   :  { %v5948_v63 = vpop.eup %5947 }
0x1354   :  { %v5950_v40 = vpop.eup %5949  ;;  %v2523_v0 = vadd.f32 1.0, %v5948_v63 }
0x1355   :  { %v2528_v31 = vsel %vm6735_vm2, %v5946_v29, %v5950_v40  ;;  %v5952_v54 = vpop.eup %5951 }
0x1356   :  { %5953 = vrcp.f32 %v2523_v0  ;;  %2534 = vrot.lane.b32.xlu1 %v2528_v31, %s6215_s0  ;;  %2530 = vrot.lane.b32.xlu0 %v2528_v31, %s6214_s4 }
0x1360   :  { %v5954_v22 = vpop.eup %5953 }
0x1361   :  { %v2529_v39 = vsel %vm6735_vm2, %v5952_v54, %v5954_v22 }
0x1362   :  { %2536 = vrot.lane.b32.xlu1 %v2529_v39, %s6215_s0  ;;  %2532 = vrot.lane.b32.xlu0 %v2529_v39, %s6214_s4 }
0x1366   :  { %2540 = vrot.lane.b32.xlu1 %v2529_v39, %s6216_s26  ;;  %2538 = vrot.lane.b32.xlu0 %v2528_v31, %s6216_s26 }
0x13c8   :  { %v2535_v27 = vpop.permute.xlu1 %2534  ;;  %v2531_v48 = vpop.permute.xlu0 %2530 }
0x13c9   :  { %v2544_v35 = vmul.f32 %v2535_v27, %v2528_v31  ;;  %v2542_v34 = vmul.f32 %v2531_v48, %v2421_v25 }
0x13cb   :  { %v7556_v17 = vadd.f32 %v2544_v35, %v2542_v34 }
0x13cd   :  { %5955 = vtanh.f32 %v7556_v17 }
0x13d4   :  { %v2537_v19 = vpop.permute.xlu1 %2536  ;;  %v2533_v61 = vpop.permute.xlu0 %2532 }
0x13d5   :  { %v2545_v44 = vmul.f32 %v2537_v19, %v2529_v39  ;;  %v2543_v3 = vmul.f32 %v2533_v61, %v2422_v6  ;;  %v2554_v39 = vsel %vm452_vm3, %v7556_v17, 0.0  ;;  %v1144_v61 = vsel %vm452_vm3, %v6959_v9, 0.0 }
0x13d6   :  { %v1275_v17 = vsel %vm452_vm3, %v7004_v24, 0.0 }
0x13d7   :  { %v5956_v29 = vpop.eup %5955  ;;  %v7562_v63 = vadd.f32 %v2545_v44, %v2543_v3  ;;  %v2964_v44 = vld [vmem:[%s8081_s1 + $0x40] sm:$0xff]  ;;  %v3017_v24 = vmul.f32 %v7294_v14, %v1275_v17 }
0x13d8   :  { %v2539_v40 = vpop.permute.xlu0 %2538  ;;  %v2541_v0 = vpop.permute.xlu1 %2540 }
0x13d9   :  { %5957 = vtanh.f32 %v7562_v63  ;;  %v7565_v1 = vmul.f32 %v5956_v29, %v2539_v40  ;;  %v2555_v19 = vsel %vm452_vm3, %v7562_v63, 0.0  ;;  %v2966_v40 = vld [vmem:[%s8081_s1 + $0x50] sm:$0xff] }
0x13db   :  { %4370 = vmatmul.mubr.msk.f32.vlgmr.msra.gmra.mrb[32].mxu1 %vm452_vm3, %v7565_v1 }
0x13dc   :  { %2635 = vmatprep.mubr.f32.mxu1 %v8106_v33  ;;  %5375 = vmatpush1.bf16.msra.mxu1 %v7051_v46 }
0x13dd   :  { %5377 = vmatprep.subr.bf16.mxu1 %v7054_v16 }
0x13e0   :  { %5379 = vmatpush1.bf16.msra.mxu1 %v7057_v23 }
0x13e1   :  { %5381 = vmatprep.subr.bf16.mxu1 %v7060_v45 }
0x13e3   :  { %v5958_v37 = vpop.eup %5957 }
0x13e4   :  { %v7575_v31 = vmul.f32 %v5958_v37, %v2541_v0  ;;  %5383 = vmatpush1.bf16.msra.mxu1 %v7063_v49  ;;  %v2552_v37 = vsel %vm452_vm3, %v7565_v1, 0.0  ;;  %v3015_v0 = vmul.f32 %v7294_v14, %v1144_v61 }
0x13e5   :  { %5385 = vmatprep.subr.bf16.mxu1 %v7069_v50 }
0x13e6   :  { %4371 = vmatmul.mubr.msk.f32.gmra.mrb[34].mxu1 %vm452_vm3, %v7575_v31 }
0x13e7   :  { %2892 = vmatprep.mubr.f32.mxu1 %v8106_v33 }
0x13e8   :  { %5387 = vmatpush1.bf16.msra.mxu1 %v7071_v8 }
0x13e9   :  { %5389 = vmatprep.subr.bf16.mxu1 %v7075_v59 }
0x13ec   :  { %5391 = vmatpush1.bf16.msra.mxu1 %v7077_v11 }
0x13ed   :  { %5393 = vmatprep.subr.bf16.mxu1 %v7081_v55 }
0x13f0   :  { %5395 = vmatpush1.bf16.msra.mxu1 %v7083_v32 }
0x13f1   :  { %5397 = vmatprep.subr.bf16.mxu1 %v7089_v30 }
0x13f4   :  { %5399 = vmatpush1.bf16.msra.mxu1 %v7093_v52 }
0x13f5   :  { %5401 = vmatprep.subr.bf16.mxu1 %v7099_v15 }
0x13f8   :  { %5403 = vmatpush1.bf16.msra.mxu1 %v7103_v51 }
0x14ae   :  { %v2632_v46 = vpop.f32.mrb[32].mxu1 }
0x14af   :  { %v2642_v16 = vadd.f32 %v2632_v46, %v7222_v38  ;;  %v2634_v23 = vpop.f32.mrb[33].mxu1  ;;  %v2981_v46 = vmul.f32 %v7296_v42, %v2964_v44 }
0x14b1   :  { %v4290_v45 = vmul.f32 -1.442695, %v2642_v16  ;;  %v3031_v1 = vadd.f32 %v3015_v0, %v2981_v46 }
0x14b3   :  { %5959 = vpow2.f32 %v4290_v45 }
0x14b4   :  { %5961 = vtanh.f32 %v2642_v16  ;;  %v2983_v16 = vmul.f32 %v7296_v42, %v2966_v40 }
0x14b9   :  { %v2637_v49 = vpop.f32.mrb[34].mxu1 }
0x14ba   :  { %v2638_v50 = vpop.f32.mrb[35].mxu1  ;;  %v3065_v49 = vmul.f32 %v7313_v4, %v2552_v37 }
0x14bb   :  { %v2644_v8 = vadd.f32 %v2638_v50, %v7212_v58 }
0x14bd   :  { %v5960_v59 = vpop.eup %5959  ;;  %v4291_v11 = vmul.f32 -1.442695, %v2644_v8 }
0x14be   :  { %v2653_v55 = vadd.f32 1.0, %v5960_v59  ;;  %v5962_v32 = vpop.eup %5961 }
0x14bf   :  { %5963 = vpow2.f32 %v4291_v11  ;;  %v7642_v11 = vadd.f32 %v3065_v49, %v3031_v1 }
0x14c0   :  { %5965 = vrcp.f32 %v2653_v55 }
0x14c1   :  { %5967 = vtanh.f32 %v2644_v8  ;;  %v3033_v8 = vadd.f32 %v3017_v24, %v2983_v16 }
0x14c9   :  { %v5964_v30 = vpop.eup %5963 }
0x14ca   :  { %v5966_v52 = vpop.eup %5965  ;;  %v2654_v15 = vadd.f32 1.0, %v5964_v30  ;;  %v1276_v30 = vsel %vm452_vm3, %v7010_v10, 0.0 }
0x14cb   :  { %v2659_v51 = vsel %vm6735_vm2, %v5962_v32, %v5966_v52  ;;  %v5968_v58 = vpop.eup %5967  ;;  %v1145_v32 = vsel %vm452_vm3, %v6969_v13, 0.0  ;;  %v2963_v52 = vld [vmem:[%s8081_s1 + $0x38] sm:$0xff]  ;;  %v3012_v10 = vmul.f32 %v7294_v14, %v1276_v30 }
0x14cc   :  { %5969 = vrcp.f32 %v2654_v15  ;;  %2665 = vrot.lane.b32.xlu1 %v2659_v51, %s6215_s0  ;;  %2661 = vrot.lane.b32.xlu0 %v2659_v51, %s6214_s4  ;;  %v2961_v15 = vld [vmem:[%s8081_s1 + $0x28] sm:$0xff] }
0x14d6   :  { %v5970_v38 = vpop.eup %5969 }
0x14d7   :  { %v2660_v54 = vsel %vm6735_vm2, %v5968_v58, %v5970_v38  ;;  %v2553_v58 = vsel %vm452_vm3, %v7575_v31, 0.0  ;;  %v3014_v38 = vmul.f32 %v7294_v14, %v1145_v32 }
0x14d8   :  { %2667 = vrot.lane.b32.xlu1 %v2660_v54, %s6215_s0  ;;  %2663 = vrot.lane.b32.xlu0 %v2660_v54, %s6214_s4 }
0x14dc   :  { %2671 = vrot.lane.b32.xlu1 %v2660_v54, %s6216_s26  ;;  %2669 = vrot.lane.b32.xlu0 %v2659_v51, %s6216_s26 }
0x153e   :  { %v2666_v22 = vpop.permute.xlu1 %2665  ;;  %v2662_v27 = vpop.permute.xlu0 %2661 }
0x153f   :  { %v2675_v25 = vmul.f32 %v2666_v22, %v2659_v51  ;;  %v2673_v48 = vmul.f32 %v2662_v27, %v2554_v39  ;;  %v2978_v22 = vmul.f32 %v7296_v42, %v2961_v15 }
0x1541   :  { %v7607_v35 = vadd.f32 %v2675_v25, %v2673_v48  ;;  %v3064_v25 = vmul.f32 %v7313_v4, %v2553_v58 }
0x1543   :  { %5971 = vtanh.f32 %v7607_v35  ;;  %v2685_v32 = vsel %vm452_vm3, %v7607_v35, 0.0 }
0x154a   :  { %v2668_v34 = vpop.permute.xlu1 %2667  ;;  %v2664_v6 = vpop.permute.xlu0 %2663 }
0x154b   :  { %v2676_v3 = vmul.f32 %v2668_v34, %v2660_v54  ;;  %v2674_v29 = vmul.f32 %v2664_v6, %v2555_v19  ;;  %v2980_v54 = vmul.f32 %v7296_v42, %v2963_v52  ;;  %v3028_v34 = vadd.f32 %v3012_v10, %v2978_v22 }
0x154d   :  { %v5972_v63 = vpop.eup %5971  ;;  %v7628_v9 = vadd.f32 %v2676_v3, %v2674_v29  ;;  %v3030_v31 = vadd.f32 %v3014_v38, %v2980_v54 }
0x154e   :  { %v2670_v23 = vpop.permute.xlu0 %2669  ;;  %v2672_v39 = vpop.permute.xlu1 %2671 }
0x154f   :  { %5973 = vtanh.f32 %v7628_v9  ;;  %v2681_v45 = vmul.f32 %v5972_v63, %v2670_v23  ;;  %v7673_v6 = vadd.f32 %v3064_v25, %v3030_v31  ;;  %v2686_v38 = vsel %vm452_vm3, %v7628_v9, 0.0 }
0x1551   :  { %v2683_v50 = vsel %vm452_vm3, %v2681_v45, 0.0  ;;  %4372 = vmatmul.mubr.msk.f32.vlgmr.msra.gmra.mrb[52].mxu0 %vm452_vm3, %v2681_v45 }
0x1552   :  { %v3067_v59 = vmul.f32 %v7313_v4, %v2683_v50  ;;  %2766 = vmatprep.mubr.f32.mxu0 %v8106_v33 }
0x1554   :  { %v7644_v55 = vadd.f32 %v3067_v59, %v3033_v8 }
0x1556   :  { %v3093_v51 = vpack.c.bf16 %v7644_v55, %v7642_v11 }
0x1559   :  { %v5974_v13 = vpop.eup %5973 }
0x155a   :  { %v2682_v27 = vmul.f32 %v5974_v13, %v2672_v39 }
0x155c   :  { %v2684_v48 = vsel %vm452_vm3, %v2682_v27, 0.0  ;;  %4373 = vmatmul.mubr.msk.f32.gmra.mrb[54].mxu0 %vm452_vm3, %v2682_v27 }
0x155d   :  { %v3062_v19 = vmul.f32 %v7313_v4, %v2684_v48 }
0x155f   :  { %v7675_v61 = vadd.f32 %v3062_v19, %v3028_v34  ;;  %v5735_v34 = vld [vmem:[#allocation13 + $0x40] sm:$0xff]  }
0x1560   :  { %v5736_v19 = vld [vmem:[#allocation13] sm:$0xff]   ;;  %4384 = vmatprep.subr.bf16.mxu0 %v5735_v34 }
0x1561   :  { %v3092_v17 = vpack.c.bf16 %v7673_v6, %v7675_v61  ;;  %4385 = vmatpush3.bf16.msra.mxu0 %v5736_v19  ;;  %v5745_v19 = vld [vmem:[#allocation13 + $0x68] sm:$0xff]  }
0x1624   :  { %v2763_v44 = vpop.f32.mrb[52].mxu0 }
0x1625   :  { %v2773_v3 = vadd.f32 %v2763_v44, %v7226_v56  ;;  %v2765_v29 = vpop.f32.mrb[53].mxu0  ;;  %v5737_v44 = vld [vmem:[#allocation13 + $0x48] sm:$0xff]  }
0x1626   :  { %v3313_v29 = vld [vmem:[#allocation14] sm:$0xff]  ;;  %4386 = vmatprep.subr.bf16.mxu0 %v5737_v44 }
0x1627   :  { %v4292_v40 = vmul.f32 -1.442695, %v2773_v3  ;;  %v3321_v44 = vld [vmem:[#allocation14 + $0x40] sm:$0xff] }
0x1629   :  { %5975 = vpow2.f32 %v4292_v40  ;;  %v3314_v40 = vld [vmem:[#allocation14 + $0x8] sm:$0xff] }
0x162a   :  { %5977 = vtanh.f32 %v2773_v3  ;;  %v6217_v3 = vmov 0.0|0.0  }
0x162b   :  { %5404 = vmatprep.subr.bf16.mxu1 %v6217_v3 }
0x162f   :  { %v2768_v63 = vpop.f32.mrb[54].mxu0 }
0x1630   :  { %v2769_v37 = vpop.f32.mrb[55].mxu0  ;;  %v7715_v63 = vpack.c.bf16 %v3314_v40, %v3313_v29  ;;  %v3322_v29 = vld [vmem:[#allocation14 + $0x48] sm:$0xff] }
0x1631   :  { %v2775_v0 = vadd.f32 %v2769_v37, %v7208_v47  ;;  %v5738_v37 = vld [vmem:[#allocation13 + $0x8] sm:$0xff]  }
0x1632   :  { %4387 = vmatpush3.bf16.msra.mxu0 %v5738_v37  ;;  %v5746_v37 = vld [vmem:[#allocation13 + $0x28] sm:$0xff]  }
0x1633   :  { %v5976_v24 = vpop.eup %5975  ;;  %v4293_v46 = vmul.f32 -1.442695, %v2775_v0 }
0x1634   :  { %v2784_v16 = vadd.f32 1.0, %v5976_v24  ;;  %v5978_v23 = vpop.eup %5977 }
0x1635   :  { %5979 = vpow2.f32 %v4293_v46 }
0x1636   :  { %5981 = vrcp.f32 %v2784_v16 }
0x1637   :  { %5983 = vtanh.f32 %v2775_v0 }
0x163f   :  { %v5980_v45 = vpop.eup %5979 }
0x1640   :  { %v5982_v49 = vpop.eup %5981  ;;  %v2785_v50 = vadd.f32 1.0, %v5980_v45 }
0x1641   :  { %v2790_v56 = vsel %vm6735_vm2, %v5978_v23, %v5982_v49  ;;  %v5984_v47 = vpop.eup %5983 }
0x1642   :  { %5985 = vrcp.f32 %v2785_v50  ;;  %2796 = vrot.lane.b32.xlu1 %v2790_v56, %s6215_s0  ;;  %2792 = vrot.lane.b32.xlu0 %v2790_v56, %s6214_s4 }
0x164c   :  { %v5986_v1 = vpop.eup %5985 }
0x164d   :  { %v2791_v8 = vsel %vm6735_vm2, %v5984_v47, %v5986_v1 }
0x164e   :  { %2798 = vrot.lane.b32.xlu1 %v2791_v8, %s6215_s0  ;;  %2794 = vrot.lane.b32.xlu0 %v2791_v8, %s6214_s4 }
0x1652   :  { %2802 = vrot.lane.b32.xlu1 %v2791_v8, %s6216_s26  ;;  %2800 = vrot.lane.b32.xlu0 %v2790_v56, %s6216_s26 }
0x16b4   :  { %v2797_v59 = vpop.permute.xlu1 %2796  ;;  %v2793_v30 = vpop.permute.xlu0 %2792 }
0x16b5   :  { %v2806_v52 = vmul.f32 %v2797_v59, %v2790_v56  ;;  %v2804_v15 = vmul.f32 %v2793_v30, %v2685_v32  ;;  %v5739_v59 = vld [vmem:[#allocation13 + $0x50] sm:$0xff]   ;;  %v3316_v30 = vld [vmem:[#allocation14 + $0x18] sm:$0xff] }
0x16b6   :  { %v3315_v32 = vld [vmem:[#allocation14 + $0x10] sm:$0xff]  ;;  %4388 = vmatprep.subr.bf16.mxu0 %v5739_v59  ;;  %v5750_v59 = vld [vmem:[#allocation13 + $0x38] sm:$0xff]  }
0x16b7   :  { %v7694_v58 = vadd.f32 %v2806_v52, %v2804_v15  ;;  %v5740_v52 = vld [vmem:[#allocation13 + $0x10] sm:$0xff]   ;;  %v7721_v15 = vpack.c.bf16 %v3316_v30, %v3315_v32  ;;  %v3328_v30 = vld [vmem:[#allocation14 + $0x78] sm:$0xff] }
0x16b8   :  { %4389 = vmatpush3.bf16.msra.mxu0 %v5740_v52  ;;  %v3327_v32 = vld [vmem:[#allocation14 + $0x70] sm:$0xff] }
0x16b9   :  { %5987 = vtanh.f32 %v7694_v58  ;;  %v7760_v52 = vpack.c.bf16 %v3328_v30, %v3327_v32  ;;  %v8108_v30 = vld [vmem:[#allocation21_spill] sm:$0xff] }
0x16c0   :  { %v2799_v13 = vpop.permute.xlu1 %2798  ;;  %v2795_v10 = vpop.permute.xlu0 %2794 }
0x16c1   :  { %v2807_v54 = vmul.f32 %v2799_v13, %v2791_v8  ;;  %v2805_v22 = vmul.f32 %v2795_v10, %v2686_v38  ;;  %v3318_v13 = vld [vmem:[#allocation14 + $0x28] sm:$0xff]  ;;  %v5742_v38 = vld [vmem:[#allocation13 + $0x18] sm:$0xff]  }
0x16c3   :  { %v5988_v39 = vpop.eup %5987  ;;  %v7700_v27 = vadd.f32 %v2807_v54, %v2805_v22  ;;  %v5743_v54 = vld [vmem:[#allocation13 + $0x60] sm:$0xff]   ;;  %v3319_v22 = vld [vmem:[#allocation14 + $0x30] sm:$0xff] }
0x16c4   :  { %v2801_v25 = vpop.permute.xlu0 %2800  ;;  %v2803_v31 = vpop.permute.xlu1 %2802 }
0x16c5   :  { %5989 = vtanh.f32 %v7700_v27  ;;  %v7703_v35 = vmul.f32 %v5988_v39, %v2801_v25  ;;  %v3320_v39 = vld [vmem:[#allocation14 + $0x38] sm:$0xff]  ;;  %v5744_v25 = vld [vmem:[#allocation13 + $0x20] sm:$0xff]  }
0x16c7   :  { %4374 = vmatmul.mubr.msk.f32.vlgmr.msra.gmra.mrb[36].mxu1 %vm452_vm3, %v7703_v35 }
0x16c8   :  { %2897 = vmatprep.mubr.f32.mxu1 %v8106_v33  ;;  %5406 = vmatpush3.bf16.msra.mxu1 %v7715_v63 }
0x16c9   :  { %5407 = vmatprep.subr.bf16.mxu1 %v6217_v3 }
0x16cc   :  { %5409 = vmatpush3.bf16.msra.mxu1 %v7721_v15 }
0x16cd   :  { %5410 = vmatprep.subr.bf16.mxu1 %v6217_v3 }
0x16cf   :  { %v5990_v48 = vpop.eup %5989 }
0x16d0   :  { %v7709_v9 = vmul.f32 %v5990_v48, %v2803_v31  ;;  %v7729_v48 = vpack.c.bf16 %v3320_v39, %v3319_v22 }
0x16d2   :  { %4375 = vmatmul.mubr.msk.f32.gmra.mrb[38].mxu1 %vm452_vm3, %v7709_v9 }
0x16d3   :  { %4609 = vmatprep.mubr.msk.f32.mxu1 %vm6218_vm5, %v8106_v33 }
0x179a   :  { %v2894_v0 = vpop.f32.mrb[36].mxu1 }
0x179b   :  { %v2904_v24 = vadd.f32 %v2894_v0, %v7230_v60  ;;  %v2896_v46 = vpop.f32.mrb[37].mxu1  ;;  %v3317_v60 = vld [vmem:[#allocation14 + $0x20] sm:$0xff]  ;;  %v7737_v0 = vpack.c.bf16 %v3322_v29, %v3321_v44 }
0x179c   :  { %v7725_v10 = vpack.c.bf16 %v3318_v13, %v3317_v60  ;;  %v2817_v60 = vsel %vm452_vm3, %v7700_v27, 0.0  ;;  %v1407_v27 = vsel %vm452_vm3, %v7043_v28, 0.0 }
0x179d   :  { %v4294_v16 = vmul.f32 -1.442695, %v2904_v24  ;;  %v3010_v28 = vmul.f32 %v7294_v14, %v1407_v27 }
0x179e   :  { %5412 = vmatpush3.bf16.msra.mxu1 %v7725_v10 }
0x179f   :  { %5991 = vpow2.f32 %v4294_v16  ;;  %5413 = vmatprep.subr.bf16.mxu1 %v6217_v3  ;;  %v5747_v16 = vld [vmem:[#allocation13 + $0x70] sm:$0xff]  }
0x17a2   :  { %5415 = vmatpush3.bf16.msra.mxu1 %v7729_v48 }
0x17a3   :  { %5416 = vmatprep.subr.bf16.mxu1 %v6217_v3 }
0x17a5   :  { %v2899_v23 = vpop.f32.mrb[38].mxu1 }
0x17a6   :  { %v2900_v45 = vpop.f32.mrb[39].mxu1  ;;  %5418 = vmatpush3.bf16.msra.mxu1 %v7737_v0  ;;  %v3323_v23 = vld [vmem:[#allocation14 + $0x50] sm:$0xff] }
0x17a7   :  { %v2906_v49 = vadd.f32 %v2900_v45, %v7204_v12  ;;  %v5741_v12 = vld [vmem:[#allocation13 + $0x58] sm:$0xff]   ;;  %5419 = vmatprep.subr.bf16.mxu1 %v6217_v3 }
0x17a8   :  { %4390 = vmatprep.subr.bf16.mxu0 %v5741_v12  ;;  %v3324_v45 = vld [vmem:[#allocation14 + $0x58] sm:$0xff] }
0x17a9   :  { %v4295_v50 = vmul.f32 -1.442695, %v2906_v49  ;;  %v5992_v56 = vpop.eup %5991  ;;  %4391 = vmatpush3.bf16.msra.mxu0 %v5742_v38 }
0x17aa   :  { %v2915_v1 = vadd.f32 1.0, %v5992_v56  ;;  %4392 = vmatprep.subr.bf16.mxu0 %v5743_v54  ;;  %v7747_v56 = vpack.c.bf16 %v3324_v45, %v3323_v23 }
0x17ab   :  { %5993 = vpow2.f32 %v4295_v50  ;;  %v5748_v50 = vld [vmem:[#allocation13 + $0x30] sm:$0xff]  }
0x17ac   :  { %5995 = vtanh.f32 %v2906_v49  ;;  %5421 = vmatpush3.bf16.msra.mxu1 %v7747_v56 }
0x17ad   :  { %4393 = vmatpush3.bf16.msra.mxu0 %v5744_v25  ;;  %5422 = vmatprep.subr.bf16.mxu1 %v6217_v3 }
0x17ae   :  { %4394 = vmatprep.subr.bf16.mxu0 %v5745_v19 }
0x17b1   :  { %4395 = vmatpush3.bf16.msra.mxu0 %v5746_v37  ;;  %v8107_v37 = vld [vmem:[#allocation22_spill] sm:$0xff] }
0x17b2   :  { %4396 = vmatprep.subr.bf16.mxu0 %v5747_v16 }
0x17b5   :  { %v5994_v47 = vpop.eup %5993  ;;  %4397 = vmatpush3.bf16.msra.mxu0 %v5748_v50 }
0x17b6   :  { %v2916_v8 = vadd.f32 1.0, %v5994_v47  ;;  %v5996_v31 = vpop.eup %5995  ;;  %v5749_v47 = vld [vmem:[#allocation13 + $0x78] sm:$0xff]  }
0x17b7   :  { %4398 = vmatprep.subr.bf16.mxu0 %v5749_v47 }
0x17b8   :  { %5997 = vrcp.f32 %v2916_v8  ;;  %v3326_v8 = vld [vmem:[#allocation14 + $0x68] sm:$0xff] }
0x17b9   :  { %5999 = vrcp.f32 %v2915_v1  ;;  %v3325_v1 = vld [vmem:[#allocation14 + $0x60] sm:$0xff]  ;;  %4399 = vmatpush3.bf16.msra.mxu0 %v5750_v59 }
0x17ba   :  { %6001 = vtanh.f32 %v2904_v24  ;;  %v7754_v53 = vpack.c.bf16 %v3326_v8, %v3325_v1  ;;  %5428 = vmatprep.subr.bf16.mxu0 %v6217_v3 }
0x17bc   :  { %5424 = vmatpush3.bf16.msra.mxu1 %v7754_v53 }
0x17bd   :  { %5425 = vmatprep.subr.bf16.mxu1 %v6217_v3 }
0x17c0   :  { %5427 = vmatpush3.bf16.msra.mxu1 %v7760_v52 }
0x17c1   :  { %5452 = vmatprep.subr.bf16.mxu1 %v6217_v3 }
0x17c2   :  { %v5998_v34 = vpop.eup %5997 }
0x17c3   :  { %v7735_v40 = vsel %vm6735_vm2, %v5996_v31, %v5998_v34  ;;  %v6000_v24 = vpop.eup %5999  ;;  %4610 = vmatmul.mubr.f32.vlgmr.msra.gmra.mrb[40].mxu1 %v8106_v33  ;;  %v2816_v31 = vsel %vm452_vm3, %v7694_v58, 0.0  ;;  %v2959_v58 = vld [vmem:[%s8081_s1 + $0x18] sm:$0xff] }
0x17c4   :  { %2929 = vrot.lane.b32.xlu1 %v7735_v40, %s6215_s0  ;;  %2925 = vrot.lane.b32.xlu0 %v7735_v40, %s6214_s4  ;;  %v6002_v46 = vpop.eup %6001 }
0x17c5   :  { %v2921_v49 = vsel %vm6735_vm2, %v6002_v46, %v6000_v24  ;;  %5454 = vmatpush3.bf16.msra.mxu1 %v7715_v63  ;;  %4679 = vmatprep.mubr.msk.f32.mxu1 %vm6218_vm5, %v8106_v33  ;;  %v1538_v24 = vsel %vm452_vm3, %v8107_v37, 0.0  ;;  %v2815_v46 = vsel %vm452_vm3, %v7709_v9, 0.0  ;;  %v2968_v9 = vld [vmem:[%s8081_s1 + $0x60] sm:$0xff] }
0x17c6   :  { %5455 = vmatprep.subr.bf16.mxu1 %v6217_v3  ;;  %v3008_v45 = vmul.f32 %v7294_v14, %v1538_v24  ;;  %v3060_v47 = vmul.f32 %v7313_v4, %v2815_v46 }
0x17c8   :  { %2923 = vrot.lane.b32.xlu1 %v2921_v49, %s6214_s4  ;;  %2933 = vrot.lane.b32.xlu0 %v7735_v40, %s6216_s26 }
0x17c9   :  { %5457 = vmatpush3.bf16.msra.mxu1 %v7721_v15 }
0x17ca   :  { %5458 = vmatprep.subr.bf16.mxu1 %v6217_v3 }
0x17cc   :  { %2931 = vrot.lane.b32.xlu1 %v2921_v49, %s6216_s26  ;;  %2927 = vrot.lane.b32.xlu0 %v2921_v49, %s6215_s0 }
0x17cd   :  { %5460 = vmatpush3.bf16.msra.mxu1 %v7725_v10 }
0x17ce   :  { %5461 = vmatprep.subr.bf16.mxu1 %v6217_v3 }
0x17d1   :  { %5463 = vmatpush3.bf16.msra.mxu1 %v7729_v48 }
0x17d2   :  { %5464 = vmatprep.subr.bf16.mxu1 %v6217_v3 }
0x17d5   :  { %5466 = vmatpush3.bf16.msra.mxu1 %v7737_v0 }
0x17d6   :  { %5467 = vmatprep.subr.bf16.mxu1 %v6217_v3 }
0x17d9   :  { %5469 = vmatpush3.bf16.msra.mxu1 %v7747_v56 }
0x17da   :  { %5470 = vmatprep.subr.bf16.mxu1 %v6217_v3 }
0x17dd   :  { %5472 = vmatpush3.bf16.msra.mxu1 %v7754_v53 }
0x17de   :  { %5473 = vmatprep.subr.bf16.mxu1 %v6217_v3 }
0x17e1   :  { %5475 = vmatpush3.bf16.msra.mxu1 %v7760_v52 }
0x17e2   :  { %5500 = vmatprep.subr.bf16.mxu1 %v6217_v3 }
0x1836   :  { %v2930_v12 = vpop.permute.xlu1 %2929  ;;  %v2926_v13 = vpop.permute.xlu0 %2925 }
0x1837   :  { %v2938_v38 = vmul.f32 %v2930_v12, %v7735_v40  ;;  %v2936_v54 = vmul.f32 %v2926_v13, %v2817_v60  ;;  %v2957_v40 = vld [vmem:[%s8081_s1 + $0x8] sm:$0xff]  ;;  %v1406_v12 = vsel %vm452_vm3, %v8108_v30, 0.0  ;;  %v8109_v60 = vld [vmem:[#allocation23_spill] sm:$0xff] }
0x1838   :  { %v2974_v23 = vmul.f32 %v7296_v42, %v2957_v40  ;;  %v1537_v13 = vsel %vm452_vm3, %v8109_v60, 0.0 }
0x1839   :  { %v2940_v22 = vadd.f32 %v2938_v38, %v2936_v54  ;;  %v2970_v38 = vld [vmem:[%s8081_s1 + $0x70] sm:$0xff]  ;;  %v3021_v27 = vmul.f32 %v7294_v14, %v1537_v13 }
0x183a   :  { %v2934_v39 = vpop.permute.xlu0 %2933  ;;  %v2924_v25 = vpop.permute.xlu1 %2923  ;;  %v3024_v8 = vadd.f32 %v3008_v45, %v2974_v23 }
0x183b   :  { %6003 = vtanh.f32 %v2940_v22  ;;  %v2935_v19 = vmul.f32 %v2924_v25, %v2816_v31  ;;  %v2814_v25 = vsel %vm452_vm3, %v7703_v35, 0.0 }
0x183c   :  { %v3069_v37 = vmul.f32 %v7313_v4, %v2814_v25 }
0x183e   :  { %v2928_v34 = vpop.permute.xlu0 %2927 }
0x183f   :  { %v2937_v44 = vmul.f32 %v2928_v34, %v2921_v49  ;;  %v2976_v49 = vmul.f32 %v7296_v42, %v2959_v58  ;;  %v3019_v34 = vmul.f32 %v7294_v14, %v1406_v12 }
0x1841   :  { %v2939_v29 = vadd.f32 %v2937_v44, %v2935_v19  ;;  %v3026_v59 = vadd.f32 %v3010_v28, %v2976_v49  ;;  %v2932_v19 = vpop.permute.xlu1 %2931 }
0x1843   :  { %6005 = vtanh.f32 %v2939_v29  ;;  %v3076_v54 = vadd.f32 %v3060_v47, %v3026_v59  ;;  %v2987_v29 = vmul.f32 %v7296_v42, %v2970_v38 }
0x1845   :  { %v6004_v16 = vpop.eup %6003  ;;  %v3037_v58 = vadd.f32 %v3021_v27, %v2987_v29 }
0x1846   :  { %v2944_v50 = vmul.f32 %v6004_v16, %v2934_v39  ;;  %v2985_v39 = vmul.f32 %v7296_v42, %v2968_v9 }
0x1848   :  { %v2946_v1 = vsel %vm452_vm3, %v2944_v50, 0.0  ;;  %v3035_v24 = vadd.f32 %v3019_v34, %v2985_v39 }
0x1849   :  { %v3058_v32 = vmul.f32 %v7313_v4, %v2946_v1 }
0x184a   :  { %v3085_v14 = vadd.f32 %v3069_v37, %v3035_v24 }
0x184b   :  { %v3074_v22 = vadd.f32 %v3058_v32, %v3024_v8 }
0x184d   :  { %v6006_v31 = vpop.eup %6005  ;;  %v3090_v44 = vpack.c.bf16 %v3076_v54, %v3074_v22 }
0x184e   :  { %v2943_v40 = vmul.f32 %v6006_v31, %v2932_v19 }
0x184f   :  { %3264 = vmatprep.mubr.bf16.mxu0 %v3090_v44 }
0x1850   :  { %3265 = vmatmul.mubr.bf16.vlgmr.msra.gmra.mrb[56].mxu0 %v3089_v20  ;;  %v2945_v35 = vsel %vm452_vm3, %v2943_v40, 0.0 }
0x1851   :  { %3272 = vmatprep.mubr.bf16.mxu0 %v3092_v17  ;;  %v3071_v42 = vmul.f32 %v7313_v4, %v2945_v35  ;;  %5430 = vmatpush3.bf16.msra.mxu0 %v7715_v63  ;;  %v8110_v4 = vpack.c.bf16 %v7371_v5, %v7373_v57  ;;  %v4298_v57 = vld [vmem:[%s8090_s10] ss:$0 sm:$0xff]  ;;  %s6219_s10 = smov 32  }
0x1852   :  { %5431 = vmatprep.subr.bf16.mxu0 %v6217_v3 }
0x1853   :  { %v3087_v46 = vadd.f32 %v3071_v42, %v3037_v58 }
0x1855   :  { %v3095_v16 = vpack.c.bf16 %v3087_v46, %v3085_v14  ;;  %5433 = vmatpush3.bf16.msra.mxu0 %v7721_v15 }
0x1856   :  { %5434 = vmatprep.subr.bf16.mxu0 %v6217_v3 }
0x1858   :  { %3273 = vmatmul.mubr.bf16.gmra.mrb[60].mxu0 %v3091_v7 }
0x1859   :  { %3280 = vmatprep.mubr.bf16.mxu0 %v3094_v41  ;;  %5436 = vmatpush3.bf16.msra.mxu0 %v7725_v10 }
0x185a   :  { %5437 = vmatprep.subr.bf16.mxu0 %v6217_v3 }
0x185d   :  { %5439 = vmatpush3.bf16.msra.mxu0 %v7729_v48 }
0x185e   :  { %5440 = vmatprep.subr.bf16.mxu0 %v6217_v3 }
0x1860   :  { %3281 = vmatmul.mubr.bf16.gmra.mrb[64].mxu0 %v3093_v51 }
0x1861   :  { %3288 = vmatprep.mubr.bf16.mxu0 %v8110_v4  ;;  %5442 = vmatpush3.bf16.msra.mxu0 %v7737_v0 }
0x1862   :  { %5443 = vmatprep.subr.bf16.mxu0 %v6217_v3 }
0x1865   :  { %5445 = vmatpush3.bf16.msra.mxu0 %v7747_v56 }
0x1866   :  { %5446 = vmatprep.subr.bf16.mxu0 %v6217_v3 }
0x1868   :  { %3289 = vmatmul.mubr.bf16.gmra.mrb[68].mxu0 %v3095_v16 }
0x1869   :  { %5448 = vmatpush3.bf16.msra.mxu0 %v7754_v53  ;;  %4644 = vmatprep.mubr.msk.f32.mxu0 %vm6218_vm5, %v8106_v33 }
0x186a   :  { %5449 = vmatprep.subr.bf16.mxu0 %v6217_v3 }
0x186d   :  { %5451 = vmatpush3.bf16.msra.mxu0 %v7760_v52 }
0x186e   :  { %5476 = vmatprep.subr.bf16.mxu0 %v6217_v3 }
0x1896   :  { %v3398_v62 = vpop.f32.mrb[40].mxu1 }
0x1897   :  { %v4611_v18 = vpop.f32.mrb[41].mxu1 }
0x1923   :  { %v4400_v20 = vpop.f32.mrb[56].mxu0 }
0x1924   :  { %v4401_v5 = vpop.f32.mrb[57].mxu0 }
0x1925   :  { %v4402_v36 = vadd.f32 %v4401_v5, %v4400_v20  ;;  %v4403_v2 = vpop.f32.mrb[58].mxu0 }
0x1926   :  { %v4404_v7 = vpop.f32.mrb[59].mxu0 }
0x1927   :  { %v4405_v26 = vadd.f32 %v4404_v7, %v4403_v2  ;;  %v3267_v21 = vadd.f32 %v4402_v36, %v4298_v57 }
0x1929   :  { %v3399_v41 = vadd.f32 %v3398_v62, %v3267_v21  ;;  %v7878_v11 = vadd.f32 %v4405_v26, %v4298_v57 }
0x192b   :  { %v4315_v55 = vmul.f32 -1.442695, %v3399_v41  ;;  %v4406_v51 = vpop.f32.mrb[60].mxu0 }
0x192c   :  { %v4407_v6 = vpop.f32.mrb[61].mxu0 }
0x192d   :  { %6007 = vpow2.f32 %v4315_v55  ;;  %v4408_v61 = vadd.f32 %v4407_v6, %v4406_v51  ;;  %v4409_v17 = vpop.f32.mrb[62].mxu0 }
0x192e   :  { %v4410_v28 = vpop.f32.mrb[63].mxu0  ;;  %6009 = vtanh.f32 %v3399_v41 }
0x192f   :  { %v4411_v23 = vadd.f32 %v4410_v28, %v4409_v17  ;;  %v7880_v45 = vadd.f32 %v4408_v61, %v4298_v57 }
0x1931   :  { %v7882_v49 = vadd.f32 %v4411_v23, %v4298_v57 }
0x1933   :  { %v4412_v50 = vpop.f32.mrb[64].mxu0 }
0x1934   :  { %v4413_v47 = vpop.f32.mrb[65].mxu0 }
0x1935   :  { %v4414_v1 = vadd.f32 %v4413_v47, %v4412_v50  ;;  %v4415_v8 = vpop.f32.mrb[66].mxu0 }
0x1936   :  { %v4416_v59 = vpop.f32.mrb[67].mxu0 }
0x1937   :  { %v6008_v9 = vpop.eup %6007  ;;  %v4417_v32 = vadd.f32 %v4416_v59, %v4415_v8  ;;  %v7884_v30 = vadd.f32 %v4414_v1, %v4298_v57 }
0x1938   :  { %v3406_v12 = vadd.f32 1.0, %v6008_v9  ;;  %v6010_v44 = vpop.eup %6009 }
0x1939   :  { %v7886_v60 = vadd.f32 %v4417_v32, %v4298_v57 }
0x193a   :  { %6011 = vrcp.f32 %v3406_v12 }
0x193b   :  { %v4418_v13 = vpop.f32.mrb[68].mxu0 }
0x193c   :  { %v4419_v38 = vpop.f32.mrb[69].mxu0 }
0x193d   :  { %v4420_v54 = vadd.f32 %v4419_v38, %v4418_v13  ;;  %v4421_v22 = vpop.f32.mrb[70].mxu0 }
0x193e   :  { %v4422_v39 = vpop.f32.mrb[71].mxu0 }
0x193f   :  { %v4423_v25 = vadd.f32 %v4422_v39, %v4421_v22  ;;  %v7890_v31 = vadd.f32 %v4420_v54, %v4298_v57 }
0x1941   :  { %v7892_v34 = vadd.f32 %v4423_v25, %v4298_v57 }
0x1944   :  { %v6012_v29 = vpop.eup %6011 }
0x1945   :  { %v3409_v27 = vsel %vm7894_vm8, %v6010_v44, %v6012_v29 }
0x1946   :  { %3412 = vrot.lane.b32.xlu1 %v3409_v27, %s6210_s5  ;;  %3410 = vrot.lane.b32.xlu0 %v3409_v27, %s6215_s0 }
0x194a   :  { %3414 = vrot.lane.b32.xlu0 %v3409_v27, %s6219_s10 }
0x19b8   :  { %v3413_v40 = vpop.permute.xlu1 %3412  ;;  %v3411_v37 = vpop.permute.xlu0 %3410 }
0x19b9   :  { %v3417_v35 = vmul.f32 %v3413_v40, %v3409_v27  ;;  %v3416_v24 = vmul.f32 0.0, %v3411_v37 }
0x19bb   :  { %v3418_v58 = vadd.f32 %v3417_v35, %v3416_v24 }
0x19bc   :  { %v3415_v14 = vpop.permute.xlu0 %3414 }
0x19bd   :  { %6013 = vtanh.f32 %v3418_v58  ;;  %v3422_v26 = vsel %vm3312_vm9, %v3418_v58, 0.0 }
0x19c7   :  { %v6014_v42 = vpop.eup %6013 }
0x19c8   :  { %v3420_v46 = vmul.f32 %v6014_v42, %v3415_v14 }
0x19ca   :  { %4645 = vmatmul.mubr.msk.f32.vlgmr.msra.gmra.mrb[72].mxu0 %vm3312_vm9, %v3420_v46 }
0x19cb   :  { %5478 = vmatpush3.bf16.msra.mxu0 %v7715_v63  ;;  %4714 = vmatprep.mubr.msk.f32.mxu0 %vm6218_vm5, %v8106_v33 }
0x19cc   :  { %5479 = vmatprep.subr.bf16.mxu0 %v6217_v3 }
0x19cf   :  { %5481 = vmatpush3.bf16.msra.mxu0 %v7721_v15 }
0x19d0   :  { %5482 = vmatprep.subr.bf16.mxu0 %v6217_v3 }
0x19d3   :  { %5484 = vmatpush3.bf16.msra.mxu0 %v7725_v10 }
0x19d4   :  { %5485 = vmatprep.subr.bf16.mxu0 %v6217_v3 }
0x19d7   :  { %5487 = vmatpush3.bf16.msra.mxu0 %v7729_v48 }
0x19d8   :  { %5488 = vmatprep.subr.bf16.mxu0 %v6217_v3 }
0x19db   :  { %5490 = vmatpush3.bf16.msra.mxu0 %v7737_v0 }
0x19dc   :  { %5491 = vmatprep.subr.bf16.mxu0 %v6217_v3 }
0x19df   :  { %5493 = vmatpush3.bf16.msra.mxu0 %v7747_v56 }
0x19e0   :  { %5494 = vmatprep.subr.bf16.mxu0 %v6217_v3 }
0x19e3   :  { %5496 = vmatpush3.bf16.msra.mxu0 %v7754_v53 }
0x19e4   :  { %5497 = vmatprep.subr.bf16.mxu0 %v6217_v3 }
0x19e7   :  { %5499 = vmatpush3.bf16.msra.mxu0 %v7760_v52 }
0x19e8   :  { %5524 = vmatprep.subr.bf16.mxu0 %v6217_v3 }
0x1a9d   :  { %v3494_v16 = vpop.f32.mrb[72].mxu0 }
0x1a9e   :  { %v3495_v4 = vadd.f32 %v3494_v16, %v7878_v11  ;;  %v4646_v62 = vpop.f32.mrb[73].mxu0 }
0x1aa0   :  { %v4316_v18 = vmul.f32 -1.442695, %v3495_v4 }
0x1aa2   :  { %6015 = vpow2.f32 %v4316_v18 }
0x1aa3   :  { %6017 = vtanh.f32 %v3495_v4 }
0x1aac   :  { %v6016_v20 = vpop.eup %6015 }
0x1aad   :  { %v3502_v5 = vadd.f32 1.0, %v6016_v20  ;;  %v6018_v57 = vpop.eup %6017 }
0x1aaf   :  { %6019 = vrcp.f32 %v3502_v5 }
0x1ab9   :  { %v6020_v36 = vpop.eup %6019 }
0x1aba   :  { %v3505_v2 = vsel %vm7894_vm8, %v6018_v57, %v6020_v36 }
0x1abb   :  { %3508 = vrot.lane.b32.xlu0 %v3505_v2, %s6210_s5  ;;  %3506 = vrot.lane.b32.xlu1 %v3505_v2, %s6215_s0 }
0x1abf   :  { %3510 = vrot.lane.b32.xlu1 %v3505_v2, %s6219_s10 }
0x1b2d   :  { %v3509_v7 = vpop.permute.xlu0 %3508  ;;  %v3507_v21 = vpop.permute.xlu1 %3506 }
0x1b2e   :  { %v3513_v41 = vmul.f32 %v3509_v7, %v3505_v2  ;;  %v3512_v11 = vmul.f32 %v3507_v21, %v3422_v26 }
0x1b30   :  { %v3514_v55 = vadd.f32 %v3513_v41, %v3512_v11 }
0x1b31   :  { %v3511_v6 = vpop.permute.xlu1 %3510 }
0x1b32   :  { %6021 = vtanh.f32 %v3514_v55 }
0x1b3c   :  { %v6022_v51 = vpop.eup %6021 }
0x1b3d   :  { %v3516_v61 = vmul.f32 %v6022_v51, %v3511_v6 }
0x1b3f   :  { %4680 = vmatmul.mubr.msk.f32.vlgmr.msra.gmra.mrb[42].mxu1 %vm3312_vm9, %v3516_v61 }
0x1b40   :  { %5502 = vmatpush3.bf16.msra.mxu1 %v7715_v63  ;;  %4749 = vmatprep.mubr.msk.f32.mxu1 %vm6218_vm5, %v8106_v33 }
0x1b41   :  { %5503 = vmatprep.subr.bf16.mxu1 %v6217_v3 }
0x1b44   :  { %5505 = vmatpush3.bf16.msra.mxu1 %v7721_v15 }
0x1b45   :  { %5506 = vmatprep.subr.bf16.mxu1 %v6217_v3 }
0x1b48   :  { %5508 = vmatpush3.bf16.msra.mxu1 %v7725_v10 }
0x1b49   :  { %5509 = vmatprep.subr.bf16.mxu1 %v6217_v3 }
0x1b4c   :  { %5511 = vmatpush3.bf16.msra.mxu1 %v7729_v48 }
0x1b4d   :  { %5512 = vmatprep.subr.bf16.mxu1 %v6217_v3 }
0x1b50   :  { %5514 = vmatpush3.bf16.msra.mxu1 %v7737_v0 }
0x1b51   :  { %5515 = vmatprep.subr.bf16.mxu1 %v6217_v3 }
0x1b54   :  { %5517 = vmatpush3.bf16.msra.mxu1 %v7747_v56 }
0x1b55   :  { %5518 = vmatprep.subr.bf16.mxu1 %v6217_v3 }
0x1b58   :  { %5520 = vmatpush3.bf16.msra.mxu1 %v7754_v53 }
0x1b59   :  { %5521 = vmatprep.subr.bf16.mxu1 %v6217_v3 }
0x1b5c   :  { %5523 = vmatpush3.bf16.msra.mxu1 %v7760_v52 }
0x1b5d   :  { %5548 = vmatprep.subr.bf16.mxu1 %v6217_v3 }
0x1c12   :  { %v3590_v17 = vpop.f32.mrb[42].mxu1 }
0x1c13   :  { %v3591_v28 = vadd.f32 %v3590_v17, %v7880_v45  ;;  %v4681_v23 = vpop.f32.mrb[43].mxu1  ;;  %v3518_v45 = vsel %vm3312_vm9, %v3514_v55, 0.0 }
0x1c15   :  { %v4317_v50 = vmul.f32 -1.442695, %v3591_v28 }
0x1c17   :  { %6023 = vpow2.f32 %v4317_v50 }
0x1c18   :  { %6025 = vtanh.f32 %v3591_v28 }
0x1c21   :  { %v6024_v47 = vpop.eup %6023 }
0x1c22   :  { %v3598_v1 = vadd.f32 1.0, %v6024_v47  ;;  %v6026_v8 = vpop.eup %6025 }
0x1c24   :  { %6027 = vrcp.f32 %v3598_v1 }
0x1c2e   :  { %v6028_v59 = vpop.eup %6027 }
0x1c2f   :  { %v3601_v9 = vsel %vm7894_vm8, %v6026_v8, %v6028_v59 }
0x1c30   :  { %3604 = vrot.lane.b32.xlu1 %v3601_v9, %s6210_s5  ;;  %3602 = vrot.lane.b32.xlu0 %v3601_v9, %s6215_s0 }
0x1c34   :  { %3606 = vrot.lane.b32.xlu0 %v3601_v9, %s6219_s10 }
0x1ca2   :  { %v3605_v32 = vpop.permute.xlu1 %3604  ;;  %v3603_v12 = vpop.permute.xlu0 %3602 }
0x1ca3   :  { %v3609_v13 = vmul.f32 %v3605_v32, %v3601_v9  ;;  %v3608_v38 = vmul.f32 %v3603_v12, %v3518_v45 }
0x1ca5   :  { %v3610_v54 = vadd.f32 %v3609_v13, %v3608_v38 }
0x1ca6   :  { %v3607_v39 = vpop.permute.xlu0 %3606 }
0x1ca7   :  { %6029 = vtanh.f32 %v3610_v54 }
0x1cb1   :  { %v6030_v22 = vpop.eup %6029 }
0x1cb2   :  { %v3612_v25 = vmul.f32 %v6030_v22, %v3607_v39 }
0x1cb4   :  { %4715 = vmatmul.mubr.msk.f32.vlgmr.msra.gmra.mrb[74].mxu0 %vm3312_vm9, %v3612_v25 }
0x1cb5   :  { %5526 = vmatpush3.bf16.msra.mxu0 %v7715_v63  ;;  %4784 = vmatprep.mubr.msk.f32.mxu0 %vm6218_vm5, %v8106_v33 }
0x1cb6   :  { %5527 = vmatprep.subr.bf16.mxu0 %v6217_v3 }
0x1cb9   :  { %5529 = vmatpush3.bf16.msra.mxu0 %v7721_v15 }
0x1cba   :  { %5530 = vmatprep.subr.bf16.mxu0 %v6217_v3 }
0x1cbd   :  { %5532 = vmatpush3.bf16.msra.mxu0 %v7725_v10 }
0x1cbe   :  { %5533 = vmatprep.subr.bf16.mxu0 %v6217_v3 }
0x1cc1   :  { %5535 = vmatpush3.bf16.msra.mxu0 %v7729_v48 }
0x1cc2   :  { %5536 = vmatprep.subr.bf16.mxu0 %v6217_v3 }
0x1cc5   :  { %5538 = vmatpush3.bf16.msra.mxu0 %v7737_v0 }
0x1cc6   :  { %5539 = vmatprep.subr.bf16.mxu0 %v6217_v3 }
0x1cc9   :  { %5541 = vmatpush3.bf16.msra.mxu0 %v7747_v56 }
0x1cca   :  { %5542 = vmatprep.subr.bf16.mxu0 %v6217_v3 }
0x1ccd   :  { %5544 = vmatpush3.bf16.msra.mxu0 %v7754_v53 }
0x1cce   :  { %5545 = vmatprep.subr.bf16.mxu0 %v6217_v3 }
0x1cd1   :  { %5547 = vmatpush3.bf16.msra.mxu0 %v7760_v52 }
0x1cd2   :  { %5572 = vmatprep.subr.bf16.mxu0 %v6217_v3 }
0x1d87   :  { %v3686_v44 = vpop.f32.mrb[74].mxu0 }
0x1d88   :  { %v3687_v29 = vadd.f32 %v3686_v44, %v7882_v49  ;;  %v4716_v27 = vpop.f32.mrb[75].mxu0  ;;  %v3614_v49 = vsel %vm3312_vm9, %v3610_v54, 0.0 }
0x1d8a   :  { %v4318_v40 = vmul.f32 -1.442695, %v3687_v29 }
0x1d8c   :  { %6031 = vpow2.f32 %v4318_v40 }
0x1d8d   :  { %6033 = vtanh.f32 %v3687_v29 }
0x1d96   :  { %v6032_v37 = vpop.eup %6031 }
0x1d97   :  { %v3694_v35 = vadd.f32 1.0, %v6032_v37  ;;  %v6034_v24 = vpop.eup %6033 }
0x1d99   :  { %6035 = vrcp.f32 %v3694_v35 }
0x1da3   :  { %v6036_v58 = vpop.eup %6035 }
0x1da4   :  { %v3697_v42 = vsel %vm7894_vm8, %v6034_v24, %v6036_v58 }
0x1da5   :  { %3700 = vrot.lane.b32.xlu0 %v3697_v42, %s6210_s5  ;;  %3698 = vrot.lane.b32.xlu1 %v3697_v42, %s6215_s0 }
0x1da9   :  { %3702 = vrot.lane.b32.xlu1 %v3697_v42, %s6219_s10 }
0x1e17   :  { %v3701_v14 = vpop.permute.xlu0 %3700  ;;  %v3699_v46 = vpop.permute.xlu1 %3698 }
0x1e18   :  { %v3705_v16 = vmul.f32 %v3701_v14, %v3697_v42  ;;  %v3704_v4 = vmul.f32 %v3699_v46, %v3614_v49 }
0x1e1a   :  { %v3706_v62 = vadd.f32 %v3705_v16, %v3704_v4  ;;  %v4098_v16 = vld [vmem:[#allocation16] sm:$0xff]  ;;  %v4099_v4 = vld [vmem:[#allocation16 + $0x8] sm:$0xff] }
0x1e1b   :  { %v3703_v20 = vpop.permute.xlu1 %3702 }
0x1e1c   :  { %6037 = vtanh.f32 %v3706_v62 }
0x1e26   :  { %v6038_v18 = vpop.eup %6037 }
0x1e27   :  { %v3708_v5 = vmul.f32 %v6038_v18, %v3703_v20  ;;  %v5597_v18 = vpack.c.bf16 %v4099_v4, %v4098_v16  ;;  %v4101_v20 = vld [vmem:[#allocation16 + $0x18] sm:$0xff] }
0x1e29   :  { %4750 = vmatmul.mubr.msk.f32.vlgmr.msra.gmra.mrb[44].mxu1 %vm3312_vm9, %v3708_v5 }
0x1e2a   :  { %5550 = vmatpush3.bf16.msra.mxu1 %v7715_v63  ;;  %4819 = vmatprep.mubr.msk.f32.mxu1 %vm6218_vm5, %v8106_v33 }
0x1e2b   :  { %5551 = vmatprep.subr.bf16.mxu1 %v6217_v3 }
0x1e2e   :  { %5553 = vmatpush3.bf16.msra.mxu1 %v7721_v15 }
0x1e2f   :  { %5554 = vmatprep.subr.bf16.mxu1 %v6217_v3 }
0x1e32   :  { %5556 = vmatpush3.bf16.msra.mxu1 %v7725_v10 }
0x1e33   :  { %5557 = vmatprep.subr.bf16.mxu1 %v6217_v3 }
0x1e36   :  { %5559 = vmatpush3.bf16.msra.mxu1 %v7729_v48 }
0x1e37   :  { %5560 = vmatprep.subr.bf16.mxu1 %v6217_v3 }
0x1e3a   :  { %5562 = vmatpush3.bf16.msra.mxu1 %v7737_v0 }
0x1e3b   :  { %5563 = vmatprep.subr.bf16.mxu1 %v6217_v3 }
0x1e3e   :  { %5565 = vmatpush3.bf16.msra.mxu1 %v7747_v56 }
0x1e3f   :  { %5566 = vmatprep.subr.bf16.mxu1 %v6217_v3 }
0x1e42   :  { %5568 = vmatpush3.bf16.msra.mxu1 %v7754_v53 }
0x1e43   :  { %5569 = vmatprep.subr.bf16.mxu1 %v6217_v3 }
0x1e46   :  { %5571 = vmatpush3.bf16.msra.mxu1 %v7760_v52 }
0x1e47   :  { %5596 = vmatprep.subr.bf16.mxu1 %v6217_v3 }
0x1efc   :  { %v3782_v57 = vpop.f32.mrb[44].mxu1 }
0x1efd   :  { %v3783_v36 = vadd.f32 %v3782_v57, %v7884_v30  ;;  %v4751_v2 = vpop.f32.mrb[45].mxu1  ;;  %v3710_v30 = vsel %vm3312_vm9, %v3706_v62, 0.0  ;;  %v4100_v62 = vld [vmem:[#allocation16 + $0x10] sm:$0xff]  ;;  %v4102_v57 = vld [vmem:[#allocation16 + $0x20] sm:$0xff] }
0x1efe   :  { %v5600_v5 = vpack.c.bf16 %v4101_v20, %v4100_v62 }
0x1eff   :  { %v4319_v7 = vmul.f32 -1.442695, %v3783_v36 }
0x1f01   :  { %6039 = vpow2.f32 %v4319_v7  ;;  %v4104_v7 = vld [vmem:[#allocation16 + $0x30] sm:$0xff] }
0x1f02   :  { %6041 = vtanh.f32 %v3783_v36  ;;  %v4103_v36 = vld [vmem:[#allocation16 + $0x28] sm:$0xff] }
0x1f03   :  { %v5603_v2 = vpack.c.bf16 %v4103_v36, %v4102_v57 }
0x1f0b   :  { %v6040_v26 = vpop.eup %6039 }
0x1f0c   :  { %v3790_v21 = vadd.f32 1.0, %v6040_v26  ;;  %v6042_v41 = vpop.eup %6041  ;;  %v4105_v26 = vld [vmem:[#allocation16 + $0x38] sm:$0xff] }
0x1f0e   :  { %6043 = vrcp.f32 %v3790_v21  ;;  %v5606_v21 = vpack.c.bf16 %v4105_v26, %v4104_v7 }
0x1f18   :  { %v6044_v11 = vpop.eup %6043 }
0x1f19   :  { %v3793_v55 = vsel %vm7894_vm8, %v6042_v41, %v6044_v11 }
0x1f1a   :  { %3796 = vrot.lane.b32.xlu1 %v3793_v55, %s6210_s5  ;;  %3794 = vrot.lane.b32.xlu0 %v3793_v55, %s6215_s0 }
0x1f1e   :  { %3798 = vrot.lane.b32.xlu0 %v3793_v55, %s6219_s10 }
0x1f8c   :  { %v3797_v51 = vpop.permute.xlu1 %3796  ;;  %v3795_v6 = vpop.permute.xlu0 %3794 }
0x1f8d   :  { %v3801_v61 = vmul.f32 %v3797_v51, %v3793_v55  ;;  %v3800_v17 = vmul.f32 %v3795_v6, %v3710_v30 }
0x1f8f   :  { %v3802_v28 = vadd.f32 %v3801_v61, %v3800_v17  ;;  %v4106_v61 = vld [vmem:[#allocation16 + $0x40] sm:$0xff]  ;;  %v4107_v17 = vld [vmem:[#allocation16 + $0x48] sm:$0xff] }
0x1f90   :  { %v3799_v50 = vpop.permute.xlu0 %3798 }
0x1f91   :  { %6045 = vtanh.f32 %v3802_v28 }
0x1f9b   :  { %v6046_v23 = vpop.eup %6045 }
0x1f9c   :  { %v3804_v47 = vmul.f32 %v6046_v23, %v3799_v50  ;;  %v4108_v23 = vld [vmem:[#allocation16 + $0x50] sm:$0xff]  ;;  %v4109_v50 = vld [vmem:[#allocation16 + $0x58] sm:$0xff] }
0x1f9e   :  { %4785 = vmatmul.mubr.msk.f32.vlgmr.msra.gmra.mrb[76].mxu0 %vm3312_vm9, %v3804_v47  ;;  %v5612_v47 = vpack.c.bf16 %v4109_v50, %v4108_v23 }
0x1f9f   :  { %5574 = vmatpush3.bf16.msra.mxu0 %v7715_v63  ;;  %4854 = vmatprep.mubr.msk.f32.mxu0 %vm6218_vm5, %v8106_v33 }
0x1fa0   :  { %5575 = vmatprep.subr.bf16.mxu0 %v6217_v3 }
0x1fa3   :  { %5577 = vmatpush3.bf16.msra.mxu0 %v7721_v15 }
0x1fa4   :  { %5578 = vmatprep.subr.bf16.mxu0 %v6217_v3 }
0x1fa7   :  { %5580 = vmatpush3.bf16.msra.mxu0 %v7725_v10 }
0x1fa8   :  { %5581 = vmatprep.subr.bf16.mxu0 %v6217_v3 }
0x1fab   :  { %5583 = vmatpush3.bf16.msra.mxu0 %v7729_v48 }
0x1fac   :  { %5584 = vmatprep.subr.bf16.mxu0 %v6217_v3 }
0x1faf   :  { %5586 = vmatpush3.bf16.msra.mxu0 %v7737_v0 }
0x1fb0   :  { %5587 = vmatprep.subr.bf16.mxu0 %v6217_v3 }
0x1fb3   :  { %5589 = vmatpush3.bf16.msra.mxu0 %v7747_v56 }
0x1fb4   :  { %5590 = vmatprep.subr.bf16.mxu0 %v6217_v3 }
0x1fb7   :  { %5592 = vmatpush3.bf16.msra.mxu0 %v7754_v53 }
0x1fb8   :  { %5593 = vmatprep.subr.bf16.mxu0 %v6217_v3 }
0x1fbb   :  { %5595 = vmatpush3.bf16.msra.mxu0 %v7760_v52  ;;  %v3806_v52 = vsel %vm3312_vm9, %v3802_v28, 0.0  ;;  %v5609_v28 = vpack.c.bf16 %v4107_v17, %v4106_v61 }
0x2071   :  { %v3878_v63 = vpop.f32.mrb[76].mxu0 }
0x2072   :  { %v3879_v15 = vadd.f32 %v3878_v63, %v7886_v60  ;;  %v4786_v10 = vpop.f32.mrb[77].mxu0  ;;  %v4111_v63 = vld [vmem:[#allocation16 + $0x68] sm:$0xff] }
0x2074   :  { %v4320_v48 = vmul.f32 -1.442695, %v3879_v15 }
0x2076   :  { %6047 = vpow2.f32 %v4320_v48 }
0x2077   :  { %6049 = vtanh.f32 %v3879_v15 }
0x2080   :  { %v6048_v1 = vpop.eup %6047 }
0x2081   :  { %v3886_v0 = vadd.f32 1.0, %v6048_v1  ;;  %v6050_v8 = vpop.eup %6049  ;;  %v4112_v1 = vld [vmem:[#allocation16 + $0x70] sm:$0xff] }
0x2083   :  { %6051 = vrcp.f32 %v3886_v0  ;;  %v4113_v0 = vld [vmem:[#allocation16 + $0x78] sm:$0xff] }
0x208d   :  { %v6052_v56 = vpop.eup %6051 }
0x208e   :  { %v3889_v59 = vsel %vm7894_vm8, %v6050_v8, %v6052_v56  ;;  %v5618_v56 = vpack.c.bf16 %v4113_v0, %v4112_v1 }
0x208f   :  { %3892 = vrot.lane.b32.xlu0 %v3889_v59, %s6210_s5  ;;  %3890 = vrot.lane.b32.xlu1 %v3889_v59, %s6215_s0 }
0x2093   :  { %3894 = vrot.lane.b32.xlu1 %v3889_v59, %s6219_s10 }
0x2101   :  { %v3893_v53 = vpop.permute.xlu0 %3892  ;;  %v3891_v60 = vpop.permute.xlu1 %3890 }
0x2102   :  { %v3897_v9 = vmul.f32 %v3893_v53, %v3889_v59  ;;  %v3896_v32 = vmul.f32 %v3891_v60, %v3806_v52 }
0x2104   :  { %v3898_v45 = vadd.f32 %v3897_v9, %v3896_v32 }
0x2105   :  { %v3895_v13 = vpop.permute.xlu1 %3894 }
0x2106   :  { %6053 = vtanh.f32 %v3898_v45 }
0x2110   :  { %v6054_v12 = vpop.eup %6053 }
0x2111   :  { %v3900_v38 = vmul.f32 %v6054_v12, %v3895_v13  ;;  %v4323_v12 = vld [vmem:[%s8092_s12] ss:$0 sm:$0xff] }
0x2113   :  { %4820 = vmatmul.mubr.msk.f32.vlgmr.msra.gmra.mrb[46].mxu1 %vm3312_vm9, %v3900_v38 }
0x2114   :  { %4889 = vmatprep.mubr.msk.f32.mxu1 %vm6218_vm5, %v8106_v33  ;;  %5598 = vmatpush3.bf16.msra.mxu1 %v5597_v18 }
0x2115   :  { %5599 = vmatprep.subr.bf16.mxu1 %v6217_v3 }
0x2118   :  { %5601 = vmatpush3.bf16.msra.mxu1 %v5600_v5 }
0x2119   :  { %5602 = vmatprep.subr.bf16.mxu1 %v6217_v3 }
0x211c   :  { %5604 = vmatpush3.bf16.msra.mxu1 %v5603_v2 }
0x211d   :  { %5605 = vmatprep.subr.bf16.mxu1 %v6217_v3 }
0x2120   :  { %5607 = vmatpush3.bf16.msra.mxu1 %v5606_v21 }
0x2121   :  { %5608 = vmatprep.subr.bf16.mxu1 %v6217_v3 }
0x2124   :  { %5610 = vmatpush3.bf16.msra.mxu1 %v5609_v28 }
0x2125   :  { %5611 = vmatprep.subr.bf16.mxu1 %v6217_v3 }
0x2128   :  { %5613 = vmatpush3.bf16.msra.mxu1 %v5612_v47 }
0x2129   :  { %5614 = vmatprep.subr.bf16.mxu1 %v6217_v3 }
0x21e6   :  { %v3974_v54 = vpop.f32.mrb[46].mxu1 }
0x21e7   :  { %v3975_v22 = vadd.f32 %v3974_v54, %v7890_v31  ;;  %v4821_v39 = vpop.f32.mrb[47].mxu1  ;;  %v3902_v31 = vsel %vm3312_vm9, %v3898_v45, 0.0 }
0x21e9   :  { %v4321_v25 = vmul.f32 -1.442695, %v3975_v22 }
0x21eb   :  { %6055 = vpow2.f32 %v4321_v25 }
0x21ec   :  { %6057 = vtanh.f32 %v3975_v22 }
0x21f5   :  { %v6056_v44 = vpop.eup %6055 }
0x21f6   :  { %v3982_v29 = vadd.f32 1.0, %v6056_v44  ;;  %v6058_v27 = vpop.eup %6057 }
0x21f8   :  { %6059 = vrcp.f32 %v3982_v29 }
0x2202   :  { %v6060_v40 = vpop.eup %6059 }
0x2203   :  { %v3985_v37 = vsel %vm7894_vm8, %v6058_v27, %v6060_v40 }
0x2204   :  { %3988 = vrot.lane.b32.xlu1 %v3985_v37, %s6210_s5  ;;  %3986 = vrot.lane.b32.xlu0 %v3985_v37, %s6215_s0 }
0x2208   :  { %3990 = vrot.lane.b32.xlu0 %v3985_v37, %s6219_s10 }
0x2276   :  { %v3989_v33 = vpop.permute.xlu1 %3988  ;;  %v3987_v35 = vpop.permute.xlu0 %3986 }
0x2277   :  { %v3993_v24 = vmul.f32 %v3989_v33, %v3985_v37  ;;  %v3992_v58 = vmul.f32 %v3987_v35, %v3902_v31 }
0x2279   :  { %v3994_v42 = vadd.f32 %v3993_v24, %v3992_v58 }
0x227a   :  { %v3991_v49 = vpop.permute.xlu0 %3990 }
0x227b   :  { %6061 = vtanh.f32 %v3994_v42  ;;  %v3998_v53 = vsel %vm3312_vm9, %v3994_v42, 0.0 }
0x2285   :  { %v6062_v14 = vpop.eup %6061 }
0x2286   :  { %v3996_v46 = vmul.f32 %v6062_v14, %v3991_v49 }
0x2288   :  { %4855 = vmatmul.mubr.msk.f32.vlgmr.msra.gmra.mrb[78].mxu0 %vm3312_vm9, %v3996_v46 }
0x235b   :  { %v4070_v41 = vpop.f32.mrb[78].mxu0 }
0x235c   :  { %v4071_v11 = vadd.f32 %v4070_v41, %v7892_v34  ;;  %v4856_v55 = vpop.f32.mrb[79].mxu0  ;;  %v4110_v34 = vld [vmem:[#allocation16 + $0x60] sm:$0xff] }
0x235d   :  { %v5615_v15 = vpack.c.bf16 %v4111_v63, %v4110_v34 }
0x235e   :  { %v4322_v51 = vmul.f32 -1.442695, %v4071_v11 }
0x235f   :  { %5616 = vmatpush3.bf16.msra.mxu1 %v5615_v15 }
0x2360   :  { %6063 = vpow2.f32 %v4322_v51  ;;  %5617 = vmatprep.subr.bf16.mxu1 %v6217_v3 }
0x2361   :  { %6065 = vtanh.f32 %v4071_v11 }
0x2363   :  { %5619 = vmatpush3.bf16.msra.mxu1 %v5618_v56 }
0x236a   :  { %v6064_v30 = vpop.eup %6063 }
0x236b   :  { %v4078_v6 = vadd.f32 1.0, %v6064_v30  ;;  %v6066_v10 = vpop.eup %6065 }
0x236d   :  { %6067 = vrcp.f32 %v4078_v6 }
0x2377   :  { %v6068_v48 = vpop.eup %6067 }
0x2378   :  { %v4081_v8 = vsel %vm7894_vm8, %v6066_v10, %v6068_v48 }
0x2379   :  { %4084 = vrot.lane.b32.xlu0 %v4081_v8, %s6210_s5  ;;  %4082 = vrot.lane.b32.xlu1 %v4081_v8, %s6215_s0 }
0x237d   :  { %4086 = vrot.lane.b32.xlu1 %v4081_v8, %s6219_s10 }
0x23eb   :  { %v4085_v59 = vpop.permute.xlu0 %4084  ;;  %v4083_v52 = vpop.permute.xlu1 %4082 }
0x23ec   :  { %v4089_v60 = vmul.f32 %v4085_v59, %v4081_v8  ;;  %v4088_v3 = vmul.f32 %v4083_v52, %v3998_v53 }
0x23ee   :  { %v4090_v9 = vadd.f32 %v4089_v60, %v4088_v3 }
0x23ef   :  { %v4087_v19 = vpop.permute.xlu1 %4086 }
0x23f0   :  { %6069 = vtanh.f32 %v4090_v9 }
0x23fa   :  { %v6070_v32 = vpop.eup %6069 }
0x23fb   :  { %v4092_v45 = vmul.f32 %v6070_v32, %v4087_v19 }
0x23fd   :  { %4890 = vmatmul.mubr.msk.f32.vlgmr.msra.gmra.mrb[48].mxu1 %vm3312_vm9, %v4092_v45 }
0x24d0   :  { %v4187_v13 = vpop.f32.mrb[48].mxu1 }
0x24d1   :  { %v4188_v38 = vadd.f32 %v4323_v12, %v4187_v13  ;;  %v4891_v54 = vpop.f32.mrb[49].mxu1 }
0x24d3   :  { %4191 = vst [vmem:[%s8093_s13] sm:$0xff] %v4188_v38 }
0x24d4   :  { %4196 = vsyncpa [#allocation8], 1 }
0x24d5   :  { %4197 = vsyncpa [#allocation12], 1 }
0x24d6   :  { %4198 = vsyncpa [#allocation15], 1 }
0x24d7   :  { %4199 = vsyncpa [#allocation9], 1 }

</bundles_post_ra>
